<compile_context>
chip_gen: v6e
topology: v6e:2x2x1
jax: 0.10.0
libtpu: 0.0.40
codegen_flags: <defaults>
</compile_context>

<pallas_src>
import jax
import jax.numpy as jnp
from jax.experimental import pallas as pl
from jax.experimental.pallas import tpu as pltpu

RESNET_FEATURES = 512                                   # resnet18 fc.in_features
VIT_FEATURES = 768                                      # vit_b_16 heads.head.in_features
BACKBONE_FEATURES = RESNET_FEATURES + VIT_FEATURES      # 1280 (concat width)
HIDDEN = 512
NUM_CLASSES = 2
OUT_PAD = 128                                           # lane-dense padded output width


def _round_up(x, m):
    return ((x + m - 1) // m) * m


def ensemble_kernel(x_ref, wb_ref, bb_ref, w1_ref, b1_ref, w2_ref, b2_ref,
                    out_ref, acc_ref):
    """K-tiled backbone projection + fused classifier epilogue."""
    k = pl.program_id(1)

    # Partial backbone projection: (tm, tk)bf16 @ (tk, 1280)bf16 -> f32.
    partial = jnp.dot(x_ref[...], wb_ref[...],
                      preferred_element_type=jnp.float32)

    @pl.when(k == 0)
    def _first():
        # Fold the backbone bias into the first partial product: no separate
        # zero-init store sweep, and the +bb add disappears from the epilogue.
        acc_ref[...] = partial + bb_ref[...]

    @pl.when(k != 0)
    def _rest():
        acc_ref[...] += partial

    @pl.when(k == pl.num_programs(1) - 1)
    def _epilogue():
        f = acc_ref[...]                                     # (tm, 1280) f32
        h = jnp.dot(f.astype(jnp.bfloat16), w1_ref[...],
                    preferred_element_type=jnp.float32) + b1_ref[...]
        h = jnp.maximum(h, 0.0)                              # ReLU (f32 epilogue)
        # Dropout layers are identity at inference time.
        o = jnp.dot(h.astype(jnp.bfloat16), w2_ref[...],
                    preferred_element_type=jnp.float32) + b2_ref[...]
        out_ref[...] = o.astype(out_ref.dtype)               # (tm, 128) lane-dense


def select_tiles(n, din, *, tm=256, tk=1024):
    """Pick batch / reduction tile sizes (multiples of 16 / 128 respectively)."""
    tm = min(tm, _round_up(max(n, 1), 16))
    # Guarantee >=2 batch tiles for moderate batches so both v7x TensorCores
    # (parallel axis) get work; tiny batches stay in a single small tile.
    if pl.cdiv(n, tm) < 2 and n > 128:
        tm = _round_up(pl.cdiv(n, 2), 16)
    tk = min(tk, _round_up(din, 128))
    m_pad = _round_up(n, tm)
    k_pad = _round_up(din, tk)
    return tm, tk, m_pad, k_pad


def pack_params(params, din, k_pad):
    """One-time packing: concat backbone weights, cast to bf16, zero-pad.

    Done once outside the per-call forward so the ~(Din,1280) weight is not
    re-concatenated / re-cast / re-padded (a full HBM round trip) every call.
    """
    wb_full = jnp.concatenate([params["wr"], params["wv"]], axis=1)   # (Din, 1280)
    wb = jnp.zeros((k_pad, BACKBONE_FEATURES), jnp.bfloat16)
    wb = wb.at[:din, :].set(wb_full.astype(jnp.bfloat16))

    bb = jnp.concatenate([params["br"], params["bv"]], axis=1)        # (1, 1280) f32

    w1 = params["w1"].astype(jnp.bfloat16)                            # (1280, 512)
    b1 = params["b1"]                                                 # (1, 512) f32

    w2 = jnp.zeros((HIDDEN, OUT_PAD), jnp.bfloat16)
    w2 = w2.at[:, :NUM_CLASSES].set(params["w2"].astype(jnp.bfloat16))
    b2 = jnp.zeros((1, OUT_PAD), jnp.float32)
    b2 = b2.at[:, :NUM_CLASSES].set(params["b2"])

    return {"wb": wb, "bb": bb, "w1": w1, "b1": b1, "w2": w2, "b2": b2}


def _vmem_limit_bytes():
    """Key the scoped-VMEM request off the chip instead of hard-coding 64 MiB."""
    try:
        cap = pltpu.get_tpu_info().vmem_capacity_bytes
    except Exception:
        cap = 64 * 1024 * 1024
    return min(48 * 1024 * 1024, cap // 2)


def _invariant_spec(shape):
    """BlockSpec for a grid-invariant operand: single-buffered when supported."""
    idx = lambda i, k: (0, 0)
    try:
        return pl.BlockSpec(shape, idx, pipeline_mode=pl.Buffered(1))
    except Exception:
        return pl.BlockSpec(shape, idx)


def ensemble_forward(x_nchw, packed, *, tm, tk):
    n = x_nchw.shape[0]
    x_flat = x_nchw.reshape(n, -1)
    din = x_flat.shape[1]

    k_pad = packed["wb"].shape[0]
    m_pad = _round_up(n, tm)
    assert k_pad % tk == 0

    # bf16 activations, zero padded to tile multiples (exact: padded rows /
    # columns contribute 0 to the dot products and are sliced away).
    x_bf16 = jnp.zeros((m_pad, k_pad), jnp.bfloat16)
    x_bf16 = x_bf16.at[:n, :din].set(x_flat.astype(jnp.bfloat16))

    wb, bb = packed["wb"], packed["bb"]
    w1, b1 = packed["w1"], packed["b1"]
    w2, b2 = packed["w2"], packed["b2"]

    grid = (m_pad // tm, k_pad // tk)

    flops = 2 * m_pad * (k_pad * BACKBONE_FEATURES
                         + BACKBONE_FEATURES * HIDDEN
                         + HIDDEN * OUT_PAD)
    # wb is re-streamed once per batch tile; invariant operands are read once.
    bytes_accessed = (x_bf16.size * 2
                      + grid[0] * wb.size * 2
                      + w1.size * 2 + w2.size * 2
                      + bb.size * 4 + b1.size * 4 + b2.size * 4
                      + m_pad * OUT_PAD * 4)

    out_padded = pl.pallas_call(
        ensemble_kernel,
        out_shape=jax.ShapeDtypeStruct((m_pad, OUT_PAD), jnp.float32),
        grid_spec=pltpu.PrefetchScalarGridSpec(
            num_scalar_prefetch=0,
            grid=grid,
            in_specs=[
                pl.BlockSpec((tm, tk), lambda i, k: (i, k)),                 # x
                pl.BlockSpec((tk, BACKBONE_FEATURES), lambda i, k: (k, 0)),  # W_backbone
                _invariant_spec((1, BACKBONE_FEATURES)),                     # b_backbone
                _invariant_spec((BACKBONE_FEATURES, HIDDEN)),                # W1
                _invariant_spec((1, HIDDEN)),                                # b1
                _invariant_spec((HIDDEN, OUT_PAD)),                          # W2 (padded)
                _invariant_spec((1, OUT_PAD)),                               # b2 (padded)
            ],
            out_specs=pl.BlockSpec((tm, OUT_PAD), lambda i, k: (i, 0)),
            scratch_shapes=[pltpu.VMEM((tm, BACKBONE_FEATURES), jnp.float32)],
        ),
        compiler_params=pltpu.CompilerParams(
            dimension_semantics=("parallel", "arbitrary"),
            vmem_limit_bytes=_vmem_limit_bytes(),
        ),
        cost_estimate=pl.CostEstimate(
            flops=flops, transcendentals=0, bytes_accessed=bytes_accessed),
    )(x_bf16, wb, bb, w1, b1, w2, b2)

    return out_padded[:n, :NUM_CLASSES]


def init_params(key, in_features):
    """Deterministic PyTorch-style uniform(-1/sqrt(fan_in), 1/sqrt(fan_in)) init."""
    def linear(key, fan_in, fan_out):
        kw, kb = jax.random.split(key)
        bound = 1.0 / jnp.sqrt(jnp.float32(fan_in))
        w = jax.random.uniform(kw, (fan_in, fan_out), jnp.float32, -bound, bound)
        b = jax.random.uniform(kb, (1, fan_out), jnp.float32, -bound, bound)
        return w, b

    k1, k2, k3, k4 = jax.random.split(key, 4)
    wr, br = linear(k1, in_features, RESNET_FEATURES)
    wv, bv = linear(k2, in_features, VIT_FEATURES)
    w1, b1 = linear(k3, BACKBONE_FEATURES, HIDDEN)
    w2, b2 = linear(k4, HIDDEN, NUM_CLASSES)
    return {"wr": wr, "br": br, "wv": wv, "bv": bv,
            "w1": w1, "b1": b1, "w2": w2, "b2": b2}


def reference_forward(x_nchw, params):
    """Pure-JAX reference using the same bf16-weight / f32-accumulate recipe."""
    n = x_nchw.shape[0]
    x = x_nchw.reshape(n, -1).astype(jnp.bfloat16)
    wb = jnp.concatenate([params["wr"], params["wv"]], axis=1).astype(jnp.bfloat16)
    bb = jnp.concatenate([params["br"], params["bv"]], axis=1)
    f = jnp.dot(x, wb, preferred_element_type=jnp.float32) + bb
    h = jnp.dot(f.astype(jnp.bfloat16), params["w1"].astype(jnp.bfloat16),
                preferred_element_type=jnp.float32) + params["b1"]
    h = jnp.maximum(h, 0.0)
    return jnp.dot(h.astype(jnp.bfloat16), params["w2"].astype(jnp.bfloat16),
                   preferred_element_type=jnp.float32) + params["b2"]


if __name__ == "__main__":
    key = jax.random.PRNGKey(0)
    kx, kp = jax.random.split(key)

    # Small NCHW image batch (torchvision backbones expect 3 channels).
    N, C, H, W = 2, 3, 16, 16
    x = jax.random.normal(kx, (N, C, H, W), jnp.float32)

    din = C * H * W
    params = init_params(kp, din)

    # One-time tile selection + weight packing (hoisted out of the forward).
    tm, tk, m_pad, k_pad = select_tiles(N, din)
    packed = pack_params(params, din, k_pad)

    out = ensemble_forward(x, packed, tm=tm, tk=tk)
    out = jax.block_until_ready(out)

    ref = reference_forward(x, params)
    assert out.shape == (N, NUM_CLASSES)
    assert jnp.allclose(out, ref, atol=1e-2, rtol=1e-2), (
        f"max abs err {jnp.max(jnp.abs(out - ref))}")

    print("KERNEL_OK")
</pallas_src>

<mosaic_0001>
module attributes {stable_mosaic.version = 11 : i64} {
  func.func @ensemble_kernel(%arg0: i32, %arg1: i32, %arg2: memref<16x768xbf16, #tpu.memory_space<vmem>>, %arg3: memref<768x1280xbf16, #tpu.memory_space<vmem>>, %arg4: memref<1x1280xf32, #tpu.memory_space<vmem>>, %arg5: memref<1280x512xbf16, #tpu.memory_space<vmem>>, %arg6: memref<1x512xf32, #tpu.memory_space<vmem>>, %arg7: memref<512x128xbf16, #tpu.memory_space<vmem>>, %arg8: memref<1x128xf32, #tpu.memory_space<vmem>>, %arg9: memref<16x128xf32, #tpu.memory_space<vmem>>, %arg10: memref<16x1280xf32, #tpu.memory_space<vmem>>) attributes {dimension_semantics = [#tpu.dimension_semantics<parallel>, #tpu.dimension_semantics<arbitrary>], iteration_bounds = array<i64: 1, 1>, scalar_prefetch = 0 : i64, scratch_operands = 1 : i64, tpu.core_type = #tpu.core_type<tc>, window_params = [{transform_indices = @transform_0, window_bounds = array<i64: 16, 768>}, {transform_indices = @transform_1, window_bounds = array<i64: 768, 1280>}, {pipeline_mode = #tpu.pipeline_mode<synchronous>, transform_indices = @transform_2, window_bounds = array<i64: 1, 1280>}, {pipeline_mode = #tpu.pipeline_mode<synchronous>, transform_indices = @transform_3, window_bounds = array<i64: 1280, 512>}, {pipeline_mode = #tpu.pipeline_mode<synchronous>, transform_indices = @transform_4, window_bounds = array<i64: 1, 512>}, {pipeline_mode = #tpu.pipeline_mode<synchronous>, transform_indices = @transform_5, window_bounds = array<i64: 512, 128>}, {pipeline_mode = #tpu.pipeline_mode<synchronous>, transform_indices = @transform_6, window_bounds = array<i64: 1, 128>}, {transform_indices = @transform_7, window_bounds = array<i64: 16, 128>}]} {
    %c0 = arith.constant 0 : index
    %c0_0 = arith.constant 0 : index
    %0 = vector.load %arg2[%c0, %c0_0] : memref<16x768xbf16, #tpu.memory_space<vmem>>, vector<16x768xbf16>
    %c0_1 = arith.constant 0 : index
    %c0_2 = arith.constant 0 : index
    %1 = vector.load %arg3[%c0_1, %c0_2] : memref<768x1280xbf16, #tpu.memory_space<vmem>>, vector<768x1280xbf16>
    %cst = arith.constant dense<0.000000e+00> : vector<16x1280xf32>
    %2 = tpu.matmul %0, %1, %cst {dimension_numbers = #tpu.dot_dimension_numbers<[1], [0], [0], [1], [0, 0, 1, 1], [], []>} : vector<16x768xbf16>, vector<768x1280xbf16>, vector<16x1280xf32> -> vector<16x1280xf32>
    %c0_i32 = arith.constant 0 : i32
    %3 = arith.cmpi eq, %arg1, %c0_i32 : i32
    %4 = arith.extui %3 : i1 to i32
    %c0_i32_3 = arith.constant 0 : i32
    %5 = arith.cmpi ne, %4, %c0_i32_3 : i32
    scf.if %5 {
      %c0_8 = arith.constant 0 : index
      %c0_9 = arith.constant 0 : index
      %12 = vector.load %arg4[%c0_8, %c0_9] : memref<1x1280xf32, #tpu.memory_space<vmem>>, vector<1x1280xf32>
      %13 = vector.broadcast %12 : vector<1x1280xf32> to vector<16x1280xf32>
      %14 = arith.addf %2, %13 : vector<16x1280xf32>
      %c0_10 = arith.constant 0 : index
      %c0_11 = arith.constant 0 : index
      %15 = vector.load %arg10[%c0_10, %c0_11] : memref<16x1280xf32, #tpu.memory_space<vmem>>, vector<16x1280xf32>
      tpu.vector_store %arg10[%c0_10, %c0_11], %14 {strides = array<i32>} : memref<16x1280xf32, #tpu.memory_space<vmem>>, vector<16x1280xf32>,
    } else {
    }
    %c0_i32_4 = arith.constant 0 : i32
    %6 = arith.cmpi ne, %arg1, %c0_i32_4 : i32
    %7 = arith.extui %6 : i1 to i32
    %c0_i32_5 = arith.constant 0 : i32
    %8 = arith.cmpi ne, %7, %c0_i32_5 : i32
    scf.if %8 {
      %c0_8 = arith.constant 0 : index
      %c0_9 = arith.constant 0 : index
      %12 = vector.load %arg10[%c0_8, %c0_9] : memref<16x1280xf32, #tpu.memory_space<vmem>>, vector<16x1280xf32>
      %13 = arith.addf %12, %2 : vector<16x1280xf32>
      %c0_10 = arith.constant 0 : index
      %c0_11 = arith.constant 0 : index
      %14 = vector.load %arg10[%c0_10, %c0_11] : memref<16x1280xf32, #tpu.memory_space<vmem>>, vector<16x1280xf32>
      tpu.vector_store %arg10[%c0_10, %c0_11], %13 {strides = array<i32>} : memref<16x1280xf32, #tpu.memory_space<vmem>>, vector<16x1280xf32>,
    } else {
    }
    %c0_i32_6 = arith.constant 0 : i32
    %9 = arith.cmpi eq, %arg1, %c0_i32_6 : i32
    %10 = arith.extui %9 : i1 to i32
    %c0_i32_7 = arith.constant 0 : i32
    %11 = arith.cmpi ne, %10, %c0_i32_7 : i32
    scf.if %11 {
      %c0_8 = arith.constant 0 : index
      %c0_9 = arith.constant 0 : index
      %12 = vector.load %arg10[%c0_8, %c0_9] : memref<16x1280xf32, #tpu.memory_space<vmem>>, vector<16x1280xf32>
      %13 = arith.truncf %12 : vector<16x1280xf32> to vector<16x1280xbf16>
      %c0_10 = arith.constant 0 : index
      %c0_11 = arith.constant 0 : index
      %14 = vector.load %arg5[%c0_10, %c0_11] : memref<1280x512xbf16, #tpu.memory_space<vmem>>, vector<1280x512xbf16>
      %cst_12 = arith.constant dense<0.000000e+00> : vector<16x512xf32>
      %15 = tpu.matmul %13, %14, %cst_12 {dimension_numbers = #tpu.dot_dimension_numbers<[1], [0], [0], [1], [0, 0, 1, 1], [], []>} : vector<16x1280xbf16>, vector<1280x512xbf16>, vector<16x512xf32> -> vector<16x512xf32>
      %c0_13 = arith.constant 0 : index
      %c0_14 = arith.constant 0 : index
      %16 = vector.load %arg6[%c0_13, %c0_14] : memref<1x512xf32, #tpu.memory_space<vmem>>, vector<1x512xf32>
      %17 = vector.broadcast %16 : vector<1x512xf32> to vector<16x512xf32>
      %18 = arith.addf %15, %17 : vector<16x512xf32>
      %cst_15 = arith.constant 0.000000e+00 : f32
      %19 = vector.broadcast %cst_15 : f32 to vector<16x512xf32>
      %20 = arith.maximumf %18, %19 : vector<16x512xf32>
      %21 = arith.truncf %20 : vector<16x512xf32> to vector<16x512xbf16>
      %c0_16 = arith.constant 0 : index
      %c0_17 = arith.constant 0 : index
      %22 = vector.load %arg7[%c0_16, %c0_17] : memref<512x128xbf16, #tpu.memory_space<vmem>>, vector<512x128xbf16>
      %cst_18 = arith.constant dense<0.000000e+00> : vector<16x128xf32>
      %23 = tpu.matmul %21, %22, %cst_18 {dimension_numbers = #tpu.dot_dimension_numbers<[1], [0], [0], [1], [0, 0, 1, 1], [], []>} : vector<16x512xbf16>, vector<512x128xbf16>, vector<16x128xf32> -> vector<16x128xf32>
      %c0_19 = arith.constant 0 : index
      %c0_20 = arith.constant 0 : index
      %24 = vector.load %arg8[%c0_19, %c0_20] : memref<1x128xf32, #tpu.memory_space<vmem>>, vector<1x128xf32>
      %25 = vector.broadcast %24 : vector<1x128xf32> to vector<16x128xf32>
      %26 = arith.addf %23, %25 : vector<16x128xf32>
      %c0_21 = arith.constant 0 : index
      %c0_22 = arith.constant 0 : index
      %27 = vector.load %arg9[%c0_21, %c0_22] : memref<16x128xf32, #tpu.memory_space<vmem>>, vector<16x128xf32>
      tpu.vector_store %arg9[%c0_21, %c0_22], %26 {strides = array<i32>} : memref<16x128xf32, #tpu.memory_space<vmem>>, vector<16x128xf32>,
    } else {
    }
    return
  }
  func.func @transform_0(%arg0: i32, %arg1: i32) -> (i32, i32) {
    %c0_i32 = arith.constant 0 : i32
    return %arg0, %arg1 : i32, i32
  }
  func.func @transform_1(%arg0: i32, %arg1: i32) -> (i32, i32) {
    %c0_i32 = arith.constant 0 : i32
    %c0_i32_0 = arith.constant 0 : i32
    return %arg1, %c0_i32 : i32, i32
  }
  func.func @transform_2(%arg0: i32, %arg1: i32) -> (i32, i32) {
    %c0_i32 = arith.constant 0 : i32
    %c0_i32_0 = arith.constant 0 : i32
    %c0_i32_1 = arith.constant 0 : i32
    return %c0_i32, %c0_i32_0 : i32, i32
  }
  func.func @transform_3(%arg0: i32, %arg1: i32) -> (i32, i32) {
    %c0_i32 = arith.constant 0 : i32
    %c0_i32_0 = arith.constant 0 : i32
    %c0_i32_1 = arith.constant 0 : i32
    return %c0_i32, %c0_i32_0 : i32, i32
  }
  func.func @transform_4(%arg0: i32, %arg1: i32) -> (i32, i32) {
    %c0_i32 = arith.constant 0 : i32
    %c0_i32_0 = arith.constant 0 : i32
    %c0_i32_1 = arith.constant 0 : i32
    return %c0_i32, %c0_i32_0 : i32, i32
  }
  func.func @transform_5(%arg0: i32, %arg1: i32) -> (i32, i32) {
    %c0_i32 = arith.constant 0 : i32
    %c0_i32_0 = arith.constant 0 : i32
    %c0_i32_1 = arith.constant 0 : i32
    return %c0_i32, %c0_i32_0 : i32, i32
  }
  func.func @transform_6(%arg0: i32, %arg1: i32) -> (i32, i32) {
    %c0_i32 = arith.constant 0 : i32
    %c0_i32_0 = arith.constant 0 : i32
    %c0_i32_1 = arith.constant 0 : i32
    return %c0_i32, %c0_i32_0 : i32, i32
  }
  func.func @transform_7(%arg0: i32, %arg1: i32) -> (i32, i32) {
    %c0_i32 = arith.constant 0 : i32
    %c0_i32_0 = arith.constant 0 : i32
    return %arg0, %c0_i32 : i32, i32
  }
}

</mosaic_0001>

<bundles_post_ra>
// kernel: tpu_custom_call.1
= control target key start
LH: loop header
LB: loop body
LE: loop exit
PB: predicated region body
PF: predicated region fallthrough
CT: control target
= control target key end

     0   :  { %12 = vsyncpa [#allocation4], 0  ;;  %s9233_s0 = inlined_call_operand.hbm [shape: bf16[16,768], index: 0, kind: input, shape index: {}]   ;;  %s9234_s1 = inlined_call_operand.hbm [shape: bf16[768,1280], index: 1, kind: input, shape index: {}]   ;;  %s9235_s2 = inlined_call_operand.hbm [shape: f32[1,1280], index: 2, kind: input, shape index: {}]   ;;  %s9236_s3 = inlined_call_operand.hbm [shape: bf16[1280,512], index: 3, kind: input, shape index: {}]   ;;  %s9237_s4 = inlined_call_operand.hbm [shape: f32[1,512], index: 4, kind: input, shape index: {}]   ;;  %s9238_s5 = inlined_call_operand.hbm [shape: bf16[512,128], index: 5, kind: input, shape index: {}]   ;;  %s9239_s6 = inlined_call_operand.hbm [shape: f32[1,128], index: 6, kind: input, shape index: {}]   ;;  %s9240_s7 = inlined_call_operand.hbm [shape: f32[16,128], index: 7, kind: output, shape index: {}]  }
   0x1   :  { %13 = vsyncpa [#allocation7], 0 }
   0x2   :  { %14 = vsyncpa [#allocation10], 0 }
   0x3   :  { %15 = vsyncpa [#allocation13], 0 }
   0x4   :  { %16 = vsyncpa [#allocation5], 0  ;;  %s8950_s24 = smov [#allocation6]  }
   0x5   :  { %s34_s25 = sshll.u32 %s8950_s24, 4  ;;  %s35_s25 = int_to_ptr.vmem [resolvable:$true] %s34_s25 }
   0x6   :  { %s8788_s26 = scalar_lea.vmem %s35_s25, 61440  ;;  %p8793_p1 = scmp.lt.s32.totalorder %s35_s25, %s35_s25 }
   0x7   :  { %p8789_p0 = scmp.ne.s32.totalorder %s35_s25, %s8788_s26  ;;  %p8794_p2 = scmp.lt.s32.totalorder %s8788_s26, %s8788_s26 }
   0x9   :  { %p8795_p3 = por %p8794_p2, %p8793_p1 }
   0xb   :  { %p8796_p4 = pnand %p8795_p3, %p8789_p0 }
   0xd   :  { %8799 = shalt.err (!%p8796_p4)
}
   0xe   :  { %s8951_s27 = smov 640   ;;  %s8952_s28 = smov 40  }
   0xf   :  { %40 = dma.hbm_to_vmem [thread:$0]  %s9234_s1, 61440, %s35_s25, [#allocation7], %s8951_s27, %s8951_s27, %s8952_s28  }
  0x10   :  { %s8953_s8 = smov [#allocation9]  }
  0x11   :  { %s56_s9 = sshll.u32 %s8953_s8, 4  ;;  %s57_s9 = int_to_ptr.vmem [resolvable:$true] %s56_s9 }
  0x12   :  { %s8808_s10 = scalar_lea.vmem %s57_s9, 40960  ;;  %p8813_p6 = scmp.lt.s32.totalorder %s57_s9, %s57_s9 }
  0x13   :  { %p8809_p5 = scmp.ne.s32.totalorder %s57_s9, %s8808_s10  ;;  %p8814_p7 = scmp.lt.s32.totalorder %s8808_s10, %s8808_s10 }
  0x15   :  { %p8815_p8 = por %p8814_p7, %p8813_p6 }
  0x17   :  { %p8816_p9 = pnand %p8815_p8, %p8809_p5 }
  0x19   :  { %8819 = shalt.err (!%p8816_p9)
}
  0x1a   :  { %s8954_s11 = smov 256   ;;  %s8955_s12 = smov 16  }
  0x1b   :  { %62 = dma.hbm_to_vmem [thread:$0]  %s9236_s3, 40960, %s57_s9, [#allocation10], %s8954_s11, %s8954_s11, %s8955_s12  }
  0x1c   :  { %s8956_s15 = smov [#allocation12]  }
  0x1d   :  { %s78_s16 = sshll.u32 %s8956_s15, 4  ;;  %s79_s16 = int_to_ptr.vmem [resolvable:$true] %s78_s16 }
  0x1e   :  { %s8828_s1 = scalar_lea.vmem %s79_s16, 4096  ;;  %p8833_p11 = scmp.lt.s32.totalorder %s79_s16, %s79_s16 }
  0x1f   :  { %p8829_p10 = scmp.ne.s32.totalorder %s79_s16, %s8828_s1  ;;  %p8834_p12 = scmp.lt.s32.totalorder %s8828_s1, %s8828_s1 }
  0x21   :  { %p8835_p13 = por %p8834_p12, %p8833_p11 }
  0x23   :  { %p8836_p0 = pnand %p8835_p13, %p8829_p10 }
  0x25   :  { %8839 = shalt.err (!%p8836_p0)
}
  0x26   :  { %s8957_s17 = smov 64   ;;  %s8958_s18 = smov 4  }
  0x27   :  { %84 = dma.hbm_to_vmem [thread:$0]  %s9238_s5, 4096, %s79_s16, [#allocation13], %s8957_s17, %s8957_s17, %s8958_s18  }
  0x28   :  { %s8959_s21 = smov [#allocation3]  }
  0x29   :  { %s22_s22 = sshll.u32 %s8959_s21, 4  ;;  %s23_s22 = int_to_ptr.vmem [resolvable:$true] %s22_s22 }
  0x2a   :  { %s8848_s3 = scalar_lea.vmem %s23_s22, 768  ;;  %p8853_p2 = scmp.lt.s32.totalorder %s23_s22, %s23_s22 }
  0x2b   :  { %p8849_p1 = scmp.ne.s32.totalorder %s23_s22, %s8848_s3  ;;  %p8854_p3 = scmp.lt.s32.totalorder %s8848_s3, %s8848_s3 }
  0x2d   :  { %p8855_p4 = por %p8854_p3, %p8853_p2 }
  0x2f   :  { %p8856_p5 = pnand %p8855_p4, %p8849_p1 }
  0x31   :  { %8859 = shalt.err (!%p8856_p5)
}
  0x32   :  { %s8960_s23 = smov 384   ;;  %s8961_s24 = smov 24  }
  0x33   :  { %28 = dma.hbm_to_vmem [thread:$0]  %s9233_s0, 768, %s23_s22, [#allocation4], %s8960_s23, %s8960_s23, %s8961_s24  }
  0x34   :  { %s8962_s27 = smov [#allocation8]   ;;  %s8963_s29 = smov [#allocation11]  }
  0x35   :  { %s47_s28 = sshll.u32 %s8962_s27, 4  ;;  %s69_s5 = sshll.u32 %s8963_s29, 4  ;;  %s48_s28 = int_to_ptr.vmem [resolvable:$true] %s47_s28  ;;  %s70_s5 = int_to_ptr.vmem [resolvable:$true] %s69_s5 }
  0x36   :  { %s8868_s30 = scalar_lea.vmem %s48_s28, 160  ;;  %p8873_p7 = scmp.lt.s32.totalorder %s48_s28, %s48_s28 }
  0x37   :  { %p8869_p6 = scmp.ne.s32.totalorder %s48_s28, %s8868_s30  ;;  %p8874_p8 = scmp.lt.s32.totalorder %s8868_s30, %s8868_s30 }
  0x39   :  { %p8875_p9 = por %p8874_p8, %p8873_p7 }
  0x3b   :  { %p8876_p10 = pnand %p8875_p9, %p8869_p6 }
  0x3d   :  { %8879 = shalt.err (!%p8876_p10)
}
  0x3e   :  { %50 = dma.hbm_to_vmem [thread:$0]  %s9235_s2, 160, %s48_s28, [#allocation7]  }
  0x3f   :  { %s8888_s10 = scalar_lea.vmem %s70_s5, 64  ;;  %p8893_p12 = scmp.lt.s32.totalorder %s70_s5, %s70_s5 }
  0x40   :  { %p8889_p11 = scmp.ne.s32.totalorder %s70_s5, %s8888_s10  ;;  %p8894_p13 = scmp.lt.s32.totalorder %s8888_s10, %s8888_s10 }
  0x42   :  { %p8895_p0 = por %p8894_p13, %p8893_p12 }
  0x44   :  { %p8896_p1 = pnand %p8895_p0, %p8889_p11 }
  0x46   :  { %8899 = shalt.err (!%p8896_p1)
}
  0x47   :  { %72 = dma.hbm_to_vmem [thread:$0]  %s9237_s4, 64, %s70_s5, [#allocation10]  }
  0x48   :  { %s8964_s12 = smov [#allocation14]  }
  0x49   :  { %s91_s13 = sshll.u32 %s8964_s12, 4  ;;  %s92_s13 = int_to_ptr.vmem [resolvable:$true] %s91_s13 }
  0x4a   :  { %s8908_s14 = scalar_lea.vmem %s92_s13, 16  ;;  %s8912_s15 = scalar_lea.vmem %s92_s13, 32 }
  0x4b   :  { %p8909_p2 = scmp.ne.s32.totalorder %s92_s13, %s8908_s14  ;;  %p8913_p3 = scmp.lt.s32.totalorder %s92_s13, %s92_s13 }
  0x4c   :  { %p8914_p4 = scmp.lt.s32.totalorder %s8912_s15, %s8908_s14 }
  0x4e   :  { %p8915_p5 = por %p8914_p4, %p8913_p3 }
  0x50   :  { %p8916_p6 = pnand %p8915_p5, %p8909_p2 }
  0x52   :  { %8919 = shalt.err (!%p8916_p6)
}
  0x53   :  { %94 = dma.hbm_to_vmem [thread:$0]  %s9239_s6, 16, %s92_s13, [#allocation13]  }
  0x54   :  { %8940 = dma.done.wait [#allocation4], 768  }
  0x55   :  { %8941 = vsyncadd [#allocation4], 4294966528 }
  0x56   :  { %8942 = dma.done.wait [#allocation7], 61600  }
  0x57   :  { %8943 = vsyncadd [#allocation7], 4294905696 }
  0x58   :  { %8944 = dma.done.wait [#allocation10], 41024  }
  0x59   :  { %8945 = vsyncadd [#allocation10], 4294926272 }
  0x5a   :  { %8946 = dma.done.wait [#allocation13], 4112  }
  0x5b   :  { %8947 = vsyncadd [#allocation13], 4294963184  ;;  %v7525_v0 = vld [vmem:[#allocation6 + $0x234] ss:$40 sps:$4 sm:$0xff]   ;;  %v7529_v2 = vld [vmem:[#allocation6 + $0x230] ss:$40 sps:$4 sm:$0xff]  }
  0x5c   :  { %v7527_v1 = vld [vmem:[#allocation6 + $0x734] ss:$40 sps:$4 sm:$0xff]   ;;  %3033 = vmatprep.subr.bf16.mxu0 %v7525_v0  ;;  %v7530_v3 = vld [vmem:[#allocation6 + $0x730] ss:$40 sps:$4 sm:$0xff]   ;;  %v7531_v4 = vld [vmem:[#allocation6 + $0x1e4] ss:$40 sps:$4 sm:$0xff]  }
  0x5d   :  { %3076 = vmatprep.subr.bf16.mxu1 %v7527_v1  ;;  %3034 = vmatpush1.bf16.msra.mxu0 %v7529_v2  ;;  %v7533_v5 = vld [vmem:[#allocation6 + $0x6e4] ss:$40 sps:$4 sm:$0xff]   ;;  %v7535_v6 = vld [vmem:[#allocation6 + $0x1e0] ss:$40 sps:$4 sm:$0xff]   ;;  %v7537_v8 = vld [vmem:[#allocation6 + $0x194] ss:$40 sps:$4 sm:$0xff]  }
  0x5e   :  { %3077 = vmatpush1.bf16.msra.mxu1 %v7530_v3  ;;  %3035 = vmatprep.subr.bf16.mxu0 %v7531_v4  ;;  %v7536_v7 = vld [vmem:[#allocation6 + $0x6e0] ss:$40 sps:$4 sm:$0xff]   ;;  %v7539_v9 = vld [vmem:[#allocation6 + $0x694] ss:$40 sps:$4 sm:$0xff]   ;;  %v7541_v10 = vld [vmem:[#allocation6 + $0x190] ss:$40 sps:$4 sm:$0xff]  }
  0x5f   :  { %3078 = vmatprep.subr.bf16.mxu1 %v7533_v5  ;;  %v7542_v11 = vld [vmem:[#allocation6 + $0x690] ss:$40 sps:$4 sm:$0xff]   ;;  %v7543_v12 = vld [vmem:[#allocation6 + $0x144] ss:$40 sps:$4 sm:$0xff]   ;;  %v7547_v14 = vld [vmem:[#allocation6 + $0x140] ss:$40 sps:$4 sm:$0xff]  }
  0x60   :  { %v7545_v13 = vld [vmem:[#allocation6 + $0x644] ss:$40 sps:$4 sm:$0xff]   ;;  %v7548_v15 = vld [vmem:[#allocation6 + $0x640] ss:$40 sps:$4 sm:$0xff]   ;;  %v7549_v16 = vld [vmem:[#allocation6 + $0xf4] ss:$40 sps:$4 sm:$0xff]  }
  0x61   :  { %3036 = vmatpush1.bf16.msra.mxu0 %v7535_v6  ;;  %v7551_v17 = vld [vmem:[#allocation6 + $0x5f4] ss:$40 sps:$4 sm:$0xff]   ;;  %v7553_v18 = vld [vmem:[#allocation6 + $0xf0] ss:$40 sps:$4 sm:$0xff]   ;;  %v7555_v20 = vld [vmem:[#allocation6 + $0xa4] ss:$40 sps:$4 sm:$0xff]  }
  0x62   :  { %3079 = vmatpush1.bf16.msra.mxu1 %v7536_v7  ;;  %3037 = vmatprep.subr.bf16.mxu0 %v7537_v8  ;;  %v7554_v19 = vld [vmem:[#allocation6 + $0x5f0] ss:$40 sps:$4 sm:$0xff]   ;;  %v7557_v21 = vld [vmem:[#allocation6 + $0x5a4] ss:$40 sps:$4 sm:$0xff]   ;;  %v7559_v22 = vld [vmem:[#allocation6 + $0xa0] ss:$40 sps:$4 sm:$0xff]  }
  0x63   :  { %3080 = vmatprep.subr.bf16.mxu1 %v7539_v9  ;;  %v7560_v23 = vld [vmem:[#allocation6 + $0x5a0] ss:$40 sps:$4 sm:$0xff]   ;;  %v7561_v24 = vld [vmem:[#allocation6 + $0x54] ss:$40 sps:$4 sm:$0xff]   ;;  %v7565_v26 = vld [vmem:[#allocation6 + $0x50] ss:$40 sps:$4 sm:$0xff]  }
  0x64   :  { %v7563_v25 = vld [vmem:[#allocation6 + $0x554] ss:$40 sps:$4 sm:$0xff]   ;;  %v7566_v27 = vld [vmem:[#allocation6 + $0x550] ss:$40 sps:$4 sm:$0xff]   ;;  %v7567_v28 = vld [vmem:[#allocation6 + $0x4] ss:$40 sps:$4 sm:$0xff]  }
  0x65   :  { %3038 = vmatpush1.bf16.msra.mxu0 %v7541_v10  ;;  %v7569_v29 = vld [vmem:[#allocation6 + $0x504] ss:$40 sps:$4 sm:$0xff]   ;;  %v7571_v30 = vld [vmem:[#allocation6] ss:$40 sps:$4 sm:$0xff]   ;;  %v7573_v32 = vld [vmem:[#allocation6 + $0x4b4] ss:$40 sps:$4 sm:$0xff]  }
  0x66   :  { %3081 = vmatpush1.bf16.msra.mxu1 %v7542_v11  ;;  %3039 = vmatprep.subr.bf16.mxu0 %v7543_v12  ;;  %v7572_v31 = vld [vmem:[#allocation6 + $0x500] ss:$40 sps:$4 sm:$0xff]   ;;  %v7575_v33 = vld [vmem:[#allocation6 + $0x9b4] ss:$40 sps:$4 sm:$0xff]   ;;  %v7577_v34 = vld [vmem:[#allocation6 + $0x4b0] ss:$40 sps:$4 sm:$0xff]  }
  0x67   :  { %3082 = vmatprep.subr.bf16.mxu1 %v7545_v13  ;;  %v7578_v35 = vld [vmem:[#allocation6 + $0x9b0] ss:$40 sps:$4 sm:$0xff]   ;;  %v7579_v36 = vld [vmem:[#allocation6 + $0x464] ss:$40 sps:$4 sm:$0xff]   ;;  %v7583_v38 = vld [vmem:[#allocation6 + $0x460] ss:$40 sps:$4 sm:$0xff]  }
  0x68   :  { %v7581_v37 = vld [vmem:[#allocation6 + $0x964] ss:$40 sps:$4 sm:$0xff]   ;;  %v7584_v39 = vld [vmem:[#allocation6 + $0x960] ss:$40 sps:$4 sm:$0xff]   ;;  %v7585_v40 = vld [vmem:[#allocation6 + $0x414] ss:$40 sps:$4 sm:$0xff]  }
  0x69   :  { %3040 = vmatpush1.bf16.msra.mxu0 %v7547_v14  ;;  %v7587_v41 = vld [vmem:[#allocation6 + $0x914] ss:$40 sps:$4 sm:$0xff]   ;;  %v7589_v42 = vld [vmem:[#allocation6 + $0x410] ss:$40 sps:$4 sm:$0xff]   ;;  %v7591_v44 = vld [vmem:[#allocation6 + $0x3c4] ss:$40 sps:$4 sm:$0xff]  }
  0x6a   :  { %3083 = vmatpush1.bf16.msra.mxu1 %v7548_v15  ;;  %3041 = vmatprep.subr.bf16.mxu0 %v7549_v16  ;;  %v7590_v43 = vld [vmem:[#allocation6 + $0x910] ss:$40 sps:$4 sm:$0xff]   ;;  %v7593_v45 = vld [vmem:[#allocation6 + $0x8c4] ss:$40 sps:$4 sm:$0xff]   ;;  %v7595_v46 = vld [vmem:[#allocation6 + $0x3c0] ss:$40 sps:$4 sm:$0xff]  }
  0x6b   :  { %3084 = vmatprep.subr.bf16.mxu1 %v7551_v17  ;;  %v7596_v47 = vld [vmem:[#allocation6 + $0x8c0] ss:$40 sps:$4 sm:$0xff]   ;;  %v7621_v48 = vld [vmem:[#allocation3 + $0x4] ss:$24 sps:$4 sm:$0xff]   ;;  %v7601_v52 = vld [vmem:[#allocation6 + $0x370] ss:$40 sps:$4 sm:$0xff]  }
  0x6c   :  { %v7597_v49 = vld [vmem:[#allocation6 + $0x374] ss:$40 sps:$4 sm:$0xff]   ;;  %3065 = vmatprep.mubr.bf16.mxu0 %v7621_v48  ;;  %v7602_v53 = vld [vmem:[#allocation6 + $0x870] ss:$40 sps:$4 sm:$0xff]   ;;  %v7603_v54 = vld [vmem:[#allocation6 + $0x324] ss:$40 sps:$4 sm:$0xff]  }
  0x6d   :  { %3042 = vmatpush1.bf16.msra.mxu0 %v7553_v18  ;;  %v9029_v50 = vld [vmem:[#allocation3 + $0xc] ss:$24 sps:$4 sm:$0xff]   ;;  %v7605_v55 = vld [vmem:[#allocation6 + $0x824] ss:$40 sps:$4 sm:$0xff]   ;;  %v7607_v56 = vld [vmem:[#allocation6 + $0x320] ss:$40 sps:$4 sm:$0xff]  }
  0x6e   :  { %3085 = vmatpush1.bf16.msra.mxu1 %v7554_v19  ;;  %3043 = vmatprep.subr.bf16.mxu0 %v7555_v20  ;;  %v7599_v51 = vld [vmem:[#allocation6 + $0x874] ss:$40 sps:$4 sm:$0xff]   ;;  %v7608_v57 = vld [vmem:[#allocation6 + $0x820] ss:$40 sps:$4 sm:$0xff]   ;;  %v7613_v60 = vld [vmem:[#allocation6 + $0x2d0] ss:$40 sps:$4 sm:$0xff]  }
  0x6f   :  { %3086 = vmatprep.subr.bf16.mxu1 %v7557_v21  ;;  %3108 = vmatprep.mubr.bf16.mxu1 %v9029_v50  ;;  %v7609_v58 = vld [vmem:[#allocation6 + $0x2d4] ss:$40 sps:$4 sm:$0xff]   ;;  %v7614_v61 = vld [vmem:[#allocation6 + $0x7d0] ss:$40 sps:$4 sm:$0xff]   ;;  %v7615_v62 = vld [vmem:[#allocation6 + $0x284] ss:$40 sps:$4 sm:$0xff]  }
  0x70   :  { %v7611_v59 = vld [vmem:[#allocation6 + $0x7d4] ss:$40 sps:$4 sm:$0xff]   ;;  %v7617_v63 = vld [vmem:[#allocation6 + $0x784] ss:$40 sps:$4 sm:$0xff]   ;;  %v7619_v0 = vld [vmem:[#allocation6 + $0x280] ss:$40 sps:$4 sm:$0xff]  }
  0x71   :  { %3044 = vmatpush1.bf16.msra.mxu0 %v7559_v22  ;;  %v7620_v1 = vld [vmem:[#allocation6 + $0x780] ss:$40 sps:$4 sm:$0xff]   ;;  %v7629_v2 = vld [vmem:[#allocation6 + $0xc34] ss:$40 sps:$4 sm:$0xff]   ;;  %v9034_v5 = vld [vmem:[#allocation3 + $0x8] ss:$24 sps:$4 sm:$0xff]  }
  0x72   :  { %3087 = vmatpush1.bf16.msra.mxu1 %v7560_v23  ;;  %3045 = vmatprep.subr.bf16.mxu0 %v7561_v24  ;;  %v7632_v3 = vld [vmem:[#allocation6 + $0x23c] ss:$40 sps:$4 sm:$0xff]   ;;  %v9032_v4 = vld [vmem:[#allocation3] ss:$24 sps:$4 sm:$0xff]   ;;  %v7630_v7 = vld [vmem:[#allocation6 + $0x238] ss:$40 sps:$4 sm:$0xff]  }
  0x73   :  { %3088 = vmatprep.subr.bf16.mxu1 %v7563_v25  ;;  %v7627_v6 = vld [vmem:[#allocation6 + $0xc30] ss:$40 sps:$4 sm:$0xff]   ;;  %v7635_v8 = vld [vmem:[#allocation6 + $0xbe4] ss:$40 sps:$4 sm:$0xff]   ;;  %v7633_v10 = vld [vmem:[#allocation6 + $0xbe0] ss:$40 sps:$4 sm:$0xff]  }
  0x74   :  { %v7638_v9 = vld [vmem:[#allocation6 + $0x1ec] ss:$40 sps:$4 sm:$0xff]   ;;  %v7636_v11 = vld [vmem:[#allocation6 + $0x1e8] ss:$40 sps:$4 sm:$0xff]   ;;  %v7644_v13 = vld [vmem:[#allocation6 + $0x19c] ss:$40 sps:$4 sm:$0xff]  }
  0x75   :  { %3046 = vmatpush1.bf16.msra.mxu0 %v7565_v26  ;;  %v7641_v12 = vld [vmem:[#allocation6 + $0xb94] ss:$40 sps:$4 sm:$0xff]   ;;  %v7639_v14 = vld [vmem:[#allocation6 + $0xb90] ss:$40 sps:$4 sm:$0xff]   ;;  %v7647_v16 = vld [vmem:[#allocation6 + $0xb44] ss:$40 sps:$4 sm:$0xff]  }
  0x76   :  { %3089 = vmatpush1.bf16.msra.mxu1 %v7566_v27  ;;  %3047 = vmatprep.subr.bf16.mxu0 %v7567_v28  ;;  %v7642_v15 = vld [vmem:[#allocation6 + $0x198] ss:$40 sps:$4 sm:$0xff]   ;;  %v7650_v17 = vld [vmem:[#allocation6 + $0x14c] ss:$40 sps:$4 sm:$0xff]   ;;  %v7648_v19 = vld [vmem:[#allocation6 + $0x148] ss:$40 sps:$4 sm:$0xff]  }
  0x77   :  { %3090 = vmatprep.subr.bf16.mxu1 %v7569_v29  ;;  %v7645_v18 = vld [vmem:[#allocation6 + $0xb40] ss:$40 sps:$4 sm:$0xff]   ;;  %v7653_v20 = vld [vmem:[#allocation6 + $0xaf4] ss:$40 sps:$4 sm:$0xff]   ;;  %v7651_v22 = vld [vmem:[#allocation6 + $0xaf0] ss:$40 sps:$4 sm:$0xff]  }
  0x78   :  { %v7656_v21 = vld [vmem:[#allocation6 + $0xfc] ss:$40 sps:$4 sm:$0xff]   ;;  %v7654_v23 = vld [vmem:[#allocation6 + $0xf8] ss:$40 sps:$4 sm:$0xff]   ;;  %v7662_v25 = vld [vmem:[#allocation6 + $0xac] ss:$40 sps:$4 sm:$0xff]  }
  0x79   :  { %3048 = vmatpush1.bf16.msra.mxu0 %v7571_v30  ;;  %v7659_v24 = vld [vmem:[#allocation6 + $0xaa4] ss:$40 sps:$4 sm:$0xff]   ;;  %v7657_v26 = vld [vmem:[#allocation6 + $0xaa0] ss:$40 sps:$4 sm:$0xff]   ;;  %v7665_v28 = vld [vmem:[#allocation6 + $0xa54] ss:$40 sps:$4 sm:$0xff]  }
  0x7a   :  { %3091 = vmatpush1.bf16.msra.mxu1 %v7572_v31  ;;  %3049 = vmatprep.subr.bf16.mxu0 %v7573_v32  ;;  %v7660_v27 = vld [vmem:[#allocation6 + $0xa8] ss:$40 sps:$4 sm:$0xff]   ;;  %v7668_v29 = vld [vmem:[#allocation6 + $0x5c] ss:$40 sps:$4 sm:$0xff]   ;;  %v7666_v31 = vld [vmem:[#allocation6 + $0x58] ss:$40 sps:$4 sm:$0xff]  }
  0x7b   :  { %3092 = vmatprep.subr.bf16.mxu1 %v7575_v33  ;;  %v7663_v30 = vld [vmem:[#allocation6 + $0xa50] ss:$40 sps:$4 sm:$0xff]   ;;  %v7671_v32 = vld [vmem:[#allocation6 + $0xa04] ss:$40 sps:$4 sm:$0xff]   ;;  %s8965_s4 = smov [#allocation15]  }
  0x7c   :  { %v9038_v33 = vld [vmem:[#allocation3 + $0x14] ss:$24 sps:$4 sm:$0xff]   ;;  %s6609_s6 = sshll.u32 %s8965_s4, 4  ;;  %s6610_s6 = int_to_ptr.vmem [resolvable:$true] %s6609_s6 }
  0x7d   :  { %3050 = vmatpush2.bf16.msra.mxu0 %v7577_v34  ;;  %v7674_v34 = vld [vmem:[#allocation6 + $0xc] ss:$40 sps:$4 sm:$0xff]   ;;  %s8920_s1 = scalar_lea.vmem %s6610_s6, 256  ;;  %p8925_p8 = scmp.lt.s32.totalorder %s6610_s6, %s6610_s6 }
  0x7e   :  { %3093 = vmatpush2.bf16.msra.mxu1 %v7578_v35  ;;  %3051 = vmatprep.subr.bf16.mxu0 %v7579_v36  ;;  %v7669_v35 = vld [vmem:[#allocation6 + $0xa00] ss:$40 sps:$4 sm:$0xff]   ;;  %p8921_p7 = scmp.ne.s32.totalorder %s6610_s6, %s8920_s1  ;;  %p8926_p9 = scmp.lt.s32.totalorder %s8920_s1, %s8920_s1 }
  0x7f   :  { %3094 = vmatprep.subr.bf16.mxu1 %v7581_v37  ;;  %v7672_v36 = vld [vmem:[#allocation6 + $0x8] ss:$40 sps:$4 sm:$0xff]   ;;  %v7677_v37 = vld [vmem:[#allocation6 + $0xeb4] ss:$40 sps:$4 sm:$0xff]  }
  0x80   :  { %p8927_p10 = por %p8926_p9, %p8925_p8 }
  0x81   :  { %3052 = vmatpush2.bf16.msra.mxu0 %v7583_v38  ;;  %v7680_v38 = vld [vmem:[#allocation6 + $0x4bc] ss:$40 sps:$4 sm:$0xff]  }
  0x82   :  { %3095 = vmatpush2.bf16.msra.mxu1 %v7584_v39  ;;  %3053 = vmatprep.subr.bf16.mxu0 %v7585_v40  ;;  %v7675_v39 = vld [vmem:[#allocation6 + $0xeb0] ss:$40 sps:$4 sm:$0xff]   ;;  %p8928_p11 = pnand %p8927_p10, %p8921_p7 }
  0x83   :  { %3096 = vmatprep.subr.bf16.mxu1 %v7587_v41  ;;  %v7678_v40 = vld [vmem:[#allocation6 + $0x4b8] ss:$40 sps:$4 sm:$0xff]   ;;  %v7683_v41 = vld [vmem:[#allocation6 + $0xe64] ss:$40 sps:$4 sm:$0xff]  }
  0x85   :  { %3054 = vmatpush2.bf16.msra.mxu0 %v7589_v42  ;;  %v7686_v42 = vld [vmem:[#allocation6 + $0x46c] ss:$40 sps:$4 sm:$0xff]  }
  0x86   :  { %3097 = vmatpush2.bf16.msra.mxu1 %v7590_v43  ;;  %3055 = vmatprep.subr.bf16.mxu0 %v7591_v44  ;;  %v7681_v43 = vld [vmem:[#allocation6 + $0xe60] ss:$40 sps:$4 sm:$0xff]  }
  0x87   :  { %3098 = vmatprep.subr.bf16.mxu1 %v7593_v45  ;;  %v7684_v44 = vld [vmem:[#allocation6 + $0x468] ss:$40 sps:$4 sm:$0xff]   ;;  %v7689_v45 = vld [vmem:[#allocation6 + $0xe14] ss:$40 sps:$4 sm:$0xff]  }
  0x89   :  { %3056 = vmatpush2.bf16.msra.mxu0 %v7595_v46  ;;  %v7692_v46 = vld [vmem:[#allocation6 + $0x41c] ss:$40 sps:$4 sm:$0xff]  }
  0x8a   :  { %3099 = vmatpush2.bf16.msra.mxu1 %v7596_v47  ;;  %3057 = vmatprep.subr.bf16.mxu0 %v7597_v49  ;;  %v7687_v47 = vld [vmem:[#allocation6 + $0xe10] ss:$40 sps:$4 sm:$0xff]   ;;  %v7695_v49 = vld [vmem:[#allocation6 + $0xdc4] ss:$40 sps:$4 sm:$0xff]  }
  0x8b   :  { %3100 = vmatprep.subr.bf16.mxu1 %v7599_v51  ;;  %v7698_v51 = vld [vmem:[#allocation6 + $0x3cc] ss:$40 sps:$4 sm:$0xff]  }
  0x8d   :  { %3058 = vmatpush2.bf16.msra.mxu0 %v7601_v52  ;;  %v7693_v52 = vld [vmem:[#allocation6 + $0xdc0] ss:$40 sps:$4 sm:$0xff]  }
  0x8e   :  { %3101 = vmatpush2.bf16.msra.mxu1 %v7602_v53  ;;  %3059 = vmatprep.subr.bf16.mxu0 %v7603_v54  ;;  %v7696_v53 = vld [vmem:[#allocation6 + $0x3c8] ss:$40 sps:$4 sm:$0xff]   ;;  %v7701_v54 = vld [vmem:[#allocation6 + $0xd74] ss:$40 sps:$4 sm:$0xff]  }
  0x8f   :  { %3102 = vmatprep.subr.bf16.mxu1 %v7605_v55  ;;  %v7704_v55 = vld [vmem:[#allocation6 + $0x37c] ss:$40 sps:$4 sm:$0xff]  }
  0x91   :  { %3060 = vmatpush2.bf16.msra.mxu0 %v7607_v56  ;;  %v7699_v56 = vld [vmem:[#allocation6 + $0xd70] ss:$40 sps:$4 sm:$0xff]  }
  0x92   :  { %3103 = vmatpush2.bf16.msra.mxu1 %v7608_v57  ;;  %3061 = vmatprep.subr.bf16.mxu0 %v7609_v58  ;;  %v7702_v57 = vld [vmem:[#allocation6 + $0x378] ss:$40 sps:$4 sm:$0xff]   ;;  %v7707_v58 = vld [vmem:[#allocation6 + $0xd24] ss:$40 sps:$4 sm:$0xff]  }
  0x93   :  { %3104 = vmatprep.subr.bf16.mxu1 %v7611_v59  ;;  %v7710_v59 = vld [vmem:[#allocation6 + $0x32c] ss:$40 sps:$4 sm:$0xff]  }
  0x95   :  { %3062 = vmatpush2.bf16.msra.mxu0 %v7613_v60  ;;  %v7705_v60 = vld [vmem:[#allocation6 + $0xd20] ss:$40 sps:$4 sm:$0xff]  }
  0x96   :  { %3105 = vmatpush2.bf16.msra.mxu1 %v7614_v61  ;;  %3063 = vmatprep.subr.bf16.mxu0 %v7615_v62  ;;  %v7708_v61 = vld [vmem:[#allocation6 + $0x328] ss:$40 sps:$4 sm:$0xff]   ;;  %v7713_v62 = vld [vmem:[#allocation6 + $0xcd4] ss:$40 sps:$4 sm:$0xff]  }
  0x97   :  { %3106 = vmatprep.subr.bf16.mxu1 %v7617_v63  ;;  %v7716_v63 = vld [vmem:[#allocation6 + $0x2dc] ss:$40 sps:$4 sm:$0xff]  }
  0x99   :  { %3064 = vmatpush2.bf16.msra.mxu0 %v7619_v0  ;;  %v7711_v0 = vld [vmem:[#allocation6 + $0xcd0] ss:$40 sps:$4 sm:$0xff]  }
  0x9a   :  { %3107 = vmatpush2.bf16.msra.mxu1 %v7620_v1  ;;  %3119 = vmatprep.subr.bf16.mxu0 %v7629_v2  ;;  %v7714_v1 = vld [vmem:[#allocation6 + $0x2d8] ss:$40 sps:$4 sm:$0xff]   ;;  %v7719_v2 = vld [vmem:[#allocation6 + $0xc84] ss:$40 sps:$4 sm:$0xff]  }
  0x9b   :  { %3162 = vmatprep.subr.bf16.mxu1 %v7632_v3  ;;  %v7722_v3 = vld [vmem:[#allocation6 + $0x28c] ss:$40 sps:$4 sm:$0xff]  }
  0x9c   :  { %3066 = vmatmul.mubr.bf16.vlgmr.msra.gmra.mxu0 %v9032_v4 }
  0x9d   :  { %3109 = vmatmul.mubr.bf16.vlgmr.msra.gmra.mxu1 %v9034_v5  ;;  %3120 = vmatpush1.bf16.msra.mxu0 %v7627_v6  ;;  %v7717_v6 = vld [vmem:[#allocation6 + $0xc80] ss:$40 sps:$4 sm:$0xff]  }
  0x9e   :  { %3163 = vmatpush1.bf16.msra.mxu1 %v7630_v7  ;;  %3121 = vmatprep.subr.bf16.mxu0 %v7635_v8  ;;  %v7720_v7 = vld [vmem:[#allocation6 + $0x288] ss:$40 sps:$4 sm:$0xff]   ;;  %v7728_v8 = vld [vmem:[#allocation6 + $0x73c] ss:$40 sps:$4 sm:$0xff]  }
  0x9f   :  { %3164 = vmatprep.subr.bf16.mxu1 %v7638_v9  ;;  %3194 = vmatprep.mubr.bf16.mxu1 %v7621_v48  ;;  %v7690_v48 = vld [vmem:[#allocation6 + $0x418] ss:$40 sps:$4 sm:$0xff]   ;;  %v7731_v9 = vld [vmem:[#allocation6 + $0xc3c] ss:$40 sps:$4 sm:$0xff]  }
  0xa0   :  { %3151 = vmatprep.mubr.bf16.mxu0 %v9038_v33 }
  0xa1   :  { %3122 = vmatpush1.bf16.msra.mxu0 %v7633_v10  ;;  %v9041_v10 = vld [vmem:[#allocation3 + $0x10] ss:$24 sps:$4 sm:$0xff]  }
  0xa2   :  { %3165 = vmatpush1.bf16.msra.mxu1 %v7636_v11  ;;  %3123 = vmatprep.subr.bf16.mxu0 %v7641_v12  ;;  %v7726_v11 = vld [vmem:[#allocation6 + $0x738] ss:$40 sps:$4 sm:$0xff]  }
  0xa3   :  { %3166 = vmatprep.subr.bf16.mxu1 %v7644_v13  ;;  %v7729_v12 = vld [vmem:[#allocation6 + $0xc38] ss:$40 sps:$4 sm:$0xff]   ;;  %v7734_v13 = vld [vmem:[#allocation6 + $0x6ec] ss:$40 sps:$4 sm:$0xff]  }
  0xa5   :  { %3124 = vmatpush1.bf16.msra.mxu0 %v7639_v14  ;;  %v7737_v14 = vld [vmem:[#allocation6 + $0xbec] ss:$40 sps:$4 sm:$0xff]  }
  0xa6   :  { %3167 = vmatpush1.bf16.msra.mxu1 %v7642_v15  ;;  %3125 = vmatprep.subr.bf16.mxu0 %v7647_v16  ;;  %v7732_v15 = vld [vmem:[#allocation6 + $0x6e8] ss:$40 sps:$4 sm:$0xff]  }
  0xa7   :  { %3168 = vmatprep.subr.bf16.mxu1 %v7650_v17  ;;  %v7735_v16 = vld [vmem:[#allocation6 + $0xbe8] ss:$40 sps:$4 sm:$0xff]   ;;  %v7740_v17 = vld [vmem:[#allocation6 + $0x69c] ss:$40 sps:$4 sm:$0xff]  }
  0xa9   :  { %3126 = vmatpush1.bf16.msra.mxu0 %v7645_v18  ;;  %v7743_v18 = vld [vmem:[#allocation6 + $0xb9c] ss:$40 sps:$4 sm:$0xff]  }
  0xaa   :  { %3169 = vmatpush1.bf16.msra.mxu1 %v7648_v19  ;;  %3127 = vmatprep.subr.bf16.mxu0 %v7653_v20  ;;  %v7738_v19 = vld [vmem:[#allocation6 + $0x698] ss:$40 sps:$4 sm:$0xff]  }
  0xab   :  { %3170 = vmatprep.subr.bf16.mxu1 %v7656_v21  ;;  %v7741_v20 = vld [vmem:[#allocation6 + $0xb98] ss:$40 sps:$4 sm:$0xff]   ;;  %v7746_v21 = vld [vmem:[#allocation6 + $0x64c] ss:$40 sps:$4 sm:$0xff]  }
  0xad   :  { %3128 = vmatpush1.bf16.msra.mxu0 %v7651_v22  ;;  %v7744_v22 = vld [vmem:[#allocation6 + $0x648] ss:$40 sps:$4 sm:$0xff]  }
  0xae   :  { %3171 = vmatpush1.bf16.msra.mxu1 %v7654_v23  ;;  %3129 = vmatprep.subr.bf16.mxu0 %v7659_v24  ;;  %v7747_v23 = vld [vmem:[#allocation6 + $0xb48] ss:$40 sps:$4 sm:$0xff]   ;;  %v7752_v24 = vld [vmem:[#allocation6 + $0x5fc] ss:$40 sps:$4 sm:$0xff]  }
  0xaf   :  { %3172 = vmatprep.subr.bf16.mxu1 %v7662_v25  ;;  %v7755_v25 = vld [vmem:[#allocation6 + $0xafc] ss:$40 sps:$4 sm:$0xff]  }
  0xb1   :  { %3130 = vmatpush1.bf16.msra.mxu0 %v7657_v26  ;;  %v7750_v26 = vld [vmem:[#allocation6 + $0x5f8] ss:$40 sps:$4 sm:$0xff]  }
  0xb2   :  { %3173 = vmatpush1.bf16.msra.mxu1 %v7660_v27  ;;  %3131 = vmatprep.subr.bf16.mxu0 %v7665_v28  ;;  %v7758_v27 = vld [vmem:[#allocation6 + $0x5ac] ss:$40 sps:$4 sm:$0xff]  }
  0xb3   :  { %3174 = vmatprep.subr.bf16.mxu1 %v7668_v29  ;;  %v7761_v28 = vld [vmem:[#allocation6 + $0xaac] ss:$40 sps:$4 sm:$0xff]   ;;  %v7756_v29 = vld [vmem:[#allocation6 + $0x5a8] ss:$40 sps:$4 sm:$0xff]  }
  0xb5   :  { %3132 = vmatpush1.bf16.msra.mxu0 %v7663_v30  ;;  %v7759_v30 = vld [vmem:[#allocation6 + $0xaa8] ss:$40 sps:$4 sm:$0xff]  }
  0xb6   :  { %3175 = vmatpush1.bf16.msra.mxu1 %v7666_v31  ;;  %3133 = vmatprep.subr.bf16.mxu0 %v7671_v32  ;;  %v7764_v31 = vld [vmem:[#allocation6 + $0x55c] ss:$40 sps:$4 sm:$0xff]  }
  0xb7   :  { %3176 = vmatprep.subr.bf16.mxu1 %v7674_v34  ;;  %v7767_v32 = vld [vmem:[#allocation6 + $0xa5c] ss:$40 sps:$4 sm:$0xff]   ;;  %v7765_v34 = vld [vmem:[#allocation6 + $0xa58] ss:$40 sps:$4 sm:$0xff]  }
  0xb9   :  { %3134 = vmatpush1.bf16.msra.mxu0 %v7669_v35  ;;  %v7770_v35 = vld [vmem:[#allocation6 + $0x50c] ss:$40 sps:$4 sm:$0xff]  }
  0xba   :  { %3177 = vmatpush1.bf16.msra.mxu1 %v7672_v36  ;;  %3135 = vmatprep.subr.bf16.mxu0 %v7677_v37  ;;  %v7773_v36 = vld [vmem:[#allocation6 + $0xa0c] ss:$40 sps:$4 sm:$0xff]   ;;  %v7768_v37 = vld [vmem:[#allocation6 + $0x508] ss:$40 sps:$4 sm:$0xff]  }
  0xbb   :  { %3178 = vmatprep.subr.bf16.mxu1 %v7680_v38  ;;  %v7771_v38 = vld [vmem:[#allocation6 + $0xa08] ss:$40 sps:$4 sm:$0xff]  }
  0xbd   :  { %3136 = vmatpush2.bf16.msra.mxu0 %v7675_v39  ;;  %v7776_v39 = vld [vmem:[#allocation6 + $0x9bc] ss:$40 sps:$4 sm:$0xff]  }
  0xbe   :  { %3179 = vmatpush2.bf16.msra.mxu1 %v7678_v40  ;;  %3137 = vmatprep.subr.bf16.mxu0 %v7683_v41  ;;  %v7779_v40 = vld [vmem:[#allocation6 + $0xebc] ss:$40 sps:$4 sm:$0xff]   ;;  %v7774_v41 = vld [vmem:[#allocation6 + $0x9b8] ss:$40 sps:$4 sm:$0xff]  }
  0xbf   :  { %3180 = vmatprep.subr.bf16.mxu1 %v7686_v42  ;;  %v7777_v42 = vld [vmem:[#allocation6 + $0xeb8] ss:$40 sps:$4 sm:$0xff]  }
  0xc1   :  { %3138 = vmatpush2.bf16.msra.mxu0 %v7681_v43  ;;  %v7782_v43 = vld [vmem:[#allocation6 + $0x96c] ss:$40 sps:$4 sm:$0xff]  }
  0xc2   :  { %3181 = vmatpush2.bf16.msra.mxu1 %v7684_v44  ;;  %3139 = vmatprep.subr.bf16.mxu0 %v7689_v45  ;;  %v7785_v44 = vld [vmem:[#allocation6 + $0xe6c] ss:$40 sps:$4 sm:$0xff]   ;;  %v7780_v45 = vld [vmem:[#allocation6 + $0x968] ss:$40 sps:$4 sm:$0xff]  }
  0xc3   :  { %3182 = vmatprep.subr.bf16.mxu1 %v7692_v46  ;;  %v7783_v46 = vld [vmem:[#allocation6 + $0xe68] ss:$40 sps:$4 sm:$0xff]  }
  0xc5   :  { %3140 = vmatpush2.bf16.msra.mxu0 %v7687_v47  ;;  %v7788_v47 = vld [vmem:[#allocation6 + $0x91c] ss:$40 sps:$4 sm:$0xff]  }
  0xc6   :  { %3183 = vmatpush2.bf16.msra.mxu1 %v7690_v48  ;;  %3141 = vmatprep.subr.bf16.mxu0 %v7695_v49  ;;  %v7791_v48 = vld [vmem:[#allocation6 + $0xe1c] ss:$40 sps:$4 sm:$0xff]   ;;  %v7786_v49 = vld [vmem:[#allocation6 + $0x918] ss:$40 sps:$4 sm:$0xff]  }
  0xc7   :  { %3184 = vmatprep.subr.bf16.mxu1 %v7698_v51  ;;  %v7789_v51 = vld [vmem:[#allocation6 + $0xe18] ss:$40 sps:$4 sm:$0xff]  }
  0xc9   :  { %3142 = vmatpush2.bf16.msra.mxu0 %v7693_v52  ;;  %v7794_v52 = vld [vmem:[#allocation6 + $0x8cc] ss:$40 sps:$4 sm:$0xff]  }
  0xca   :  { %3185 = vmatpush2.bf16.msra.mxu1 %v7696_v53  ;;  %3143 = vmatprep.subr.bf16.mxu0 %v7701_v54  ;;  %v7797_v53 = vld [vmem:[#allocation6 + $0xdcc] ss:$40 sps:$4 sm:$0xff]   ;;  %v7792_v54 = vld [vmem:[#allocation6 + $0x8c8] ss:$40 sps:$4 sm:$0xff]  }
  0xcb   :  { %3186 = vmatprep.subr.bf16.mxu1 %v7704_v55  ;;  %v7795_v55 = vld [vmem:[#allocation6 + $0xdc8] ss:$40 sps:$4 sm:$0xff]  }
  0xcd   :  { %3144 = vmatpush2.bf16.msra.mxu0 %v7699_v56  ;;  %v7800_v56 = vld [vmem:[#allocation6 + $0x87c] ss:$40 sps:$4 sm:$0xff]  }
  0xce   :  { %3187 = vmatpush2.bf16.msra.mxu1 %v7702_v57  ;;  %3145 = vmatprep.subr.bf16.mxu0 %v7707_v58  ;;  %v7803_v57 = vld [vmem:[#allocation6 + $0xd7c] ss:$40 sps:$4 sm:$0xff]   ;;  %v7798_v58 = vld [vmem:[#allocation6 + $0x878] ss:$40 sps:$4 sm:$0xff]  }
  0xcf   :  { %3188 = vmatprep.subr.bf16.mxu1 %v7710_v59  ;;  %v7801_v59 = vld [vmem:[#allocation6 + $0xd78] ss:$40 sps:$4 sm:$0xff]  }
  0xd1   :  { %3146 = vmatpush2.bf16.msra.mxu0 %v7705_v60  ;;  %v7806_v60 = vld [vmem:[#allocation6 + $0x82c] ss:$40 sps:$4 sm:$0xff]  }
  0xd2   :  { %3189 = vmatpush2.bf16.msra.mxu1 %v7708_v61  ;;  %3147 = vmatprep.subr.bf16.mxu0 %v7713_v62  ;;  %v7809_v61 = vld [vmem:[#allocation6 + $0xd2c] ss:$40 sps:$4 sm:$0xff]   ;;  %v7804_v62 = vld [vmem:[#allocation6 + $0x828] ss:$40 sps:$4 sm:$0xff]  }
  0xd3   :  { %3190 = vmatprep.subr.bf16.mxu1 %v7716_v63  ;;  %v7807_v63 = vld [vmem:[#allocation6 + $0xd28] ss:$40 sps:$4 sm:$0xff]  }
  0xd5   :  { %3148 = vmatpush2.bf16.msra.mxu0 %v7711_v0  ;;  %v7812_v0 = vld [vmem:[#allocation6 + $0x7dc] ss:$40 sps:$4 sm:$0xff]  }
  0xd6   :  { %3191 = vmatpush2.bf16.msra.mxu1 %v7714_v1  ;;  %3149 = vmatprep.subr.bf16.mxu0 %v7719_v2  ;;  %v7815_v1 = vld [vmem:[#allocation6 + $0xcdc] ss:$40 sps:$4 sm:$0xff]   ;;  %v7810_v2 = vld [vmem:[#allocation6 + $0x7d8] ss:$40 sps:$4 sm:$0xff]  }
  0xd7   :  { %3192 = vmatprep.subr.bf16.mxu1 %v7722_v3  ;;  %v7813_v3 = vld [vmem:[#allocation6 + $0xcd8] ss:$40 sps:$4 sm:$0xff]  }
  0xd9   :  { %3150 = vmatpush2.bf16.msra.mxu0 %v7717_v6  ;;  %v7818_v6 = vld [vmem:[#allocation6 + $0x78c] ss:$40 sps:$4 sm:$0xff]  }
  0xda   :  { %3193 = vmatpush2.bf16.msra.mxu1 %v7720_v7  ;;  %3205 = vmatprep.subr.bf16.mxu0 %v7728_v8  ;;  %v7821_v7 = vld [vmem:[#allocation6 + $0xc8c] ss:$40 sps:$4 sm:$0xff]   ;;  %v7816_v8 = vld [vmem:[#allocation6 + $0x788] ss:$40 sps:$4 sm:$0xff]  }
  0xdb   :  { %3248 = vmatprep.subr.bf16.mxu1 %v7731_v9  ;;  %v7819_v9 = vld [vmem:[#allocation6 + $0xc88] ss:$40 sps:$4 sm:$0xff]  }
  0xdc   :  { %3152 = vmatmul.mubr.bf16.vlgmr.msra.gmra.mxu0 %v9041_v10 }
  0xdd   :  { %3195 = vmatmul.mubr.bf16.vlgmr.msra.gmra.mxu1 %v9032_v4  ;;  %3206 = vmatpush1.bf16.msra.mxu0 %v7726_v11  ;;  %v7749_v4 = vld [vmem:[#allocation6 + $0xb4c] ss:$40 sps:$4 sm:$0xff]  }
  0xde   :  { %3249 = vmatpush1.bf16.msra.mxu1 %v7729_v12  ;;  %3207 = vmatprep.subr.bf16.mxu0 %v7734_v13  ;;  %v7824_v11 = vld [vmem:[#allocation6 + $0x244] ss:$40 sps:$4 sm:$0xff]   ;;  %v7822_v13 = vld [vmem:[#allocation6 + $0x240] ss:$40 sps:$4 sm:$0xff]  }
  0xdf   :  { %3250 = vmatprep.subr.bf16.mxu1 %v7737_v14  ;;  %3237 = vmatprep.mubr.bf16.mxu0 %v9029_v50  ;;  %v7753_v50 = vld [vmem:[#allocation6 + $0xaf8] ss:$40 sps:$4 sm:$0xff]   ;;  %v7827_v12 = vld [vmem:[#allocation6 + $0x744] ss:$40 sps:$4 sm:$0xff]  }
  0xe0   :  { %3280 = vmatprep.mubr.bf16.mxu1 %v9038_v33  ;;  %v7762_v33 = vld [vmem:[#allocation6 + $0x558] ss:$40 sps:$4 sm:$0xff]  }
  0xe1   :  { %3208 = vmatpush1.bf16.msra.mxu0 %v7732_v15  ;;  %v7825_v14 = vld [vmem:[#allocation6 + $0x740] ss:$40 sps:$4 sm:$0xff]   ;;  %v7830_v15 = vld [vmem:[#allocation6 + $0x1f4] ss:$40 sps:$4 sm:$0xff]  }
  0xe2   :  { %3251 = vmatpush1.bf16.msra.mxu1 %v7735_v16  ;;  %3209 = vmatprep.subr.bf16.mxu0 %v7740_v17  ;;  %v7833_v16 = vld [vmem:[#allocation6 + $0x6f4] ss:$40 sps:$4 sm:$0xff]   ;;  %v7828_v17 = vld [vmem:[#allocation6 + $0x1f0] ss:$40 sps:$4 sm:$0xff]  }
  0xe3   :  { %3252 = vmatprep.subr.bf16.mxu1 %v7743_v18  ;;  %v7831_v18 = vld [vmem:[#allocation6 + $0x6f0] ss:$40 sps:$4 sm:$0xff]  }
  0xe5   :  { %3210 = vmatpush1.bf16.msra.mxu0 %v7738_v19  ;;  %v7836_v19 = vld [vmem:[#allocation6 + $0x1a4] ss:$40 sps:$4 sm:$0xff]  }
  0xe6   :  { %3253 = vmatpush1.bf16.msra.mxu1 %v7741_v20  ;;  %3211 = vmatprep.subr.bf16.mxu0 %v7746_v21  ;;  %v7839_v20 = vld [vmem:[#allocation6 + $0x6a4] ss:$40 sps:$4 sm:$0xff]  }
  0xe7   :  { %3254 = vmatprep.subr.bf16.mxu1 %v7749_v4  ;;  %v9049_v21 = vld [vmem:[#allocation3 + $0x4] ss:$24 sps:$4 sm:$0xff]  }
  0xe8   :  { %v9052_v4 = vld [vmem:[#allocation3 + $0xc] ss:$24 sps:$4 sm:$0xff]  }
  0xe9   :  { %3212 = vmatpush1.bf16.msra.mxu0 %v7744_v22  ;;  %v7834_v22 = vld [vmem:[#allocation6 + $0x1a0] ss:$40 sps:$4 sm:$0xff]  }
  0xea   :  { %3255 = vmatpush1.bf16.msra.mxu1 %v7747_v23  ;;  %3213 = vmatprep.subr.bf16.mxu0 %v7752_v24  ;;  %v7845_v23 = vld [vmem:[#allocation6 + $0x654] ss:$40 sps:$4 sm:$0xff]   ;;  %v7840_v24 = vld [vmem:[#allocation6 + $0x150] ss:$40 sps:$4 sm:$0xff]  }
  0xeb   :  { %3256 = vmatprep.subr.bf16.mxu1 %v7755_v25  ;;  %v7843_v25 = vld [vmem:[#allocation6 + $0x650] ss:$40 sps:$4 sm:$0xff]  }
  0xed   :  { %3214 = vmatpush1.bf16.msra.mxu0 %v7750_v26  ;;  %v7848_v26 = vld [vmem:[#allocation6 + $0x104] ss:$40 sps:$4 sm:$0xff]  }
  0xee   :  { %3257 = vmatpush1.bf16.msra.mxu1 %v7753_v50  ;;  %3215 = vmatprep.subr.bf16.mxu0 %v7758_v27  ;;  %v7851_v50 = vld [vmem:[#allocation6 + $0x604] ss:$40 sps:$4 sm:$0xff]   ;;  %v7846_v27 = vld [vmem:[#allocation6 + $0x100] ss:$40 sps:$4 sm:$0xff]  }
  0xef   :  { %3258 = vmatprep.subr.bf16.mxu1 %v7761_v28  ;;  %v7849_v28 = vld [vmem:[#allocation6 + $0x600] ss:$40 sps:$4 sm:$0xff]  }
  0xf1   :  { %3216 = vmatpush1.bf16.msra.mxu0 %v7756_v29  ;;  %v7854_v29 = vld [vmem:[#allocation6 + $0xb4] ss:$40 sps:$4 sm:$0xff]  }
  0xf2   :  { %3259 = vmatpush1.bf16.msra.mxu1 %v7759_v30  ;;  %3217 = vmatprep.subr.bf16.mxu0 %v7764_v31  ;;  %v7857_v30 = vld [vmem:[#allocation6 + $0x5b4] ss:$40 sps:$4 sm:$0xff]   ;;  %v7852_v31 = vld [vmem:[#allocation6 + $0xb0] ss:$40 sps:$4 sm:$0xff]  }
  0xf3   :  { %3260 = vmatprep.subr.bf16.mxu1 %v7767_v32  ;;  %v7855_v32 = vld [vmem:[#allocation6 + $0x5b0] ss:$40 sps:$4 sm:$0xff]  }
  0xf5   :  { %3218 = vmatpush1.bf16.msra.mxu0 %v7762_v33  ;;  %v7860_v33 = vld [vmem:[#allocation6 + $0x64] ss:$40 sps:$4 sm:$0xff]  }
  0xf6   :  { %3261 = vmatpush1.bf16.msra.mxu1 %v7765_v34  ;;  %3219 = vmatprep.subr.bf16.mxu0 %v7770_v35  ;;  %v7863_v34 = vld [vmem:[#allocation6 + $0x564] ss:$40 sps:$4 sm:$0xff]   ;;  %v7858_v35 = vld [vmem:[#allocation6 + $0x60] ss:$40 sps:$4 sm:$0xff]  }
  0xf7   :  { %3262 = vmatprep.subr.bf16.mxu1 %v7773_v36  ;;  %v7861_v36 = vld [vmem:[#allocation6 + $0x560] ss:$40 sps:$4 sm:$0xff]  }
  0xf9   :  { %3220 = vmatpush1.bf16.msra.mxu0 %v7768_v37  ;;  %v7866_v37 = vld [vmem:[#allocation6 + $0x14] ss:$40 sps:$4 sm:$0xff]  }
  0xfa   :  { %3263 = vmatpush1.bf16.msra.mxu1 %v7771_v38  ;;  %3221 = vmatprep.subr.bf16.mxu0 %v7776_v39  ;;  %v7869_v38 = vld [vmem:[#allocation6 + $0x514] ss:$40 sps:$4 sm:$0xff]   ;;  %v7864_v39 = vld [vmem:[#allocation6 + $0x10] ss:$40 sps:$4 sm:$0xff]  }
  0xfb   :  { %3264 = vmatprep.subr.bf16.mxu1 %v7779_v40  ;;  %v7867_v40 = vld [vmem:[#allocation6 + $0x510] ss:$40 sps:$4 sm:$0xff]  }
  0xfd   :  { %3222 = vmatpush2.bf16.msra.mxu0 %v7774_v41  ;;  %v7872_v41 = vld [vmem:[#allocation6 + $0x4c4] ss:$40 sps:$4 sm:$0xff]  }
  0xfe   :  { %3265 = vmatpush2.bf16.msra.mxu1 %v7777_v42  ;;  %3223 = vmatprep.subr.bf16.mxu0 %v7782_v43  ;;  %v7875_v42 = vld [vmem:[#allocation6 + $0x9c4] ss:$40 sps:$4 sm:$0xff]   ;;  %v7870_v43 = vld [vmem:[#allocation6 + $0x4c0] ss:$40 sps:$4 sm:$0xff]  }
  0xff   :  { %3266 = vmatprep.subr.bf16.mxu1 %v7785_v44  ;;  %v7873_v44 = vld [vmem:[#allocation6 + $0x9c0] ss:$40 sps:$4 sm:$0xff]  }
 0x101   :  { %3224 = vmatpush2.bf16.msra.mxu0 %v7780_v45  ;;  %v7878_v45 = vld [vmem:[#allocation6 + $0x474] ss:$40 sps:$4 sm:$0xff]  }
 0x102   :  { %3267 = vmatpush2.bf16.msra.mxu1 %v7783_v46  ;;  %3225 = vmatprep.subr.bf16.mxu0 %v7788_v47  ;;  %v7881_v46 = vld [vmem:[#allocation6 + $0x974] ss:$40 sps:$4 sm:$0xff]   ;;  %v7876_v47 = vld [vmem:[#allocation6 + $0x470] ss:$40 sps:$4 sm:$0xff]  }
 0x103   :  { %3268 = vmatprep.subr.bf16.mxu1 %v7791_v48  ;;  %v7879_v48 = vld [vmem:[#allocation6 + $0x970] ss:$40 sps:$4 sm:$0xff]  }
 0x105   :  { %3226 = vmatpush2.bf16.msra.mxu0 %v7786_v49  ;;  %v7884_v49 = vld [vmem:[#allocation6 + $0x424] ss:$40 sps:$4 sm:$0xff]  }
 0x106   :  { %3269 = vmatpush2.bf16.msra.mxu1 %v7789_v51  ;;  %3227 = vmatprep.subr.bf16.mxu0 %v7794_v52  ;;  %v7887_v51 = vld [vmem:[#allocation6 + $0x924] ss:$40 sps:$4 sm:$0xff]   ;;  %v7882_v52 = vld [vmem:[#allocation6 + $0x420] ss:$40 sps:$4 sm:$0xff]  }
 0x107   :  { %3270 = vmatprep.subr.bf16.mxu1 %v7797_v53  ;;  %v7885_v53 = vld [vmem:[#allocation6 + $0x920] ss:$40 sps:$4 sm:$0xff]  }
 0x109   :  { %3228 = vmatpush2.bf16.msra.mxu0 %v7792_v54  ;;  %v7890_v54 = vld [vmem:[#allocation6 + $0x3d4] ss:$40 sps:$4 sm:$0xff]  }
 0x10a   :  { %3271 = vmatpush2.bf16.msra.mxu1 %v7795_v55  ;;  %3229 = vmatprep.subr.bf16.mxu0 %v7800_v56  ;;  %v7893_v55 = vld [vmem:[#allocation6 + $0x8d4] ss:$40 sps:$4 sm:$0xff]   ;;  %v7888_v56 = vld [vmem:[#allocation6 + $0x3d0] ss:$40 sps:$4 sm:$0xff]  }
 0x10b   :  { %3272 = vmatprep.subr.bf16.mxu1 %v7803_v57  ;;  %v7891_v57 = vld [vmem:[#allocation6 + $0x8d0] ss:$40 sps:$4 sm:$0xff]  }
 0x10d   :  { %3230 = vmatpush2.bf16.msra.mxu0 %v7798_v58  ;;  %v7896_v58 = vld [vmem:[#allocation6 + $0x384] ss:$40 sps:$4 sm:$0xff]  }
 0x10e   :  { %3273 = vmatpush2.bf16.msra.mxu1 %v7801_v59  ;;  %3231 = vmatprep.subr.bf16.mxu0 %v7806_v60  ;;  %v7899_v59 = vld [vmem:[#allocation6 + $0x884] ss:$40 sps:$4 sm:$0xff]   ;;  %v7894_v60 = vld [vmem:[#allocation6 + $0x380] ss:$40 sps:$4 sm:$0xff]  }
 0x10f   :  { %3274 = vmatprep.subr.bf16.mxu1 %v7809_v61  ;;  %v7897_v61 = vld [vmem:[#allocation6 + $0x880] ss:$40 sps:$4 sm:$0xff]  }
 0x111   :  { %3232 = vmatpush2.bf16.msra.mxu0 %v7804_v62  ;;  %v7902_v62 = vld [vmem:[#allocation6 + $0x334] ss:$40 sps:$4 sm:$0xff]  }
 0x112   :  { %3275 = vmatpush2.bf16.msra.mxu1 %v7807_v63  ;;  %3233 = vmatprep.subr.bf16.mxu0 %v7812_v0  ;;  %v7905_v63 = vld [vmem:[#allocation6 + $0x834] ss:$40 sps:$4 sm:$0xff]   ;;  %v7900_v0 = vld [vmem:[#allocation6 + $0x330] ss:$40 sps:$4 sm:$0xff]  }
 0x113   :  { %3276 = vmatprep.subr.bf16.mxu1 %v7815_v1  ;;  %v7903_v1 = vld [vmem:[#allocation6 + $0x830] ss:$40 sps:$4 sm:$0xff]  }
 0x115   :  { %3234 = vmatpush2.bf16.msra.mxu0 %v7810_v2  ;;  %v7908_v2 = vld [vmem:[#allocation6 + $0x2e4] ss:$40 sps:$4 sm:$0xff]  }
 0x116   :  { %3277 = vmatpush2.bf16.msra.mxu1 %v7813_v3  ;;  %3235 = vmatprep.subr.bf16.mxu0 %v7818_v6  ;;  %v7911_v3 = vld [vmem:[#allocation6 + $0x7e4] ss:$40 sps:$4 sm:$0xff]   ;;  %v7906_v6 = vld [vmem:[#allocation6 + $0x2e0] ss:$40 sps:$4 sm:$0xff]  }
 0x117   :  { %3278 = vmatprep.subr.bf16.mxu1 %v7821_v7  ;;  %v7909_v7 = vld [vmem:[#allocation6 + $0x7e0] ss:$40 sps:$4 sm:$0xff]  }
 0x119   :  { %3236 = vmatpush2.bf16.msra.mxu0 %v7816_v8  ;;  %v7914_v8 = vld [vmem:[#allocation6 + $0x294] ss:$40 sps:$4 sm:$0xff]  }
 0x11a   :  { %3279 = vmatpush2.bf16.msra.mxu1 %v7819_v9  ;;  %3291 = vmatprep.subr.bf16.mxu0 %v7824_v11  ;;  %v7917_v9 = vld [vmem:[#allocation6 + $0x794] ss:$40 sps:$4 sm:$0xff]   ;;  %v7912_v11 = vld [vmem:[#allocation6 + $0x290] ss:$40 sps:$4 sm:$0xff]  }
 0x11b   :  { %3334 = vmatprep.subr.bf16.mxu1 %v7827_v12  ;;  %v7915_v12 = vld [vmem:[#allocation6 + $0x790] ss:$40 sps:$4 sm:$0xff]  }
 0x11c   :  { %3238 = vmatmul.mubr.bf16.vlgmr.msra.gmra.mxu0 %v9034_v5  ;;  %v7837_v5 = vld [vmem:[#allocation6 + $0x6a0] ss:$40 sps:$4 sm:$0xff]  }
 0x11d   :  { %3281 = vmatmul.mubr.bf16.vlgmr.msra.gmra.mxu1 %v9041_v10  ;;  %3292 = vmatpush1.bf16.msra.mxu0 %v7822_v13  ;;  %v7842_v10 = vld [vmem:[#allocation6 + $0x154] ss:$40 sps:$4 sm:$0xff]   ;;  %v7920_v13 = vld [vmem:[#allocation6 + $0xc44] ss:$40 sps:$4 sm:$0xff]  }
 0x11e   :  { %3335 = vmatpush1.bf16.msra.mxu1 %v7825_v14  ;;  %3293 = vmatprep.subr.bf16.mxu0 %v7830_v15  ;;  %v7923_v14 = vld [vmem:[#allocation6 + $0x24c] ss:$40 sps:$4 sm:$0xff]   ;;  %v7918_v15 = vld [vmem:[#allocation6 + $0xc40] ss:$40 sps:$4 sm:$0xff]  }
 0x11f   :  { %3336 = vmatprep.subr.bf16.mxu1 %v7833_v16  ;;  %3323 = vmatprep.mubr.bf16.mxu0 %v9049_v21  ;;  %v7921_v16 = vld [vmem:[#allocation6 + $0x248] ss:$40 sps:$4 sm:$0xff]  }
 0x120   :  { %3366 = vmatprep.mubr.bf16.mxu1 %v9052_v4 }
 0x121   :  { %3294 = vmatpush1.bf16.msra.mxu0 %v7828_v17  ;;  %v7926_v17 = vld [vmem:[#allocation6 + $0xbf4] ss:$40 sps:$4 sm:$0xff]  }
 0x122   :  { %3337 = vmatpush1.bf16.msra.mxu1 %v7831_v18  ;;  %3295 = vmatprep.subr.bf16.mxu0 %v7836_v19  ;;  %v7929_v18 = vld [vmem:[#allocation6 + $0x1fc] ss:$40 sps:$4 sm:$0xff]  }
 0x123   :  { %3338 = vmatprep.subr.bf16.mxu1 %v7839_v20 }
 0x125   :  { %3296 = vmatpush1.bf16.msra.mxu0 %v7834_v22  ;;  %v9055_v22 = vld [vmem:[#allocation3] ss:$24 sps:$4 sm:$0xff]  }
 0x126   :  { %3339 = vmatpush1.bf16.msra.mxu1 %v7837_v5  ;;  %3297 = vmatprep.subr.bf16.mxu0 %v7842_v10  ;;  %v8769_v5 = vld [vmem:[#allocation3 + $0x8] ss:$24 sps:$4 sm:$0xff]  }
 0x127   :  { %3340 = vmatprep.subr.bf16.mxu1 %v7845_v23  ;;  %v7924_v10 = vld [vmem:[#allocation6 + $0xbf0] ss:$40 sps:$4 sm:$0xff]  }
 0x129   :  { %3298 = vmatpush1.bf16.msra.mxu0 %v7840_v24  ;;  %v7927_v24 = vld [vmem:[#allocation6 + $0x1f8] ss:$40 sps:$4 sm:$0xff]  }
 0x12a   :  { %3341 = vmatpush1.bf16.msra.mxu1 %v7843_v25  ;;  %3299 = vmatprep.subr.bf16.mxu0 %v7848_v26 }
 0x12b   :  { %3342 = vmatprep.subr.bf16.mxu1 %v7851_v50  ;;  %v7932_v50 = vld [vmem:[#allocation6 + $0xba4] ss:$40 sps:$4 sm:$0xff]  }
 0x12d   :  { %3300 = vmatpush1.bf16.msra.mxu0 %v7846_v27  ;;  %v7935_v27 = vld [vmem:[#allocation6 + $0x1ac] ss:$40 sps:$4 sm:$0xff]  }
 0x12e   :  { %3343 = vmatpush1.bf16.msra.mxu1 %v7849_v28  ;;  %3301 = vmatprep.subr.bf16.mxu0 %v7854_v29  ;;  %v9064_v28 = vld [vmem:[#allocation3 + $0x14] ss:$24 sps:$4 sm:$0xff]  }
 0x12f   :  { %3344 = vmatprep.subr.bf16.mxu1 %v7857_v30 }
 0x131   :  { %3302 = vmatpush1.bf16.msra.mxu0 %v7852_v31  ;;  %v7930_v31 = vld [vmem:[#allocation6 + $0xba0] ss:$40 sps:$4 sm:$0xff]  }
 0x132   :  { %3345 = vmatpush1.bf16.msra.mxu1 %v7855_v32  ;;  %3303 = vmatprep.subr.bf16.mxu0 %v7860_v33  ;;  %v7933_v33 = vld [vmem:[#allocation6 + $0x1a8] ss:$40 sps:$4 sm:$0xff]  }
 0x133   :  { %3346 = vmatprep.subr.bf16.mxu1 %v7863_v34  ;;  %v7938_v34 = vld [vmem:[#allocation6 + $0xb54] ss:$40 sps:$4 sm:$0xff]  }
 0x135   :  { %3304 = vmatpush1.bf16.msra.mxu0 %v7858_v35  ;;  %v7941_v35 = vld [vmem:[#allocation6 + $0x15c] ss:$40 sps:$4 sm:$0xff]  }
 0x136   :  { %3347 = vmatpush1.bf16.msra.mxu1 %v7861_v36  ;;  %3305 = vmatprep.subr.bf16.mxu0 %v7866_v37  ;;  %v7936_v36 = vld [vmem:[#allocation6 + $0xb50] ss:$40 sps:$4 sm:$0xff]  }
 0x137   :  { %3348 = vmatprep.subr.bf16.mxu1 %v7869_v38  ;;  %v7939_v37 = vld [vmem:[#allocation6 + $0x158] ss:$40 sps:$4 sm:$0xff]   ;;  %v7944_v38 = vld [vmem:[#allocation6 + $0xb04] ss:$40 sps:$4 sm:$0xff]  }
 0x139   :  { %3306 = vmatpush1.bf16.msra.mxu0 %v7864_v39  ;;  %v7942_v39 = vld [vmem:[#allocation6 + $0xb00] ss:$40 sps:$4 sm:$0xff]  }
 0x13a   :  { %3349 = vmatpush1.bf16.msra.mxu1 %v7867_v40  ;;  %3307 = vmatprep.subr.bf16.mxu0 %v7872_v41  ;;  %v7945_v40 = vld [vmem:[#allocation6 + $0x108] ss:$40 sps:$4 sm:$0xff]   ;;  %v7950_v41 = vld [vmem:[#allocation6 + $0xab4] ss:$40 sps:$4 sm:$0xff]  }
 0x13b   :  { %3350 = vmatprep.subr.bf16.mxu1 %v7875_v42  ;;  %v7953_v42 = vld [vmem:[#allocation6 + $0xbc] ss:$40 sps:$4 sm:$0xff]  }
 0x13d   :  { %3308 = vmatpush2.bf16.msra.mxu0 %v7870_v43  ;;  %v7948_v43 = vld [vmem:[#allocation6 + $0xab0] ss:$40 sps:$4 sm:$0xff]  }
 0x13e   :  { %3351 = vmatpush2.bf16.msra.mxu1 %v7873_v44  ;;  %3309 = vmatprep.subr.bf16.mxu0 %v7878_v45  ;;  %v7951_v44 = vld [vmem:[#allocation6 + $0xb8] ss:$40 sps:$4 sm:$0xff]   ;;  %v7956_v45 = vld [vmem:[#allocation6 + $0xa64] ss:$40 sps:$4 sm:$0xff]  }
 0x13f   :  { %3352 = vmatprep.subr.bf16.mxu1 %v7881_v46  ;;  %v7959_v46 = vld [vmem:[#allocation6 + $0x6c] ss:$40 sps:$4 sm:$0xff]  }
 0x141   :  { %3310 = vmatpush2.bf16.msra.mxu0 %v7876_v47  ;;  %v7954_v47 = vld [vmem:[#allocation6 + $0xa60] ss:$40 sps:$4 sm:$0xff]  }
 0x142   :  { %3353 = vmatpush2.bf16.msra.mxu1 %v7879_v48  ;;  %3311 = vmatprep.subr.bf16.mxu0 %v7884_v49  ;;  %v7957_v48 = vld [vmem:[#allocation6 + $0x68] ss:$40 sps:$4 sm:$0xff]   ;;  %v7962_v49 = vld [vmem:[#allocation6 + $0xa14] ss:$40 sps:$4 sm:$0xff]  }
 0x143   :  { %3354 = vmatprep.subr.bf16.mxu1 %v7887_v51  ;;  %v7965_v51 = vld [vmem:[#allocation6 + $0x1c] ss:$40 sps:$4 sm:$0xff]  }
 0x145   :  { %3312 = vmatpush2.bf16.msra.mxu0 %v7882_v52  ;;  %v7960_v52 = vld [vmem:[#allocation6 + $0xa10] ss:$40 sps:$4 sm:$0xff]  }
 0x146   :  { %3355 = vmatpush2.bf16.msra.mxu1 %v7885_v53  ;;  %3313 = vmatprep.subr.bf16.mxu0 %v7890_v54  ;;  %v7963_v53 = vld [vmem:[#allocation6 + $0x18] ss:$40 sps:$4 sm:$0xff]   ;;  %v7968_v54 = vld [vmem:[#allocation6 + $0xec4] ss:$40 sps:$4 sm:$0xff]  }
 0x147   :  { %3356 = vmatprep.subr.bf16.mxu1 %v7893_v55  ;;  %v7971_v55 = vld [vmem:[#allocation6 + $0x4cc] ss:$40 sps:$4 sm:$0xff]  }
 0x149   :  { %3314 = vmatpush2.bf16.msra.mxu0 %v7888_v56  ;;  %v7966_v56 = vld [vmem:[#allocation6 + $0xec0] ss:$40 sps:$4 sm:$0xff]  }
 0x14a   :  { %3357 = vmatpush2.bf16.msra.mxu1 %v7891_v57  ;;  %3315 = vmatprep.subr.bf16.mxu0 %v7896_v58  ;;  %v7969_v57 = vld [vmem:[#allocation6 + $0x4c8] ss:$40 sps:$4 sm:$0xff]   ;;  %v7974_v58 = vld [vmem:[#allocation6 + $0xe74] ss:$40 sps:$4 sm:$0xff]  }
 0x14b   :  { %3358 = vmatprep.subr.bf16.mxu1 %v7899_v59  ;;  %v7977_v59 = vld [vmem:[#allocation6 + $0x47c] ss:$40 sps:$4 sm:$0xff]  }
 0x14d   :  { %3316 = vmatpush2.bf16.msra.mxu0 %v7894_v60  ;;  %v7972_v60 = vld [vmem:[#allocation6 + $0xe70] ss:$40 sps:$4 sm:$0xff]  }
 0x14e   :  { %3359 = vmatpush2.bf16.msra.mxu1 %v7897_v61  ;;  %3317 = vmatprep.subr.bf16.mxu0 %v7902_v62  ;;  %v7975_v61 = vld [vmem:[#allocation6 + $0x478] ss:$40 sps:$4 sm:$0xff]   ;;  %v7980_v62 = vld [vmem:[#allocation6 + $0xe24] ss:$40 sps:$4 sm:$0xff]  }
 0x14f   :  { %3360 = vmatprep.subr.bf16.mxu1 %v7905_v63  ;;  %v7983_v63 = vld [vmem:[#allocation6 + $0x42c] ss:$40 sps:$4 sm:$0xff]  }
 0x151   :  { %3318 = vmatpush2.bf16.msra.mxu0 %v7900_v0  ;;  %v7978_v0 = vld [vmem:[#allocation6 + $0xe20] ss:$40 sps:$4 sm:$0xff]  }
 0x152   :  { %3361 = vmatpush2.bf16.msra.mxu1 %v7903_v1  ;;  %3319 = vmatprep.subr.bf16.mxu0 %v7908_v2  ;;  %v7981_v1 = vld [vmem:[#allocation6 + $0x428] ss:$40 sps:$4 sm:$0xff]   ;;  %v7986_v2 = vld [vmem:[#allocation6 + $0xdd4] ss:$40 sps:$4 sm:$0xff]  }
 0x153   :  { %3362 = vmatprep.subr.bf16.mxu1 %v7911_v3  ;;  %v7989_v3 = vld [vmem:[#allocation6 + $0x3dc] ss:$40 sps:$4 sm:$0xff]  }
 0x155   :  { %3320 = vmatpush2.bf16.msra.mxu0 %v7906_v6  ;;  %v7984_v6 = vld [vmem:[#allocation6 + $0xdd0] ss:$40 sps:$4 sm:$0xff]  }
 0x156   :  { %3363 = vmatpush2.bf16.msra.mxu1 %v7909_v7  ;;  %3321 = vmatprep.subr.bf16.mxu0 %v7914_v8  ;;  %v7987_v7 = vld [vmem:[#allocation6 + $0x3d8] ss:$40 sps:$4 sm:$0xff]   ;;  %v7992_v8 = vld [vmem:[#allocation6 + $0xd84] ss:$40 sps:$4 sm:$0xff]  }
 0x157   :  { %3364 = vmatprep.subr.bf16.mxu1 %v7917_v9  ;;  %v7995_v9 = vld [vmem:[#allocation6 + $0x38c] ss:$40 sps:$4 sm:$0xff]  }
 0x159   :  { %3322 = vmatpush2.bf16.msra.mxu0 %v7912_v11  ;;  %v7990_v11 = vld [vmem:[#allocation6 + $0xd80] ss:$40 sps:$4 sm:$0xff]  }
 0x15a   :  { %3365 = vmatpush2.bf16.msra.mxu1 %v7915_v12  ;;  %3377 = vmatprep.subr.bf16.mxu0 %v7920_v13  ;;  %v7993_v12 = vld [vmem:[#allocation6 + $0x388] ss:$40 sps:$4 sm:$0xff]   ;;  %v7998_v13 = vld [vmem:[#allocation6 + $0xd34] ss:$40 sps:$4 sm:$0xff]  }
 0x15b   :  { %3420 = vmatprep.subr.bf16.mxu1 %v7923_v14  ;;  %v8001_v14 = vld [vmem:[#allocation6 + $0x33c] ss:$40 sps:$4 sm:$0xff]  }
 0x15c   :  { %v3067_v19 = vpop.f32.mrf.mxu0  ;;  %3324 = vmatmul.mubr.bf16.vlgmr.msra.gmra.mxu0 %v9055_v22 }
 0x15d   :  { %v3110_v20 = vpop.f32.mrf.mxu1  ;;  %3367 = vmatmul.mubr.bf16.vlgmr.msra.gmra.mxu1 %v8769_v5  ;;  %3378 = vmatpush1.bf16.msra.mxu0 %v7918_v15  ;;  %v7996_v15 = vld [vmem:[#allocation6 + $0xd30] ss:$40 sps:$4 sm:$0xff]   ;;  %v8010_v5 = vld [vmem:[#allocation6 + $0xc94] ss:$40 sps:$4 sm:$0xff]  }
 0x15e   :  { %v9058_v23 = vadd.f32 %v3110_v20, %v3067_v19  ;;  %3421 = vmatpush1.bf16.msra.mxu1 %v7921_v16  ;;  %v9060_v25 = vpop.f32.mrf.mxu0  ;;  %3379 = vmatprep.subr.bf16.mxu0 %v7926_v17  ;;  %v7999_v16 = vld [vmem:[#allocation6 + $0x338] ss:$40 sps:$4 sm:$0xff]   ;;  %v8004_v17 = vld [vmem:[#allocation6 + $0xce4] ss:$40 sps:$4 sm:$0xff]   ;;  %v8005_v20 = vld [vmem:[#allocation6 + $0x2e8] ss:$40 sps:$4 sm:$0xff]  }
 0x15f   :  { %v9062_v26 = vpop.f32.mrf.mxu1  ;;  %3422 = vmatprep.subr.bf16.mxu1 %v7929_v18  ;;  %3409 = vmatprep.mubr.bf16.mxu0 %v9064_v28  ;;  %v8007_v18 = vld [vmem:[#allocation6 + $0x2ec] ss:$40 sps:$4 sm:$0xff]   ;;  %v8002_v19 = vld [vmem:[#allocation6 + $0xce0] ss:$40 sps:$4 sm:$0xff]  }
 0x160   :  { %3452 = vmatprep.mubr.bf16.mxu1 %v9049_v21  ;;  %v3071_v29 = vpop.f32.mrf.mxu0  ;;  %v7947_v21 = vld [vmem:[#allocation6 + $0x10c] ss:$40 sps:$4 sm:$0xff]  }
 0x161   :  { %v3114_v30 = vpop.f32.mrf.mxu1  ;;  %3380 = vmatpush1.bf16.msra.mxu0 %v7924_v10  ;;  %v8013_v10 = vld [vmem:[#allocation6 + $0x29c] ss:$40 sps:$4 sm:$0xff]  }
 0x162   :  { %v9068_v32 = vadd.f32 %v3114_v30, %v3071_v29  ;;  %3423 = vmatpush1.bf16.msra.mxu1 %v7927_v24  ;;  %3381 = vmatprep.subr.bf16.mxu0 %v7932_v50  ;;  %v3686_v24 = vlaneseq  ;;  %v8008_v50 = vld [vmem:[#allocation6 + $0xc90] ss:$40 sps:$4 sm:$0xff]   ;;  %v8016_v29 = vld [vmem:[#allocation6 + $0x74c] ss:$40 sps:$4 sm:$0xff]  }
 0x163   :  { %3424 = vmatprep.subr.bf16.mxu1 %v7935_v27  ;;  %v8011_v27 = vld [vmem:[#allocation6 + $0x298] ss:$40 sps:$4 sm:$0xff]   ;;  %v8019_v30 = vld [vmem:[#allocation6 + $0xc4c] ss:$40 sps:$4 sm:$0xff]  }
 0x165   :  { %3382 = vmatpush1.bf16.msra.mxu0 %v7930_v31  ;;  %v9070_v31 = vshrl.u32 %v3686_v24, 7  ;;  %v8085_v24 = vld [vmem:[#allocation6 + $0xddc] ss:$40 sps:$4 sm:$0xff]  }
 0x166   :  { %3425 = vmatpush1.bf16.msra.mxu1 %v7933_v33  ;;  %3383 = vmatprep.subr.bf16.mxu0 %v7938_v34  ;;  %v8014_v33 = vld [vmem:[#allocation6 + $0x748] ss:$40 sps:$4 sm:$0xff]  }
 0x167   :  { %3426 = vmatprep.subr.bf16.mxu1 %v7941_v35  ;;  %v8017_v34 = vld [vmem:[#allocation6 + $0xc48] ss:$40 sps:$4 sm:$0xff]   ;;  %v9072_v35 = vpop.f32.mrf.mxu0 }
 0x169   :  { %3384 = vmatpush1.bf16.msra.mxu0 %v7936_v36  ;;  %v9074_v36 = vld [vmem:[#allocation8] sm:$0xff] }
 0x16a   :  { %3427 = vmatpush1.bf16.msra.mxu1 %v7939_v37  ;;  %3385 = vmatprep.subr.bf16.mxu0 %v7944_v38  ;;  %v8022_v37 = vld [vmem:[#allocation6 + $0x6fc] ss:$40 sps:$4 sm:$0xff]  }
 0x16b   :  { %3428 = vmatprep.subr.bf16.mxu1 %v7947_v21  ;;  %v8025_v38 = vld [vmem:[#allocation6 + $0xbfc] ss:$40 sps:$4 sm:$0xff]   ;;  %v9077_v21 = vsub.s32 0, %v9070_v31 }
 0x16d   :  { %3386 = vmatpush1.bf16.msra.mxu0 %v7942_v39  ;;  %v8020_v39 = vld [vmem:[#allocation6 + $0x6f8] ss:$40 sps:$4 sm:$0xff]  }
 0x16e   :  { %3429 = vmatpush1.bf16.msra.mxu1 %v7945_v40  ;;  %3387 = vmatprep.subr.bf16.mxu0 %v7950_v41  ;;  %v8023_v40 = vld [vmem:[#allocation6 + $0xbf8] ss:$40 sps:$4 sm:$0xff]  }
 0x16f   :  { %3430 = vmatprep.subr.bf16.mxu1 %v7953_v42  ;;  %v9079_v42 = vld [vmem:[#allocation3 + $0x10] ss:$24 sps:$4 sm:$0xff]  }
 0x171   :  { %3388 = vmatpush1.bf16.msra.mxu0 %v7948_v43  ;;  %v8028_v43 = vld [vmem:[#allocation6 + $0x6ac] ss:$40 sps:$4 sm:$0xff]  }
 0x172   :  { %3431 = vmatpush1.bf16.msra.mxu1 %v7951_v44  ;;  %3389 = vmatprep.subr.bf16.mxu0 %v7956_v45  ;;  %v8031_v44 = vld [vmem:[#allocation6 + $0xbac] ss:$40 sps:$4 sm:$0xff]  }
 0x173   :  { %3432 = vmatprep.subr.bf16.mxu1 %v7959_v46 }
 0x175   :  { %3390 = vmatpush1.bf16.msra.mxu0 %v7954_v47  ;;  %v3689_v47 = vrot.slane %v9074_v36, %v9077_v21 }
 0x176   :  { %3433 = vmatpush1.bf16.msra.mxu1 %v7957_v48  ;;  %3391 = vmatprep.subr.bf16.mxu0 %v7962_v49  ;;  %v8026_v48 = vld [vmem:[#allocation6 + $0x6a8] ss:$40 sps:$4 sm:$0xff]  }
 0x177   :  { %3434 = vmatprep.subr.bf16.mxu1 %v7965_v51  ;;  %v8029_v49 = vld [vmem:[#allocation6 + $0xba8] ss:$40 sps:$4 sm:$0xff]   ;;  %v8034_v51 = vld [vmem:[#allocation6 + $0x65c] ss:$40 sps:$4 sm:$0xff]  }
 0x179   :  { %3392 = vmatpush1.bf16.msra.mxu0 %v7960_v52  ;;  %v8037_v52 = vld [vmem:[#allocation6 + $0xb5c] ss:$40 sps:$4 sm:$0xff]  }
 0x17a   :  { %3435 = vmatpush1.bf16.msra.mxu1 %v7963_v53  ;;  %3393 = vmatprep.subr.bf16.mxu0 %v7968_v54 }
 0x17b   :  { %3436 = vmatprep.subr.bf16.mxu1 %v7971_v55 }
 0x17d   :  { %3394 = vmatpush2.bf16.msra.mxu0 %v7966_v56  ;;  %v8032_v56 = vld [vmem:[#allocation6 + $0x658] ss:$40 sps:$4 sm:$0xff]  }
 0x17e   :  { %3437 = vmatpush2.bf16.msra.mxu1 %v7969_v57  ;;  %3395 = vmatprep.subr.bf16.mxu0 %v7974_v58  ;;  %v8035_v57 = vld [vmem:[#allocation6 + $0xb58] ss:$40 sps:$4 sm:$0xff]   ;;  %v8038_v58 = vld [vmem:[#allocation6 + $0x608] ss:$40 sps:$4 sm:$0xff]  }
 0x17f   :  { %3438 = vmatprep.subr.bf16.mxu1 %v7977_v59  ;;  %v8046_v59 = vld [vmem:[#allocation6 + $0x5bc] ss:$40 sps:$4 sm:$0xff]  }
 0x181   :  { %3396 = vmatpush2.bf16.msra.mxu0 %v7972_v60  ;;  %v8049_v60 = vld [vmem:[#allocation6 + $0xabc] ss:$40 sps:$4 sm:$0xff]  }
 0x182   :  { %3439 = vmatpush2.bf16.msra.mxu1 %v7975_v61  ;;  %3397 = vmatprep.subr.bf16.mxu0 %v7980_v62  ;;  %v8044_v61 = vld [vmem:[#allocation6 + $0x5b8] ss:$40 sps:$4 sm:$0xff]  }
 0x183   :  { %3440 = vmatprep.subr.bf16.mxu1 %v7983_v63  ;;  %v8047_v62 = vld [vmem:[#allocation6 + $0xab8] ss:$40 sps:$4 sm:$0xff]   ;;  %v8052_v63 = vld [vmem:[#allocation6 + $0x56c] ss:$40 sps:$4 sm:$0xff]  }
 0x185   :  { %3398 = vmatpush2.bf16.msra.mxu0 %v7978_v0  ;;  %v8055_v0 = vld [vmem:[#allocation6 + $0xa6c] ss:$40 sps:$4 sm:$0xff]  }
 0x186   :  { %3441 = vmatpush2.bf16.msra.mxu1 %v7981_v1  ;;  %3399 = vmatprep.subr.bf16.mxu0 %v7986_v2  ;;  %v8050_v1 = vld [vmem:[#allocation6 + $0x568] ss:$40 sps:$4 sm:$0xff]  }
 0x187   :  { %3442 = vmatprep.subr.bf16.mxu1 %v7989_v3  ;;  %v8053_v2 = vld [vmem:[#allocation6 + $0xa68] ss:$40 sps:$4 sm:$0xff]   ;;  %v8058_v3 = vld [vmem:[#allocation6 + $0x51c] ss:$40 sps:$4 sm:$0xff]  }
 0x189   :  { %3400 = vmatpush2.bf16.msra.mxu0 %v7984_v6  ;;  %v8061_v6 = vld [vmem:[#allocation6 + $0xa1c] ss:$40 sps:$4 sm:$0xff]  }
 0x18a   :  { %3443 = vmatpush2.bf16.msra.mxu1 %v7987_v7  ;;  %3401 = vmatprep.subr.bf16.mxu0 %v7992_v8  ;;  %v8056_v7 = vld [vmem:[#allocation6 + $0x518] ss:$40 sps:$4 sm:$0xff]  }
 0x18b   :  { %3444 = vmatprep.subr.bf16.mxu1 %v7995_v9  ;;  %v8059_v8 = vld [vmem:[#allocation6 + $0xa18] ss:$40 sps:$4 sm:$0xff]   ;;  %v8064_v9 = vld [vmem:[#allocation6 + $0x9cc] ss:$40 sps:$4 sm:$0xff]  }
 0x18d   :  { %3402 = vmatpush2.bf16.msra.mxu0 %v7990_v11  ;;  %v8067_v11 = vld [vmem:[#allocation6 + $0xecc] ss:$40 sps:$4 sm:$0xff]  }
 0x18e   :  { %3445 = vmatpush2.bf16.msra.mxu1 %v7993_v12  ;;  %3403 = vmatprep.subr.bf16.mxu0 %v7998_v13  ;;  %v8062_v12 = vld [vmem:[#allocation6 + $0x9c8] ss:$40 sps:$4 sm:$0xff]  }
 0x18f   :  { %3446 = vmatprep.subr.bf16.mxu1 %v8001_v14  ;;  %v8065_v13 = vld [vmem:[#allocation6 + $0xec8] ss:$40 sps:$4 sm:$0xff]   ;;  %v8070_v14 = vld [vmem:[#allocation6 + $0x97c] ss:$40 sps:$4 sm:$0xff]  }
 0x191   :  { %3404 = vmatpush2.bf16.msra.mxu0 %v7996_v15  ;;  %v8073_v15 = vld [vmem:[#allocation6 + $0xe7c] ss:$40 sps:$4 sm:$0xff]  }
 0x192   :  { %3447 = vmatpush2.bf16.msra.mxu1 %v7999_v16  ;;  %3405 = vmatprep.subr.bf16.mxu0 %v8004_v17  ;;  %v8068_v16 = vld [vmem:[#allocation6 + $0x978] ss:$40 sps:$4 sm:$0xff]  }
 0x193   :  { %3448 = vmatprep.subr.bf16.mxu1 %v8007_v18  ;;  %v8071_v17 = vld [vmem:[#allocation6 + $0xe78] ss:$40 sps:$4 sm:$0xff]   ;;  %v8076_v18 = vld [vmem:[#allocation6 + $0x92c] ss:$40 sps:$4 sm:$0xff]  }
 0x195   :  { %3406 = vmatpush2.bf16.msra.mxu0 %v8002_v19  ;;  %v8079_v19 = vld [vmem:[#allocation6 + $0xe2c] ss:$40 sps:$4 sm:$0xff]  }
 0x196   :  { %3449 = vmatpush2.bf16.msra.mxu1 %v8005_v20  ;;  %3407 = vmatprep.subr.bf16.mxu0 %v8010_v5  ;;  %v8074_v20 = vld [vmem:[#allocation6 + $0x928] ss:$40 sps:$4 sm:$0xff]  }
 0x197   :  { %3450 = vmatprep.subr.bf16.mxu1 %v8013_v10  ;;  %v8077_v5 = vld [vmem:[#allocation6 + $0xe28] ss:$40 sps:$4 sm:$0xff]   ;;  %v8082_v10 = vld [vmem:[#allocation6 + $0x8dc] ss:$40 sps:$4 sm:$0xff]  }
 0x199   :  { %3408 = vmatpush2.bf16.msra.mxu0 %v8008_v50  ;;  %v8080_v50 = vld [vmem:[#allocation6 + $0x8d8] ss:$40 sps:$4 sm:$0xff]  }
 0x19a   :  { %3451 = vmatpush2.bf16.msra.mxu1 %v8011_v27  ;;  %3463 = vmatprep.subr.bf16.mxu0 %v8016_v29  ;;  %v8083_v27 = vld [vmem:[#allocation6 + $0xdd8] ss:$40 sps:$4 sm:$0xff]   ;;  %v8088_v29 = vld [vmem:[#allocation6 + $0x88c] ss:$40 sps:$4 sm:$0xff]  }
 0x19b   :  { %3506 = vmatprep.subr.bf16.mxu1 %v8019_v30  ;;  %v8091_v30 = vld [vmem:[#allocation6 + $0xd8c] ss:$40 sps:$4 sm:$0xff]  }
 0x19c   :  { %v3153_v41 = vpop.f32.mrf.mxu0  ;;  %3410 = vmatmul.mubr.bf16.vlgmr.msra.gmra.mxu0 %v9079_v42 }
 0x19d   :  { %3453 = vmatmul.mubr.bf16.vlgmr.msra.gmra.mxu1 %v9055_v22  ;;  %v3154_v45 = vadd.f32 %v3153_v41, %v9058_v23  ;;  %3464 = vmatpush1.bf16.msra.mxu0 %v8014_v33  ;;  %v8086_v33 = vld [vmem:[#allocation6 + $0x888] ss:$40 sps:$4 sm:$0xff]   ;;  %v8092_v41 = vld [vmem:[#allocation6 + $0x838] ss:$40 sps:$4 sm:$0xff]  }
 0x19e   :  { %3507 = vmatpush1.bf16.msra.mxu1 %v8017_v34  ;;  %v9084_v46 = vpop.f32.mrf.mxu0  ;;  %3465 = vmatprep.subr.bf16.mxu0 %v8022_v37  ;;  %v8089_v34 = vld [vmem:[#allocation6 + $0xd88] ss:$40 sps:$4 sm:$0xff]   ;;  %v9093_v37 = vpop.f32.mrf.mxu1 }
 0x19f   :  { %3508 = vmatprep.subr.bf16.mxu1 %v8025_v38  ;;  %3495 = vmatprep.mubr.bf16.mxu0 %v9052_v4  ;;  %v3736_v53 = vadd.f32 %v3689_v47, %v3154_v45  ;;  %v8040_v4 = vld [vmem:[#allocation6 + $0x60c] ss:$40 sps:$4 sm:$0xff]   ;;  %v8094_v38 = vld [vmem:[#allocation6 + $0x83c] ss:$40 sps:$4 sm:$0xff]  }
 0x1a0   :  { %3538 = vmatprep.mubr.bf16.mxu1 %v9064_v28  ;;  %v3157_v22 = vpop.f32.mrf.mxu0  ;;  %v8043_v28 = vld [vmem:[#allocation6 + $0xb0c] ss:$40 sps:$4 sm:$0xff]  }
 0x1a1   :  { %v3158_v23 = vadd.f32 %v3157_v22, %v9068_v32  ;;  %3466 = vmatpush1.bf16.msra.mxu0 %v8020_v39  ;;  %v8041_v32 = vld [vmem:[#allocation6 + $0xb08] ss:$40 sps:$4 sm:$0xff]   ;;  %v8097_v39 = vld [vmem:[#allocation6 + $0xd3c] ss:$40 sps:$4 sm:$0xff]   ;;  %v8103_v45 = vld [vmem:[#allocation6 + $0xcec] ss:$40 sps:$4 sm:$0xff]  }
 0x1a2   :  { %3509 = vmatpush1.bf16.msra.mxu1 %v8023_v40  ;;  %3467 = vmatprep.subr.bf16.mxu0 %v8028_v43  ;;  %v3196_v40 = vpop.f32.mrf.mxu1  ;;  %v8095_v43 = vld [vmem:[#allocation6 + $0xd38] ss:$40 sps:$4 sm:$0xff]   ;;  %v8106_v22 = vld [vmem:[#allocation6 + $0x79c] ss:$40 sps:$4 sm:$0xff]  }
 0x1a3   :  { %3510 = vmatprep.subr.bf16.mxu1 %v8031_v44  ;;  %v3746_v54 = vadd.f32 %v3689_v47, %v3158_v23  ;;  %v8100_v44 = vld [vmem:[#allocation6 + $0x7ec] ss:$40 sps:$4 sm:$0xff]   ;;  %v8104_v23 = vld [vmem:[#allocation6 + $0x798] ss:$40 sps:$4 sm:$0xff]  }
 0x1a4   :  { %v9095_v47 = vpop.f32.mrf.mxu1 }
 0x1a5   :  { %v9091_v55 = vpack.c.bf16 %v3746_v54, %v3736_v53  ;;  %3468 = vmatpush1.bf16.msra.mxu0 %v8026_v48  ;;  %v8098_v48 = vld [vmem:[#allocation6 + $0x7e8] ss:$40 sps:$4 sm:$0xff]   ;;  %v8107_v53 = vld [vmem:[#allocation6 + $0xc98] ss:$40 sps:$4 sm:$0xff]   ;;  %v8112_v54 = vld [vmem:[#allocation6 + $0x254] ss:$40 sps:$4 sm:$0xff]  }
 0x1a6   :  { %3511 = vmatpush1.bf16.msra.mxu1 %v8029_v49  ;;  %3469 = vmatprep.subr.bf16.mxu0 %v8034_v51  ;;  %v8101_v49 = vld [vmem:[#allocation6 + $0xce8] ss:$40 sps:$4 sm:$0xff]   ;;  %v8109_v51 = vld [vmem:[#allocation6 + $0xc9c] ss:$40 sps:$4 sm:$0xff]  }
 0x1a7   :  { %3512 = vmatprep.subr.bf16.mxu1 %v8037_v52  ;;  %v3200_v52 = vpop.f32.mrf.mxu1 }
 0x1a9   :  { %3470 = vmatpush1.bf16.msra.mxu0 %v8032_v56  ;;  %v8115_v56 = vld [vmem:[#allocation6 + $0x754] ss:$40 sps:$4 sm:$0xff]  }
 0x1aa   :  { %3513 = vmatpush1.bf16.msra.mxu1 %v8035_v57  ;;  %3471 = vmatprep.subr.bf16.mxu0 %v8040_v4  ;;  %v8110_v57 = vld [vmem:[#allocation6 + $0x250] ss:$40 sps:$4 sm:$0xff]  }
 0x1ab   :  { %3514 = vmatprep.subr.bf16.mxu1 %v8043_v28  ;;  %v8113_v4 = vld [vmem:[#allocation6 + $0x750] ss:$40 sps:$4 sm:$0xff]   ;;  %v9097_v28 = vpop.f32.mrf.mxu1 }
 0x1ad   :  { %3472 = vmatpush1.bf16.msra.mxu0 %v8038_v58  ;;  %v8118_v58 = vld [vmem:[#allocation6 + $0x204] ss:$40 sps:$4 sm:$0xff]  }
 0x1ae   :  { %3515 = vmatpush1.bf16.msra.mxu1 %v8041_v32  ;;  %3473 = vmatprep.subr.bf16.mxu0 %v8046_v59  ;;  %v8121_v32 = vld [vmem:[#allocation6 + $0x704] ss:$40 sps:$4 sm:$0xff]   ;;  %v9099_v59 = vpop.f32.mrf.mxu0 }
 0x1af   :  { %3516 = vmatprep.subr.bf16.mxu1 %v8049_v60  ;;  %v8116_v60 = vld [vmem:[#allocation6 + $0x200] ss:$40 sps:$4 sm:$0xff]  }
 0x1b1   :  { %3474 = vmatpush1.bf16.msra.mxu0 %v8044_v61  ;;  %v8119_v61 = vld [vmem:[#allocation6 + $0x700] ss:$40 sps:$4 sm:$0xff]  }
 0x1b2   :  { %3517 = vmatpush1.bf16.msra.mxu1 %v8047_v62  ;;  %3475 = vmatprep.subr.bf16.mxu0 %v8052_v63  ;;  %v9101_v63 = vld [vmem:[#allocation3 + $0x8] ss:$24 sps:$4 sm:$0xff]  }
 0x1b3   :  { %3518 = vmatprep.subr.bf16.mxu1 %v8055_v0 }
 0x1b5   :  { %3476 = vmatpush1.bf16.msra.mxu0 %v8050_v1  ;;  %v8124_v1 = vld [vmem:[#allocation6 + $0x1b4] ss:$40 sps:$4 sm:$0xff]  }
 0x1b6   :  { %3519 = vmatpush1.bf16.msra.mxu1 %v8053_v2  ;;  %3477 = vmatprep.subr.bf16.mxu0 %v8058_v3  ;;  %v8127_v2 = vld [vmem:[#allocation6 + $0x6b4] ss:$40 sps:$4 sm:$0xff]  }
 0x1b7   :  { %3520 = vmatprep.subr.bf16.mxu1 %v8061_v6  ;;  %v3696_v6 = vsub.s32 2, %v9070_v31 }
 0x1b9   :  { %3478 = vmatpush1.bf16.msra.mxu0 %v8056_v7 }
 0x1ba   :  { %3521 = vmatpush1.bf16.msra.mxu1 %v8059_v8  ;;  %3479 = vmatprep.subr.bf16.mxu0 %v8064_v9 }
 0x1bb   :  { %3522 = vmatprep.subr.bf16.mxu1 %v8067_v11  ;;  %v8122_v11 = vld [vmem:[#allocation6 + $0x1b0] ss:$40 sps:$4 sm:$0xff]  }
 0x1bd   :  { %3480 = vmatpush2.bf16.msra.mxu0 %v8062_v12  ;;  %v8125_v12 = vld [vmem:[#allocation6 + $0x6b0] ss:$40 sps:$4 sm:$0xff]  }
 0x1be   :  { %3523 = vmatpush2.bf16.msra.mxu1 %v8065_v13  ;;  %3481 = vmatprep.subr.bf16.mxu0 %v8070_v14  ;;  %v8773_v13 = vld [vmem:[#allocation3 + $0x4] ss:$24 sps:$4 sm:$0xff]  }
 0x1bf   :  { %3524 = vmatprep.subr.bf16.mxu1 %v8073_v15 }
 0x1c1   :  { %3482 = vmatpush2.bf16.msra.mxu0 %v8068_v16  ;;  %v8130_v16 = vld [vmem:[#allocation6 + $0x164] ss:$40 sps:$4 sm:$0xff]  }
 0x1c2   :  { %3525 = vmatpush2.bf16.msra.mxu1 %v8071_v17  ;;  %3483 = vmatprep.subr.bf16.mxu0 %v8076_v18  ;;  %v8133_v17 = vld [vmem:[#allocation6 + $0x664] ss:$40 sps:$4 sm:$0xff]   ;;  %v3697_v18 = vrot.slane %v9074_v36, %v3696_v6  ;;  %v8137_v36 = vld [vmem:[#allocation6 + $0x610] ss:$40 sps:$4 sm:$0xff]  }
 0x1c3   :  { %3526 = vmatprep.subr.bf16.mxu1 %v8079_v19 }
 0x1c5   :  { %3484 = vmatpush2.bf16.msra.mxu0 %v8074_v20 }
 0x1c6   :  { %3527 = vmatpush2.bf16.msra.mxu1 %v8077_v5  ;;  %3485 = vmatprep.subr.bf16.mxu0 %v8082_v10  ;;  %v8128_v5 = vld [vmem:[#allocation6 + $0x160] ss:$40 sps:$4 sm:$0xff]  }
 0x1c7   :  { %3528 = vmatprep.subr.bf16.mxu1 %v8085_v24  ;;  %v8131_v10 = vld [vmem:[#allocation6 + $0x660] ss:$40 sps:$4 sm:$0xff]  }
 0x1c9   :  { %3486 = vmatpush2.bf16.msra.mxu0 %v8080_v50 }
 0x1ca   :  { %3529 = vmatpush2.bf16.msra.mxu1 %v8083_v27  ;;  %3487 = vmatprep.subr.bf16.mxu0 %v8088_v29  ;;  %v8136_v27 = vld [vmem:[#allocation6 + $0x114] ss:$40 sps:$4 sm:$0xff]  }
 0x1cb   :  { %3530 = vmatprep.subr.bf16.mxu1 %v8091_v30  ;;  %v8139_v29 = vld [vmem:[#allocation6 + $0x614] ss:$40 sps:$4 sm:$0xff]  }
 0x1cd   :  { %3488 = vmatpush2.bf16.msra.mxu0 %v8086_v33  ;;  %v8134_v33 = vld [vmem:[#allocation6 + $0x110] ss:$40 sps:$4 sm:$0xff]  }
 0x1ce   :  { %3531 = vmatpush2.bf16.msra.mxu1 %v8089_v34  ;;  %3489 = vmatprep.subr.bf16.mxu0 %v8094_v38  ;;  %v8142_v34 = vld [vmem:[#allocation6 + $0xc4] ss:$40 sps:$4 sm:$0xff]  }
 0x1cf   :  { %3532 = vmatprep.subr.bf16.mxu1 %v8097_v39  ;;  %v8145_v38 = vld [vmem:[#allocation6 + $0x5c4] ss:$40 sps:$4 sm:$0xff]   ;;  %v8140_v39 = vld [vmem:[#allocation6 + $0xc0] ss:$40 sps:$4 sm:$0xff]  }
 0x1d1   :  { %3490 = vmatpush2.bf16.msra.mxu0 %v8092_v41  ;;  %v8148_v41 = vld [vmem:[#allocation6 + $0x74] ss:$40 sps:$4 sm:$0xff]  }
 0x1d2   :  { %3533 = vmatpush2.bf16.msra.mxu1 %v8095_v43  ;;  %3491 = vmatprep.subr.bf16.mxu0 %v8100_v44  ;;  %v8151_v43 = vld [vmem:[#allocation6 + $0x574] ss:$40 sps:$4 sm:$0xff]   ;;  %v8146_v44 = vld [vmem:[#allocation6 + $0x70] ss:$40 sps:$4 sm:$0xff]  }
 0x1d3   :  { %3534 = vmatprep.subr.bf16.mxu1 %v8103_v45  ;;  %v8149_v45 = vld [vmem:[#allocation6 + $0x570] ss:$40 sps:$4 sm:$0xff]  }
 0x1d5   :  { %3492 = vmatpush2.bf16.msra.mxu0 %v8098_v48  ;;  %v8154_v48 = vld [vmem:[#allocation6 + $0x24] ss:$40 sps:$4 sm:$0xff]  }
 0x1d6   :  { %3535 = vmatpush2.bf16.msra.mxu1 %v8101_v49  ;;  %3493 = vmatprep.subr.bf16.mxu0 %v8106_v22  ;;  %v8157_v49 = vld [vmem:[#allocation6 + $0x524] ss:$40 sps:$4 sm:$0xff]   ;;  %v8152_v22 = vld [vmem:[#allocation6 + $0x20] ss:$40 sps:$4 sm:$0xff]  }
 0x1d7   :  { %3536 = vmatprep.subr.bf16.mxu1 %v8109_v51  ;;  %v8155_v51 = vld [vmem:[#allocation6 + $0x520] ss:$40 sps:$4 sm:$0xff]  }
 0x1d9   :  { %3494 = vmatpush2.bf16.msra.mxu0 %v8104_v23  ;;  %v8163_v23 = vld [vmem:[#allocation6 + $0x9d4] ss:$40 sps:$4 sm:$0xff]  }
 0x1da   :  { %3537 = vmatpush2.bf16.msra.mxu1 %v8107_v53  ;;  %3549 = vmatprep.subr.bf16.mxu0 %v8112_v54  ;;  %v8158_v53 = vld [vmem:[#allocation6 + $0x4d0] ss:$40 sps:$4 sm:$0xff]  }
 0x1db   :  { %3592 = vmatprep.subr.bf16.mxu1 %v8115_v56  ;;  %v8161_v54 = vld [vmem:[#allocation6 + $0x9d0] ss:$40 sps:$4 sm:$0xff]   ;;  %v8166_v56 = vld [vmem:[#allocation6 + $0x484] ss:$40 sps:$4 sm:$0xff]  }
 0x1dc   :  { %v3239_v62 = vpop.f32.mrf.mxu0  ;;  %3496 = vmatmul.mubr.bf16.vlgmr.msra.gmra.mxu0 %v9101_v63 }
 0x1dd   :  { %3539 = vmatmul.mubr.bf16.vlgmr.msra.gmra.mxu1 %v9079_v42  ;;  %v3282_v0 = vpop.f32.mrf.mxu1  ;;  %v3240_v3 = vadd.f32 %v3239_v62, %v3196_v40  ;;  %3550 = vmatpush1.bf16.msra.mxu0 %v8110_v57  ;;  %v8774_v42 = vld [vmem:[#allocation3 + $0xc] ss:$24 sps:$4 sm:$0xff]   ;;  %v8143_v40 = vld [vmem:[#allocation6 + $0x5c0] ss:$40 sps:$4 sm:$0xff]   ;;  %v8169_v57 = vld [vmem:[#allocation6 + $0x984] ss:$40 sps:$4 sm:$0xff]  }
 0x1de   :  { %3593 = vmatpush1.bf16.msra.mxu1 %v8113_v4  ;;  %v9106_v7 = vpop.f32.mrf.mxu0  ;;  %3551 = vmatprep.subr.bf16.mxu0 %v8118_v58  ;;  %v8164_v4 = vld [vmem:[#allocation6 + $0x480] ss:$40 sps:$4 sm:$0xff]   ;;  %v8173_v62 = vld [vmem:[#allocation6 + $0x930] ss:$40 sps:$4 sm:$0xff]  }
 0x1df   :  { %v9108_v8 = vpop.f32.mrf.mxu1  ;;  %3594 = vmatprep.subr.bf16.mxu1 %v8121_v32  ;;  %v3283_v9 = vadd.f32 %v3282_v0, %v3240_v3  ;;  %3581 = vmatprep.mubr.bf16.mxu0 %v8773_v13  ;;  %v8167_v58 = vld [vmem:[#allocation6 + $0x980] ss:$40 sps:$4 sm:$0xff]   ;;  %v8172_v32 = vld [vmem:[#allocation6 + $0x434] ss:$40 sps:$4 sm:$0xff]   ;;  %v8178_v0 = vld [vmem:[#allocation6 + $0x3e4] ss:$40 sps:$4 sm:$0xff]  }
 0x1e0   :  { %3624 = vmatprep.mubr.bf16.mxu1 %v8774_v42  ;;  %v3243_v14 = vpop.f32.mrf.mxu0  ;;  %v8179_v3 = vld [vmem:[#allocation6 + $0x8e0] ss:$40 sps:$4 sm:$0xff]   ;;  %v8185_v13 = vld [vmem:[#allocation6 + $0x890] ss:$40 sps:$4 sm:$0xff]   ;;  %v8190_v42 = vld [vmem:[#allocation6 + $0x344] ss:$40 sps:$4 sm:$0xff]  }
 0x1e1   :  { %v3286_v15 = vpop.f32.mrf.mxu1  ;;  %v3244_v19 = vadd.f32 %v3243_v14, %v3200_v52  ;;  %3552 = vmatpush1.bf16.msra.mxu0 %v8116_v60  ;;  %v3738_v24 = vadd.f32 %v3697_v18, %v3283_v9  ;;  %v8160_v52 = vld [vmem:[#allocation6 + $0x4d4] ss:$40 sps:$4 sm:$0xff]   ;;  %v8193_v14 = vld [vmem:[#allocation6 + $0x844] ss:$40 sps:$4 sm:$0xff]  }
 0x1e2   :  { %3595 = vmatpush1.bf16.msra.mxu1 %v8119_v61  ;;  %3553 = vmatprep.subr.bf16.mxu0 %v8124_v1  ;;  %v8175_v60 = vld [vmem:[#allocation6 + $0x934] ss:$40 sps:$4 sm:$0xff]   ;;  %v8170_v61 = vld [vmem:[#allocation6 + $0x430] ss:$40 sps:$4 sm:$0xff]   ;;  %v8181_v1 = vld [vmem:[#allocation6 + $0x8e4] ss:$40 sps:$4 sm:$0xff]  }
 0x1e3   :  { %3596 = vmatprep.subr.bf16.mxu1 %v8127_v2  ;;  %v3287_v20 = vadd.f32 %v3286_v15, %v3244_v19  ;;  %v8176_v2 = vld [vmem:[#allocation6 + $0x3e0] ss:$40 sps:$4 sm:$0xff]   ;;  %v8184_v9 = vld [vmem:[#allocation6 + $0x394] ss:$40 sps:$4 sm:$0xff]   ;;  %v8194_v19 = vld [vmem:[#allocation6 + $0x2f0] ss:$40 sps:$4 sm:$0xff]  }
 0x1e4   :  { %v8188_v15 = vld [vmem:[#allocation6 + $0x340] ss:$40 sps:$4 sm:$0xff]  }
 0x1e5   :  { %v3748_v50 = vadd.f32 %v3697_v18, %v3287_v20  ;;  %3554 = vmatpush1.bf16.msra.mxu0 %v8122_v11  ;;  %v8187_v11 = vld [vmem:[#allocation6 + $0x894] ss:$40 sps:$4 sm:$0xff]   ;;  %v8197_v20 = vld [vmem:[#allocation6 + $0x7f0] ss:$40 sps:$4 sm:$0xff]  }
 0x1e6   :  { %3597 = vmatpush1.bf16.msra.mxu1 %v8125_v12  ;;  %3555 = vmatprep.subr.bf16.mxu0 %v8130_v16  ;;  %v8182_v12 = vld [vmem:[#allocation6 + $0x390] ss:$40 sps:$4 sm:$0xff]   ;;  %v8191_v16 = vld [vmem:[#allocation6 + $0x840] ss:$40 sps:$4 sm:$0xff]   ;;  %v8199_v18 = vld [vmem:[#allocation6 + $0x7f4] ss:$40 sps:$4 sm:$0xff]  }
 0x1e7   :  { %3598 = vmatprep.subr.bf16.mxu1 %v8133_v17  ;;  %v9113_v30 = vpack.c.bf16 %v3748_v50, %v3738_v24  ;;  %v8196_v17 = vld [vmem:[#allocation6 + $0x2f4] ss:$40 sps:$4 sm:$0xff]   ;;  %v8202_v24 = vld [vmem:[#allocation6 + $0x2a4] ss:$40 sps:$4 sm:$0xff]  }
 0x1e8   :  { %v8205_v50 = vld [vmem:[#allocation6 + $0x7a4] ss:$40 sps:$4 sm:$0xff]  }
 0x1e9   :  { %3556 = vmatpush1.bf16.msra.mxu0 %v8128_v5  ;;  %v3117_v5 = vadd.f32 %v9093_v37, %v9072_v35  ;;  %v8208_v37 = vld [vmem:[#allocation6 + $0xc54] ss:$40 sps:$4 sm:$0xff]  }
 0x1ea   :  { %3599 = vmatpush1.bf16.msra.mxu1 %v8131_v10  ;;  %3557 = vmatprep.subr.bf16.mxu0 %v8136_v27  ;;  %v9118_v10 = vsub.s32 1, %v9070_v31  ;;  %v8200_v27 = vld [vmem:[#allocation6 + $0x2a0] ss:$40 sps:$4 sm:$0xff]  }
 0x1eb   :  { %3600 = vmatprep.subr.bf16.mxu1 %v8139_v29  ;;  %v8203_v29 = vld [vmem:[#allocation6 + $0x7a0] ss:$40 sps:$4 sm:$0xff]  }
 0x1ed   :  { %3558 = vmatpush1.bf16.msra.mxu0 %v8134_v33  ;;  %v3113_v33 = vadd.f32 %v9062_v26, %v9060_v25  ;;  %v8217_v25 = vld [vmem:[#allocation9 + $0xc4] ss:$16 sps:$4 sm:$0xff]  }
 0x1ee   :  { %3601 = vmatpush1.bf16.msra.mxu1 %v8137_v36  ;;  %3559 = vmatprep.subr.bf16.mxu0 %v8142_v34  ;;  %v3160_v36 = vadd.f32 %v9099_v59, %v3117_v5  ;;  %v8215_v59 = vld [vmem:[#allocation9 + $0xc0] ss:$16 sps:$4 sm:$0xff]  }
 0x1ef   :  { %3602 = vmatprep.subr.bf16.mxu1 %v8145_v38  ;;  %v3156_v34 = vadd.f32 %v9084_v46, %v3113_v33  ;;  %v9124_v38 = vld [vmem:[#allocation8] sm:$0xff]  ;;  %v8263_v5 = vld [vmem:[#allocation9 + $0x1c0] ss:$16 sps:$4 sm:$0xff]  }
 0x1f0   :  { %v3693_v35 = vrot.slane %v9124_v38, %v9118_v10  ;;  %v8212_v46 = vld [vmem:[#allocation6 + $0xc00] ss:$40 sps:$4 sm:$0xff]   ;;  %v8274_v33 = vld [vmem:[#allocation6 + $0xde4] ss:$40 sps:$4 sm:$0xff]  }
 0x1f1   :  { %3560 = vmatpush1.bf16.msra.mxu0 %v8140_v39  ;;  %v8211_v39 = vld [vmem:[#allocation9 + $0xe4] ss:$16 sps:$4 sm:$0xff]  }
 0x1f2   :  { %3603 = vmatpush1.bf16.msra.mxu1 %v8143_v40  ;;  %3561 = vmatprep.subr.bf16.mxu0 %v8148_v41  ;;  %v8206_v40 = vld [vmem:[#allocation6 + $0xc50] ss:$40 sps:$4 sm:$0xff]   ;;  %v3737_v26 = vadd.f32 %v3693_v35, %v3156_v34  ;;  %v8272_v34 = vld [vmem:[#allocation6 + $0xde0] ss:$40 sps:$4 sm:$0xff]  }
 0x1f3   :  { %3604 = vmatprep.subr.bf16.mxu1 %v8151_v43  ;;  %v8209_v41 = vld [vmem:[#allocation9 + $0xe0] ss:$16 sps:$4 sm:$0xff]   ;;  %v3747_v43 = vadd.f32 %v3693_v35, %v3160_v36  ;;  %v8277_v36 = vld [vmem:[#allocation9 + $0x184] ss:$16 sps:$4 sm:$0xff]  }
 0x1f4   :  { %v8275_v35 = vld [vmem:[#allocation9 + $0x180] ss:$16 sps:$4 sm:$0xff]  }
 0x1f5   :  { %3562 = vmatpush1.bf16.msra.mxu0 %v8146_v44  ;;  %v8214_v44 = vld [vmem:[#allocation6 + $0xc04] ss:$40 sps:$4 sm:$0xff]  }
 0x1f6   :  { %3605 = vmatpush1.bf16.msra.mxu1 %v8149_v45  ;;  %3563 = vmatprep.subr.bf16.mxu0 %v8154_v48  ;;  %v8776_v45 = vld [vmem:[#allocation3] ss:$24 sps:$4 sm:$0xff]   ;;  %v9129_v48 = vpack.c.bf16 %v3747_v43, %v3737_v26  ;;  %v8286_v43 = vld [vmem:[#allocation6 + $0xd44] ss:$40 sps:$4 sm:$0xff]  }
 0x1f7   :  { %3606 = vmatprep.subr.bf16.mxu1 %v8157_v49  ;;  %v8220_v49 = vld [vmem:[#allocation6 + $0xbb4] ss:$40 sps:$4 sm:$0xff]   ;;  %v8284_v26 = vld [vmem:[#allocation6 + $0xd40] ss:$40 sps:$4 sm:$0xff]  }
 0x1f9   :  { %3564 = vmatpush1.bf16.msra.mxu0 %v8152_v22  ;;  %v8223_v22 = vld [vmem:[#allocation9 + $0xa4] ss:$16 sps:$4 sm:$0xff]  }
 0x1fa   :  { %3607 = vmatpush1.bf16.msra.mxu1 %v8155_v51  ;;  %3565 = vmatprep.subr.bf16.mxu0 %v8160_v52  ;;  %v8218_v51 = vld [vmem:[#allocation6 + $0xbb0] ss:$40 sps:$4 sm:$0xff]  }
 0x1fb   :  { %3608 = vmatprep.subr.bf16.mxu1 %v8163_v23  ;;  %v8221_v52 = vld [vmem:[#allocation9 + $0xa0] ss:$16 sps:$4 sm:$0xff]  }
 0x1fc   :  { %v8777_v23 = vld [vmem:[#allocation3 + $0x14] ss:$24 sps:$4 sm:$0xff]  }
 0x1fd   :  { %3566 = vmatpush2.bf16.msra.mxu0 %v8158_v53  ;;  %v8226_v53 = vld [vmem:[#allocation6 + $0xb64] ss:$40 sps:$4 sm:$0xff]  }
 0x1fe   :  { %3609 = vmatpush2.bf16.msra.mxu1 %v8161_v54  ;;  %3567 = vmatprep.subr.bf16.mxu0 %v8166_v56  ;;  %v8229_v54 = vld [vmem:[#allocation9 + $0x84] ss:$16 sps:$4 sm:$0xff]   ;;  %v8227_v56 = vld [vmem:[#allocation9 + $0x80] ss:$16 sps:$4 sm:$0xff]  }
 0x1ff   :  { %3610 = vmatprep.subr.bf16.mxu1 %v8169_v57  ;;  %v8232_v57 = vld [vmem:[#allocation6 + $0xb14] ss:$40 sps:$4 sm:$0xff]  }
 0x201   :  { %3568 = vmatpush2.bf16.msra.mxu0 %v8164_v4  ;;  %v8235_v4 = vld [vmem:[#allocation9 + $0x64] ss:$16 sps:$4 sm:$0xff]  }
 0x202   :  { %3611 = vmatpush2.bf16.msra.mxu1 %v8167_v58  ;;  %3569 = vmatprep.subr.bf16.mxu0 %v8172_v32  ;;  %v8230_v58 = vld [vmem:[#allocation6 + $0xb10] ss:$40 sps:$4 sm:$0xff]  }
 0x203   :  { %3612 = vmatprep.subr.bf16.mxu1 %v8175_v60  ;;  %v8233_v32 = vld [vmem:[#allocation9 + $0x60] ss:$16 sps:$4 sm:$0xff]  }
 0x204   :  { %v8238_v60 = vld [vmem:[#allocation6 + $0xac4] ss:$40 sps:$4 sm:$0xff]  }
 0x205   :  { %3570 = vmatpush2.bf16.msra.mxu0 %v8170_v61  ;;  %v8241_v61 = vld [vmem:[#allocation9 + $0x44] ss:$16 sps:$4 sm:$0xff]  }
 0x206   :  { %3613 = vmatpush2.bf16.msra.mxu1 %v8173_v62  ;;  %3571 = vmatprep.subr.bf16.mxu0 %v8178_v0  ;;  %v8236_v62 = vld [vmem:[#allocation6 + $0xac0] ss:$40 sps:$4 sm:$0xff]  }
 0x207   :  { %3614 = vmatprep.subr.bf16.mxu1 %v8181_v1  ;;  %v8239_v0 = vld [vmem:[#allocation9 + $0x40] ss:$16 sps:$4 sm:$0xff]  }
 0x208   :  { %v8244_v1 = vld [vmem:[#allocation6 + $0xa74] ss:$40 sps:$4 sm:$0xff]  }
 0x209   :  { %3572 = vmatpush2.bf16.msra.mxu0 %v8176_v2  ;;  %v8247_v2 = vld [vmem:[#allocation9 + $0x24] ss:$16 sps:$4 sm:$0xff]  }
 0x20a   :  { %3615 = vmatpush2.bf16.msra.mxu1 %v8179_v3  ;;  %3573 = vmatprep.subr.bf16.mxu0 %v8184_v9  ;;  %v8242_v3 = vld [vmem:[#allocation6 + $0xa70] ss:$40 sps:$4 sm:$0xff]  }
 0x20b   :  { %3616 = vmatprep.subr.bf16.mxu1 %v8187_v11  ;;  %v8245_v9 = vld [vmem:[#allocation9 + $0x20] ss:$16 sps:$4 sm:$0xff]  }
 0x20c   :  { %v8250_v11 = vld [vmem:[#allocation6 + $0xa24] ss:$40 sps:$4 sm:$0xff]  }
 0x20d   :  { %3574 = vmatpush2.bf16.msra.mxu0 %v8182_v12  ;;  %v8253_v12 = vld [vmem:[#allocation9 + $0x4] ss:$16 sps:$4 sm:$0xff]  }
 0x20e   :  { %3617 = vmatpush2.bf16.msra.mxu1 %v8185_v13  ;;  %3575 = vmatprep.subr.bf16.mxu0 %v8190_v42  ;;  %v8248_v13 = vld [vmem:[#allocation6 + $0xa20] ss:$40 sps:$4 sm:$0xff]  }
 0x20f   :  { %3618 = vmatprep.subr.bf16.mxu1 %v8193_v14  ;;  %v8251_v42 = vld [vmem:[#allocation9] ss:$16 sps:$4 sm:$0xff]  }
 0x210   :  { %v8256_v14 = vld [vmem:[#allocation6 + $0xed4] ss:$40 sps:$4 sm:$0xff]  }
 0x211   :  { %3576 = vmatpush2.bf16.msra.mxu0 %v8188_v15  ;;  %v8259_v15 = vld [vmem:[#allocation9 + $0x1e4] ss:$16 sps:$4 sm:$0xff]  }
 0x212   :  { %3619 = vmatpush2.bf16.msra.mxu1 %v8191_v16  ;;  %3577 = vmatprep.subr.bf16.mxu0 %v8196_v17  ;;  %v8254_v16 = vld [vmem:[#allocation6 + $0xed0] ss:$40 sps:$4 sm:$0xff]  }
 0x213   :  { %3620 = vmatprep.subr.bf16.mxu1 %v8199_v18  ;;  %v8257_v17 = vld [vmem:[#allocation9 + $0x1e0] ss:$16 sps:$4 sm:$0xff]  }
 0x214   :  { %v8262_v18 = vld [vmem:[#allocation6 + $0xe84] ss:$40 sps:$4 sm:$0xff]  }
 0x215   :  { %3578 = vmatpush2.bf16.msra.mxu0 %v8194_v19  ;;  %v8265_v19 = vld [vmem:[#allocation9 + $0x1c4] ss:$16 sps:$4 sm:$0xff]  }
 0x216   :  { %3621 = vmatpush2.bf16.msra.mxu1 %v8197_v20  ;;  %3579 = vmatprep.subr.bf16.mxu0 %v8202_v24  ;;  %v8260_v20 = vld [vmem:[#allocation6 + $0xe80] ss:$40 sps:$4 sm:$0xff]   ;;  %v8268_v24 = vld [vmem:[#allocation6 + $0xe34] ss:$40 sps:$4 sm:$0xff]  }
 0x217   :  { %3622 = vmatprep.subr.bf16.mxu1 %v8205_v50  ;;  %v8271_v50 = vld [vmem:[#allocation9 + $0x1a4] ss:$16 sps:$4 sm:$0xff]  }
 0x219   :  { %3580 = vmatpush2.bf16.msra.mxu0 %v8200_v27  ;;  %v8266_v27 = vld [vmem:[#allocation6 + $0xe30] ss:$40 sps:$4 sm:$0xff]  }
 0x21a   :  { %3623 = vmatpush2.bf16.msra.mxu1 %v8203_v29  ;;  %3635 = vmatprep.subr.bf16.mxu0 %v8208_v37  ;;  %v8269_v29 = vld [vmem:[#allocation9 + $0x1a0] ss:$16 sps:$4 sm:$0xff]  }
 0x21b   :  { %5815 = vmatprep.subr.bf16.mxu1 %v8211_v39  ;;  %v8280_v37 = vld [vmem:[#allocation6 + $0xd94] ss:$40 sps:$4 sm:$0xff]  }
 0x21c   :  { %3582 = vmatmul.mubr.bf16.vlgmr.msra.gmra.mxu0 %v8776_v45  ;;  %v8283_v39 = vld [vmem:[#allocation9 + $0x164] ss:$16 sps:$4 sm:$0xff]  }
 0x21d   :  { %3625 = vmatmul.mubr.bf16.vlgmr.msra.gmra.mxu1 %v9101_v63  ;;  %3636 = vmatpush1.bf16.msra.mxu0 %v8206_v40  ;;  %v8224_v63 = vld [vmem:[#allocation6 + $0xb60] ss:$40 sps:$4 sm:$0xff]   ;;  %v8278_v40 = vld [vmem:[#allocation6 + $0xd90] ss:$40 sps:$4 sm:$0xff]   ;;  %v8292_v45 = vld [vmem:[#allocation6 + $0xcf4] ss:$40 sps:$4 sm:$0xff]  }
 0x21e   :  { %5816 = vmatpush1.bf16.msra.mxu1 %v8209_v41  ;;  %5847 = vmatprep.mubr.bf16.mxu1 %v9129_v48  ;;  %v8281_v41 = vld [vmem:[#allocation9 + $0x160] ss:$16 sps:$4 sm:$0xff]  }
 0x21f   :  { %3637 = vmatprep.subr.bf16.mxu0 %v8214_v44  ;;  %5817 = vmatprep.subr.bf16.mxu1 %v8217_v25  ;;  %v8289_v44 = vld [vmem:[#allocation9 + $0x144] ss:$16 sps:$4 sm:$0xff]   ;;  %v3245_v25 = vpop.f32.mrf.mxu0 }
 0x220   :  { %3667 = vmatprep.mubr.bf16.mxu0 %v8777_v23  ;;  %v3700_v23 = vsub.s32 3, %v9070_v31 }
 0x221   :  { %3638 = vmatpush1.bf16.msra.mxu0 %v8212_v46  ;;  %v8287_v46 = vld [vmem:[#allocation9 + $0x140] ss:$16 sps:$4 sm:$0xff]  }
 0x222   :  { %5818 = vmatpush1.bf16.msra.mxu1 %v8215_v59  ;;  %3639 = vmatprep.subr.bf16.mxu0 %v8220_v49  ;;  %v9132_v59 = vpop.f32.mrf.mxu0  ;;  %v8295_v49 = vld [vmem:[#allocation9 + $0x124] ss:$16 sps:$4 sm:$0xff]  }
 0x223   :  { %5819 = vmatprep.subr.bf16.mxu1 %v8223_v22  ;;  %v3246_v22 = vadd.f32 %v3245_v25, %v9097_v28  ;;  %v8320_v25 = vld [vmem:[#allocation9 + $0x280] ss:$16 sps:$4 sm:$0xff]  }
 0x225   :  { %3640 = vmatpush1.bf16.msra.mxu0 %v8218_v51  ;;  %v3288_v51 = vpop.f32.mrf.mxu1 }
 0x226   :  { %5820 = vmatpush1.bf16.msra.mxu1 %v8221_v52  ;;  %3641 = vmatprep.subr.bf16.mxu0 %v8226_v53  ;;  %v3242_v52 = vadd.f32 %v9106_v7, %v9095_v47  ;;  %v8290_v53 = vld [vmem:[#allocation6 + $0xcf0] ss:$40 sps:$4 sm:$0xff]   ;;  %v3701_v47 = vrot.slane %v9124_v38, %v3700_v23  ;;  %v8296_v7 = vld [vmem:[#allocation6 + $0xca0] ss:$40 sps:$4 sm:$0xff]  }
 0x227   :  { %5821 = vmatprep.subr.bf16.mxu1 %v8229_v54  ;;  %v8293_v54 = vld [vmem:[#allocation9 + $0x120] ss:$16 sps:$4 sm:$0xff]  }
 0x228   :  { %v3285_v28 = vadd.f32 %v9108_v8, %v3242_v52  ;;  %v8302_v8 = vld [vmem:[#allocation9 + $0x2e0] ss:$16 sps:$4 sm:$0xff]   ;;  %v8334_v52 = vld [vmem:[#allocation9 + $0x244] ss:$16 sps:$4 sm:$0xff]  }
 0x229   :  { %3642 = vmatpush1.bf16.msra.mxu0 %v8224_v63  ;;  %v9138_v63 = vpop.f32.mrf.mxu1 }
 0x22a   :  { %5822 = vmatpush1.bf16.msra.mxu1 %v8227_v56  ;;  %3643 = vmatprep.subr.bf16.mxu0 %v8232_v57  ;;  %v3327_v56 = vpop.f32.mrf.mxu0  ;;  %v8298_v57 = vld [vmem:[#allocation6 + $0xca4] ss:$40 sps:$4 sm:$0xff]  }
 0x22b   :  { %5823 = vmatprep.subr.bf16.mxu1 %v8235_v4  ;;  %v8301_v4 = vld [vmem:[#allocation9 + $0x104] ss:$16 sps:$4 sm:$0xff]  }
 0x22d   :  { %3644 = vmatpush1.bf16.msra.mxu0 %v8230_v58  ;;  %v3289_v58 = vadd.f32 %v3288_v51, %v3246_v22  ;;  %v8326_v22 = vld [vmem:[#allocation9 + $0x260] ss:$16 sps:$4 sm:$0xff]  }
 0x22e   :  { %5824 = vmatpush1.bf16.msra.mxu1 %v8233_v32  ;;  %3645 = vmatprep.subr.bf16.mxu0 %v8238_v60  ;;  %v8299_v32 = vld [vmem:[#allocation9 + $0x100] ss:$16 sps:$4 sm:$0xff]   ;;  %v3370_v60 = vpop.f32.mrf.mxu1 }
 0x22f   :  { %5825 = vmatprep.subr.bf16.mxu1 %v8241_v61  ;;  %v9144_v61 = vpop.f32.mrf.mxu0  ;;  %v8329_v51 = vld [vmem:[#allocation9 + $0x460] ss:$16 sps:$4 sm:$0xff]  }
 0x231   :  { %3646 = vmatpush1.bf16.msra.mxu0 %v8236_v62  ;;  %v8304_v62 = vld [vmem:[#allocation9 + $0x2e4] ss:$16 sps:$4 sm:$0xff]  }
 0x232   :  { %5826 = vmatpush1.bf16.msra.mxu1 %v8239_v0  ;;  %3647 = vmatprep.subr.bf16.mxu0 %v8244_v1  ;;  %v8307_v0 = vld [vmem:[#allocation9 + $0x4e4] ss:$16 sps:$4 sm:$0xff]   ;;  %v3749_v1 = vadd.f32 %v3701_v47, %v3289_v58  ;;  %v8338_v58 = vld [vmem:[#allocation9 + $0x220] ss:$16 sps:$4 sm:$0xff]  }
 0x233   :  { %5827 = vmatprep.subr.bf16.mxu1 %v8247_v2  ;;  %v3739_v2 = vadd.f32 %v3701_v47, %v3285_v28  ;;  %v8341_v28 = vld [vmem:[#allocation9 + $0x420] ss:$16 sps:$4 sm:$0xff]   ;;  %v8346_v47 = vld [vmem:[#allocation9 + $0x204] ss:$16 sps:$4 sm:$0xff]  }
 0x235   :  { %3648 = vmatpush1.bf16.msra.mxu0 %v8242_v3  ;;  %v9146_v3 = vpop.f32.mrf.mxu1 }
 0x236   :  { %5828 = vmatpush1.bf16.msra.mxu1 %v8245_v9  ;;  %3649 = vmatprep.subr.bf16.mxu0 %v8250_v11  ;;  %v3331_v9 = vpop.f32.mrf.mxu0  ;;  %v8305_v11 = vld [vmem:[#allocation9 + $0x4e0] ss:$16 sps:$4 sm:$0xff]  }
 0x237   :  { %5829 = vmatprep.subr.bf16.mxu1 %v8253_v12  ;;  %v8310_v12 = vld [vmem:[#allocation9 + $0x2c4] ss:$16 sps:$4 sm:$0xff]  }
 0x239   :  { %3650 = vmatpush1.bf16.msra.mxu0 %v8248_v13  ;;  %v9148_v13 = vpack.c.bf16 %v3749_v1, %v3739_v2  ;;  %v8350_v1 = vld [vmem:[#allocation9 + $0x3e0] ss:$16 sps:$4 sm:$0xff]  }
 0x23a   :  { %5830 = vmatpush1.bf16.msra.mxu1 %v8251_v42  ;;  %3651 = vmatprep.subr.bf16.mxu0 %v8256_v14  ;;  %v8313_v42 = vld [vmem:[#allocation9 + $0x4c4] ss:$16 sps:$4 sm:$0xff]   ;;  %v8353_v2 = vld [vmem:[#allocation9 + $0x5e0] ss:$16 sps:$4 sm:$0xff]  }
 0x23b   :  { %5831 = vmatprep.subr.bf16.mxu1 %v8259_v15  ;;  %v8778_v15 = vld [vmem:[#allocation3 + $0x10] ss:$24 sps:$4 sm:$0xff]  }
 0x23d   :  { %3652 = vmatpush2.bf16.msra.mxu0 %v8254_v16  ;;  %v3708_v16 = vsub.s32 5, %v9070_v31 }
 0x23e   :  { %5832 = vmatpush2.bf16.msra.mxu1 %v8257_v17  ;;  %3653 = vmatprep.subr.bf16.mxu0 %v8262_v18  ;;  %v8308_v17 = vld [vmem:[#allocation9 + $0x2c0] ss:$16 sps:$4 sm:$0xff]   ;;  %v3374_v18 = vpop.f32.mrf.mxu1 }
 0x23f   :  { %5833 = vmatprep.subr.bf16.mxu1 %v8265_v19 }
 0x241   :  { %3654 = vmatpush2.bf16.msra.mxu0 %v8260_v20  ;;  %v8311_v20 = vld [vmem:[#allocation9 + $0x4c0] ss:$16 sps:$4 sm:$0xff]  }
 0x242   :  { %5834 = vmatpush2.bf16.msra.mxu1 %v8263_v5  ;;  %3655 = vmatprep.subr.bf16.mxu0 %v8268_v24  ;;  %v8316_v5 = vld [vmem:[#allocation9 + $0x2a4] ss:$16 sps:$4 sm:$0xff]   ;;  %v3371_v24 = vadd.f32 %v3370_v60, %v3327_v56  ;;  %v8335_v56 = vld [vmem:[#allocation9 + $0x440] ss:$16 sps:$4 sm:$0xff]  }
 0x243   :  { %5835 = vmatprep.subr.bf16.mxu1 %v8271_v50  ;;  %v8319_v50 = vld [vmem:[#allocation9 + $0x4a4] ss:$16 sps:$4 sm:$0xff]   ;;  %v8347_v60 = vld [vmem:[#allocation9 + $0x400] ss:$16 sps:$4 sm:$0xff]  }
 0x245   :  { %3656 = vmatpush2.bf16.msra.mxu0 %v8266_v27 }
 0x246   :  { %5836 = vmatpush2.bf16.msra.mxu1 %v8269_v29  ;;  %3657 = vmatprep.subr.bf16.mxu0 %v8274_v33  ;;  %v3375_v29 = vadd.f32 %v3374_v18, %v3331_v9  ;;  %v8361_v9 = vld [vmem:[#allocation9 + $0x5c4] ss:$16 sps:$4 sm:$0xff]  }
 0x247   :  { %5837 = vmatprep.subr.bf16.mxu1 %v8277_v36  ;;  %v3709_v36 = vrot.slane %v9124_v38, %v3708_v16  ;;  %v8362_v16 = vld [vmem:[#allocation9 + $0x3a0] ss:$16 sps:$4 sm:$0xff]   ;;  %v8370_v18 = vld [vmem:[#allocation9 + $0x384] ss:$16 sps:$4 sm:$0xff]  }
 0x249   :  { %3658 = vmatpush2.bf16.msra.mxu0 %v8272_v34  ;;  %v8314_v34 = vld [vmem:[#allocation9 + $0x2a0] ss:$16 sps:$4 sm:$0xff]  }
 0x24a   :  { %5838 = vmatpush2.bf16.msra.mxu1 %v8275_v35  ;;  %3659 = vmatprep.subr.bf16.mxu0 %v8280_v37  ;;  %v8317_v37 = vld [vmem:[#allocation9 + $0x4a0] ss:$16 sps:$4 sm:$0xff]  }
 0x24b   :  { %5839 = vmatprep.subr.bf16.mxu1 %v8283_v39  ;;  %v8322_v39 = vld [vmem:[#allocation9 + $0x284] ss:$16 sps:$4 sm:$0xff]  }
 0x24d   :  { %3660 = vmatpush2.bf16.msra.mxu0 %v8278_v40 }
 0x24e   :  { %5840 = vmatpush2.bf16.msra.mxu1 %v8281_v41  ;;  %3661 = vmatprep.subr.bf16.mxu0 %v8286_v43  ;;  %v8325_v41 = vld [vmem:[#allocation9 + $0x484] ss:$16 sps:$4 sm:$0xff]  }
 0x24f   :  { %5841 = vmatprep.subr.bf16.mxu1 %v8289_v44 }
 0x251   :  { %3662 = vmatpush2.bf16.msra.mxu0 %v8284_v26  ;;  %v8323_v26 = vld [vmem:[#allocation9 + $0x480] ss:$16 sps:$4 sm:$0xff]  }
 0x252   :  { %5842 = vmatpush2.bf16.msra.mxu1 %v8287_v46  ;;  %3663 = vmatprep.subr.bf16.mxu0 %v8292_v45  ;;  %v8328_v46 = vld [vmem:[#allocation9 + $0x264] ss:$16 sps:$4 sm:$0xff]  }
 0x253   :  { %5843 = vmatprep.subr.bf16.mxu1 %v8295_v49  ;;  %v8331_v49 = vld [vmem:[#allocation9 + $0x464] ss:$16 sps:$4 sm:$0xff]  }
 0x255   :  { %3664 = vmatpush2.bf16.msra.mxu0 %v8290_v53  ;;  %v8337_v53 = vld [vmem:[#allocation9 + $0x444] ss:$16 sps:$4 sm:$0xff]  }
 0x256   :  { %5844 = vmatpush2.bf16.msra.mxu1 %v8293_v54  ;;  %3665 = vmatprep.subr.bf16.mxu0 %v8298_v57  ;;  %v8332_v54 = vld [vmem:[#allocation9 + $0x240] ss:$16 sps:$4 sm:$0xff]   ;;  %v8340_v57 = vld [vmem:[#allocation9 + $0x224] ss:$16 sps:$4 sm:$0xff]  }
 0x257   :  { %5845 = vmatprep.subr.bf16.mxu1 %v8301_v4  ;;  %v8343_v4 = vld [vmem:[#allocation9 + $0x424] ss:$16 sps:$4 sm:$0xff]  }
 0x259   :  { %3666 = vmatpush2.bf16.msra.mxu0 %v8296_v7  ;;  %v8349_v7 = vld [vmem:[#allocation9 + $0x404] ss:$16 sps:$4 sm:$0xff]  }
 0x25a   :  { %5846 = vmatpush2.bf16.msra.mxu1 %v8299_v32  ;;  %5858 = vmatprep.subr.bf16.mxu0 %v8304_v62  ;;  %v8344_v32 = vld [vmem:[#allocation9 + $0x200] ss:$16 sps:$4 sm:$0xff]   ;;  %v8352_v62 = vld [vmem:[#allocation9 + $0x3e4] ss:$16 sps:$4 sm:$0xff]  }
 0x25b   :  { %5901 = vmatprep.subr.bf16.mxu1 %v8307_v0  ;;  %v8355_v0 = vld [vmem:[#allocation9 + $0x5e4] ss:$16 sps:$4 sm:$0xff]  }
 0x25c   :  { %v9150_v14 = vpop.f32.mrf.mxu0  ;;  %3668 = vmatmul.mubr.bf16.vlgmr.msra.gmra.mxu0 %v8778_v15  ;;  %v8367_v15 = vld [vmem:[#allocation9 + $0x5a4] ss:$16 sps:$4 sm:$0xff]  }
 0x25d   :  { %5848 = vmatmul.mubr.bf16.vlgmr.msra.gmra.mxu1 %v9091_v55  ;;  %5859 = vmatpush1.bf16.msra.mxu0 %v8302_v8  ;;  %v8358_v8 = vld [vmem:[#allocation9 + $0x3c4] ss:$16 sps:$4 sm:$0xff]  }
 0x25e   :  { %5890 = vmatprep.mubr.bf16.mxu0 %v9148_v13  ;;  %5902 = vmatpush1.bf16.msra.mxu1 %v8305_v11  ;;  %v3413_v19 = vpop.f32.mrf.mxu0  ;;  %v8356_v11 = vld [vmem:[#allocation9 + $0x3c0] ss:$16 sps:$4 sm:$0xff]  }
 0x25f   :  { %5860 = vmatprep.subr.bf16.mxu0 %v8310_v12  ;;  %5903 = vmatprep.subr.bf16.mxu1 %v8313_v42  ;;  %v3414_v33 = vadd.f32 %v3413_v19, %v3371_v24  ;;  %v8359_v12 = vld [vmem:[#allocation9 + $0x5c0] ss:$16 sps:$4 sm:$0xff]   ;;  %v8364_v42 = vld [vmem:[#allocation9 + $0x3a4] ss:$16 sps:$4 sm:$0xff]  }
 0x260   :  { %v9155_v27 = vpop.f32.mrf.mxu0  ;;  %v8373_v19 = vld [vmem:[#allocation9 + $0x584] ss:$16 sps:$4 sm:$0xff]  }
 0x261   :  { %5861 = vmatpush1.bf16.msra.mxu0 %v8308_v17  ;;  %v3741_v43 = vadd.f32 %v3709_v36, %v3414_v33  ;;  %v8365_v17 = vld [vmem:[#allocation9 + $0x5a0] ss:$16 sps:$4 sm:$0xff]   ;;  %v8376_v24 = vld [vmem:[#allocation9 + $0x364] ss:$16 sps:$4 sm:$0xff]  }
 0x262   :  { %5904 = vmatpush1.bf16.msra.mxu1 %v8311_v20  ;;  %v3417_v35 = vpop.f32.mrf.mxu0  ;;  %5862 = vmatprep.subr.bf16.mxu0 %v8316_v5  ;;  %v8368_v20 = vld [vmem:[#allocation9 + $0x380] ss:$16 sps:$4 sm:$0xff]  }
 0x263   :  { %v3418_v40 = vadd.f32 %v3417_v35, %v3375_v29  ;;  %5905 = vmatprep.subr.bf16.mxu1 %v8319_v50  ;;  %v8371_v5 = vld [vmem:[#allocation9 + $0x580] ss:$16 sps:$4 sm:$0xff]   ;;  %v8379_v50 = vld [vmem:[#allocation9 + $0x564] ss:$16 sps:$4 sm:$0xff]   ;;  %v9161_v35 = vpop.f32.mrf.mxu1 }
 0x264   :  { %v8374_v29 = vld [vmem:[#allocation9 + $0x360] ss:$16 sps:$4 sm:$0xff]  }
 0x265   :  { %v3751_v44 = vadd.f32 %v3709_v36, %v3418_v40  ;;  %5863 = vmatpush1.bf16.msra.mxu0 %v8314_v34  ;;  %v8377_v33 = vld [vmem:[#allocation9 + $0x560] ss:$16 sps:$4 sm:$0xff]   ;;  %v8382_v36 = vld [vmem:[#allocation9 + $0x344] ss:$16 sps:$4 sm:$0xff]  }
 0x266   :  { %5906 = vmatpush1.bf16.msra.mxu1 %v8317_v37  ;;  %5864 = vmatprep.subr.bf16.mxu0 %v8322_v39  ;;  %v8385_v34 = vld [vmem:[#allocation9 + $0x544] ss:$16 sps:$4 sm:$0xff]   ;;  %v8380_v37 = vld [vmem:[#allocation9 + $0x340] ss:$16 sps:$4 sm:$0xff]  }
 0x267   :  { %5907 = vmatprep.subr.bf16.mxu1 %v8325_v41  ;;  %v9158_v45 = vpack.c.bf16 %v3751_v44, %v3741_v43  ;;  %v8383_v39 = vld [vmem:[#allocation9 + $0x540] ss:$16 sps:$4 sm:$0xff]   ;;  %v8388_v40 = vld [vmem:[#allocation9 + $0x324] ss:$16 sps:$4 sm:$0xff]   ;;  %v3456_v43 = vpop.f32.mrf.mxu1  ;;  %v3373_v44 = vadd.f32 %v9146_v3, %v9144_v61 }
 0x268   :  { %v8391_v41 = vld [vmem:[#allocation9 + $0x524] ss:$16 sps:$4 sm:$0xff]   ;;  %v8392_v3 = vld [vmem:[#allocation9 + $0x300] ss:$16 sps:$4 sm:$0xff]  }
 0x269   :  { %5865 = vmatpush1.bf16.msra.mxu0 %v8320_v25  ;;  %5933 = vmatprep.mubr.bf16.mxu1 %v9158_v45  ;;  %v3704_v25 = vsub.s32 4, %v9070_v31 }
 0x26a   :  { %5908 = vmatpush1.bf16.msra.mxu1 %v8323_v26  ;;  %5866 = vmatprep.subr.bf16.mxu0 %v8328_v46  ;;  %v8386_v26 = vld [vmem:[#allocation9 + $0x320] ss:$16 sps:$4 sm:$0xff]  }
 0x26b   :  { %5909 = vmatprep.subr.bf16.mxu1 %v8331_v49  ;;  %v8389_v46 = vld [vmem:[#allocation9 + $0x520] ss:$16 sps:$4 sm:$0xff]   ;;  %v8394_v49 = vld [vmem:[#allocation9 + $0x304] ss:$16 sps:$4 sm:$0xff]   ;;  %v3705_v61 = vrot.slane %v9124_v38, %v3704_v25 }
 0x26c   :  { %v8482_v25 = vld [vmem:[#allocation9 + $0x860] ss:$16 sps:$4 sm:$0xff]  }
 0x26d   :  { %5867 = vmatpush1.bf16.msra.mxu0 %v8326_v22  ;;  %v3369_v22 = vadd.f32 %v9138_v63, %v9132_v59 }
 0x26e   :  { %5910 = vmatpush1.bf16.msra.mxu1 %v8329_v51  ;;  %5868 = vmatprep.subr.bf16.mxu0 %v8334_v52  ;;  %v3416_v51 = vadd.f32 %v9155_v27, %v3373_v44  ;;  %v8397_v52 = vld [vmem:[#allocation9 + $0x504] ss:$16 sps:$4 sm:$0xff]   ;;  %v8398_v27 = vld [vmem:[#allocation9 + $0x6e0] ss:$16 sps:$4 sm:$0xff]  }
 0x26f   :  { %5911 = vmatprep.subr.bf16.mxu1 %v8337_v53  ;;  %v9169_v53 = vpop.f32.mrf.mxu1  ;;  %v8410_v44 = vld [vmem:[#allocation9 + $0x660] ss:$16 sps:$4 sm:$0xff]  }
 0x271   :  { %5869 = vmatpush1.bf16.msra.mxu0 %v8332_v54  ;;  %v3412_v54 = vadd.f32 %v9150_v14, %v3369_v22  ;;  %v3460_v59 = vpop.f32.mrf.mxu1  ;;  %v8488_v22 = vld [vmem:[#allocation9 + $0x840] ss:$16 sps:$4 sm:$0xff]  }
 0x272   :  { %5912 = vmatpush1.bf16.msra.mxu1 %v8335_v56  ;;  %5870 = vmatprep.subr.bf16.mxu0 %v8340_v57  ;;  %v8395_v56 = vld [vmem:[#allocation9 + $0x500] ss:$16 sps:$4 sm:$0xff]   ;;  %v8400_v57 = vld [vmem:[#allocation9 + $0x6e4] ss:$16 sps:$4 sm:$0xff]  }
 0x273   :  { %5913 = vmatprep.subr.bf16.mxu1 %v8343_v4  ;;  %v3750_v4 = vadd.f32 %v3705_v61, %v3416_v51  ;;  %v3740_v63 = vadd.f32 %v3705_v61, %v3412_v54  ;;  %v8496_v51 = vld [vmem:[#allocation9 + $0x824] ss:$16 sps:$4 sm:$0xff]   ;;  %v8494_v61 = vld [vmem:[#allocation9 + $0x820] ss:$16 sps:$4 sm:$0xff]  }
 0x274   :  { %v8421_v54 = vld [vmem:[#allocation9 + $0x604] ss:$16 sps:$4 sm:$0xff]  }
 0x275   :  { %5871 = vmatpush1.bf16.msra.mxu0 %v8338_v58  ;;  %v8460_v58 = vld [vmem:[#allocation9 + $0x8e4] ss:$16 sps:$4 sm:$0xff]   ;;  %v9173_v14 = vpack.c.bf16 %v3750_v4, %v3740_v63  ;;  %v8500_v4 = vld [vmem:[#allocation9 + $0x800] ss:$16 sps:$4 sm:$0xff]  }
 0x276   :  { %5914 = vmatpush1.bf16.msra.mxu1 %v8341_v28  ;;  %5872 = vmatprep.subr.bf16.mxu0 %v8346_v47  ;;  %v8403_v28 = vld [vmem:[#allocation9 + $0x6c4] ss:$16 sps:$4 sm:$0xff]   ;;  %v8458_v47 = vld [vmem:[#allocation9 + $0x8e0] ss:$16 sps:$4 sm:$0xff]  }
 0x277   :  { %5915 = vmatprep.subr.bf16.mxu1 %v8349_v7  ;;  %v8466_v7 = vld [vmem:[#allocation9 + $0x8c4] ss:$16 sps:$4 sm:$0xff]  }
 0x278   :  { %v8427_v63 = vld [vmem:[#allocation9 + $0x7c4] ss:$16 sps:$4 sm:$0xff]  }
 0x279   :  { %5873 = vmatpush1.bf16.msra.mxu0 %v8344_v32 }
 0x27a   :  { %5916 = vmatpush1.bf16.msra.mxu1 %v8347_v60  ;;  %5874 = vmatprep.subr.bf16.mxu0 %v8352_v62  ;;  %v8401_v62 = vld [vmem:[#allocation9 + $0x6c0] ss:$16 sps:$4 sm:$0xff]  }
 0x27b   :  { %5917 = vmatprep.subr.bf16.mxu1 %v8355_v0 }
 0x27d   :  { %5875 = vmatpush2.bf16.msra.mxu0 %v8350_v1 }
 0x27e   :  { %5918 = vmatpush2.bf16.msra.mxu1 %v8353_v2  ;;  %5876 = vmatprep.subr.bf16.mxu0 %v8358_v8  ;;  %v8406_v2 = vld [vmem:[#allocation9 + $0x6a4] ss:$16 sps:$4 sm:$0xff]   ;;  %v8464_v8 = vld [vmem:[#allocation9 + $0x8c0] ss:$16 sps:$4 sm:$0xff]  }
 0x27f   :  { %5919 = vmatprep.subr.bf16.mxu1 %v8361_v9 }
 0x281   :  { %5877 = vmatpush2.bf16.msra.mxu0 %v8356_v11  ;;  %v3716_v11 = vsub.s32 7, %v9070_v31 }
 0x282   :  { %5920 = vmatpush2.bf16.msra.mxu1 %v8359_v12  ;;  %5878 = vmatprep.subr.bf16.mxu0 %v8364_v42  ;;  %v8472_v12 = vld [vmem:[#allocation9 + $0x8a4] ss:$16 sps:$4 sm:$0xff]  }
 0x283   :  { %5921 = vmatprep.subr.bf16.mxu1 %v8367_v15 }
 0x285   :  { %5879 = vmatpush2.bf16.msra.mxu0 %v8362_v16  ;;  %v8404_v16 = vld [vmem:[#allocation9 + $0x6a0] ss:$16 sps:$4 sm:$0xff]  }
 0x286   :  { %5922 = vmatpush2.bf16.msra.mxu1 %v8365_v17  ;;  %5880 = vmatprep.subr.bf16.mxu0 %v8370_v18 }
 0x287   :  { %5923 = vmatprep.subr.bf16.mxu1 %v8373_v19  ;;  %v8409_v19 = vld [vmem:[#allocation9 + $0x684] ss:$16 sps:$4 sm:$0xff]  }
 0x289   :  { %5881 = vmatpush2.bf16.msra.mxu0 %v8368_v20  ;;  %v8470_v20 = vld [vmem:[#allocation9 + $0x8a0] ss:$16 sps:$4 sm:$0xff]  }
 0x28a   :  { %5924 = vmatpush2.bf16.msra.mxu1 %v8371_v5  ;;  %5882 = vmatprep.subr.bf16.mxu0 %v8376_v24  ;;  %v3717_v24 = vrot.slane %v9124_v38, %v3716_v11  ;;  %v8415_v38 = vld [vmem:[#allocation9 + $0x644] ss:$16 sps:$4 sm:$0xff]   ;;  %v8431_v11 = vld [vmem:[#allocation9 + $0x780] ss:$16 sps:$4 sm:$0xff]  }
 0x28b   :  { %5925 = vmatprep.subr.bf16.mxu1 %v8379_v50 }
 0x28d   :  { %5883 = vmatpush2.bf16.msra.mxu0 %v8374_v29  ;;  %v8478_v29 = vld [vmem:[#allocation9 + $0x884] ss:$16 sps:$4 sm:$0xff]  }
 0x28e   :  { %5926 = vmatpush2.bf16.msra.mxu1 %v8377_v33  ;;  %5884 = vmatprep.subr.bf16.mxu0 %v8382_v36  ;;  %v8407_v36 = vld [vmem:[#allocation9 + $0x680] ss:$16 sps:$4 sm:$0xff]  }
 0x28f   :  { %5927 = vmatprep.subr.bf16.mxu1 %v8385_v34  ;;  %v8412_v34 = vld [vmem:[#allocation9 + $0x664] ss:$16 sps:$4 sm:$0xff]  }
 0x291   :  { %5885 = vmatpush2.bf16.msra.mxu0 %v8380_v37  ;;  %v8476_v37 = vld [vmem:[#allocation9 + $0x880] ss:$16 sps:$4 sm:$0xff]  }
 0x292   :  { %5928 = vmatpush2.bf16.msra.mxu1 %v8383_v39  ;;  %5886 = vmatprep.subr.bf16.mxu0 %v8388_v40 }
 0x293   :  { %5929 = vmatprep.subr.bf16.mxu1 %v8391_v41  ;;  %v8484_v41 = vld [vmem:[#allocation9 + $0x864] ss:$16 sps:$4 sm:$0xff]  }
 0x295   :  { %5887 = vmatpush2.bf16.msra.mxu0 %v8386_v26  ;;  %v8490_v26 = vld [vmem:[#allocation9 + $0x844] ss:$16 sps:$4 sm:$0xff]  }
 0x296   :  { %5930 = vmatpush2.bf16.msra.mxu1 %v8389_v46  ;;  %5888 = vmatprep.subr.bf16.mxu0 %v8394_v49  ;;  %v8413_v46 = vld [vmem:[#allocation9 + $0x640] ss:$16 sps:$4 sm:$0xff]   ;;  %v8418_v49 = vld [vmem:[#allocation9 + $0x624] ss:$16 sps:$4 sm:$0xff]  }
 0x297   :  { %5931 = vmatprep.subr.bf16.mxu1 %v8397_v52  ;;  %v8416_v52 = vld [vmem:[#allocation9 + $0x620] ss:$16 sps:$4 sm:$0xff]  }
 0x299   :  { %5889 = vmatpush2.bf16.msra.mxu0 %v8392_v3  ;;  %v8502_v3 = vld [vmem:[#allocation9 + $0x804] ss:$16 sps:$4 sm:$0xff]  }
 0x29a   :  { %5932 = vmatpush2.bf16.msra.mxu1 %v8395_v56  ;;  %5944 = vmatprep.subr.bf16.mxu0 %v8400_v57  ;;  %v8419_v56 = vld [vmem:[#allocation9 + $0x600] ss:$16 sps:$4 sm:$0xff]   ;;  %v8424_v57 = vld [vmem:[#allocation9 + $0x7e4] ss:$16 sps:$4 sm:$0xff]  }
 0x29b   :  { %5987 = vmatprep.subr.bf16.mxu1 %v8460_v58  ;;  %v8508_v58 = vld [vmem:[#allocation9 + $0x9e4] ss:$16 sps:$4 sm:$0xff]  }
 0x29c   :  { %v9175_v32 = vpop.f32.mrf.mxu0  ;;  %5891 = vmatmul.mubr.bf16.vlgmr.msra.gmra.mxu0 %v9113_v30 }
 0x29d   :  { %v9178_v60 = vpop.f32.mrf.mxu1  ;;  %5934 = vmatmul.mubr.bf16.vlgmr.msra.gmra.mxu1 %v9173_v14  ;;  %5945 = vmatpush1.bf16.msra.mxu0 %v8398_v27  ;;  %v8506_v27 = vld [vmem:[#allocation9 + $0x9e0] ss:$16 sps:$4 sm:$0xff]  }
 0x29e   :  { %v3499_v0 = vpop.f32.mrf.mxu0  ;;  %5946 = vmatprep.subr.bf16.mxu0 %v8403_v28  ;;  %5988 = vmatpush1.bf16.msra.mxu1 %v8458_v47  ;;  %v8514_v28 = vld [vmem:[#allocation9 + $0x9c4] ss:$16 sps:$4 sm:$0xff]   ;;  %v8425_v47 = vld [vmem:[#allocation9 + $0x7c0] ss:$16 sps:$4 sm:$0xff]  }
 0x29f   :  { %v3542_v1 = vpop.f32.mrf.mxu1  ;;  %v3500_v9 = vadd.f32 %v3499_v0, %v3456_v43  ;;  %5989 = vmatprep.subr.bf16.mxu1 %v8466_v7  ;;  %v8430_v7 = vld [vmem:[#allocation9 + $0x7a4] ss:$16 sps:$4 sm:$0xff]  }
 0x2a0   :  { %v9182_v42 = vpop.f32.mrf.mxu0  ;;  %v8520_v0 = vld [vmem:[#allocation9 + $0x9a4] ss:$16 sps:$4 sm:$0xff]  }
 0x2a1   :  { %v9184_v15 = vpop.f32.mrf.mxu1  ;;  %5947 = vmatpush1.bf16.msra.mxu0 %v8401_v62  ;;  %v3543_v5 = vadd.f32 %v3542_v1, %v3500_v9  ;;  %v8512_v62 = vld [vmem:[#allocation9 + $0x9c0] ss:$16 sps:$4 sm:$0xff]   ;;  %v8526_v9 = vld [vmem:[#allocation9 + $0x984] ss:$16 sps:$4 sm:$0xff]  }
 0x2a2   :  { %v3503_v17 = vpop.f32.mrf.mxu0  ;;  %5948 = vmatprep.subr.bf16.mxu0 %v8406_v2  ;;  %5990 = vmatpush1.bf16.msra.mxu1 %v8464_v8  ;;  %v8428_v1 = vld [vmem:[#allocation9 + $0x7a0] ss:$16 sps:$4 sm:$0xff]   ;;  %v8433_v2 = vld [vmem:[#allocation9 + $0x784] ss:$16 sps:$4 sm:$0xff]  }
 0x2a3   :  { %v3546_v18 = vpop.f32.mrf.mxu1  ;;  %v3504_v50 = vadd.f32 %v3503_v17, %v3460_v59  ;;  %5991 = vmatprep.subr.bf16.mxu1 %v8472_v12  ;;  %v3743_v39 = vadd.f32 %v3717_v24, %v3543_v5  ;;  %v8422_v59 = vld [vmem:[#allocation9 + $0x7e0] ss:$16 sps:$4 sm:$0xff]   ;;  %v8436_v12 = vld [vmem:[#allocation9 + $0x764] ss:$16 sps:$4 sm:$0xff]  }
 0x2a4   :  { %v8518_v8 = vld [vmem:[#allocation9 + $0x9a0] ss:$16 sps:$4 sm:$0xff]   ;;  %v8532_v17 = vld [vmem:[#allocation9 + $0x964] ss:$16 sps:$4 sm:$0xff]  }
 0x2a5   :  { %v3547_v33 = vadd.f32 %v3546_v18, %v3504_v50  ;;  %5949 = vmatpush1.bf16.msra.mxu0 %v8404_v16  ;;  %v8524_v16 = vld [vmem:[#allocation9 + $0x980] ss:$16 sps:$4 sm:$0xff]   ;;  %v8538_v5 = vld [vmem:[#allocation9 + $0x944] ss:$16 sps:$4 sm:$0xff]   ;;  %v3502_v50 = vadd.f32 %v9182_v42, %v9169_v53 }
 0x2a6   :  { %5950 = vmatprep.subr.bf16.mxu0 %v8409_v19  ;;  %5992 = vmatpush1.bf16.msra.mxu1 %v8470_v20  ;;  %v8434_v18 = vld [vmem:[#allocation9 + $0x760] ss:$16 sps:$4 sm:$0xff]   ;;  %v8439_v19 = vld [vmem:[#allocation9 + $0x744] ss:$16 sps:$4 sm:$0xff]  }
 0x2a7   :  { %v3753_v40 = vadd.f32 %v3717_v24, %v3547_v33  ;;  %5993 = vmatprep.subr.bf16.mxu1 %v8478_v29  ;;  %v8530_v20 = vld [vmem:[#allocation9 + $0x960] ss:$16 sps:$4 sm:$0xff]   ;;  %v8442_v29 = vld [vmem:[#allocation9 + $0x724] ss:$16 sps:$4 sm:$0xff]  }
 0x2a8   :  { %v8437_v24 = vld [vmem:[#allocation9 + $0x740] ss:$16 sps:$4 sm:$0xff]   ;;  %v8550_v53 = vld [vmem:[#allocation9 + $0x904] ss:$16 sps:$4 sm:$0xff]  }
 0x2a9   :  { %5951 = vmatpush1.bf16.msra.mxu0 %v8407_v36  ;;  %v9187_v43 = vpack.c.bf16 %v3753_v40, %v3743_v39  ;;  %v8536_v33 = vld [vmem:[#allocation9 + $0x940] ss:$16 sps:$4 sm:$0xff]   ;;  %v8544_v36 = vld [vmem:[#allocation9 + $0x924] ss:$16 sps:$4 sm:$0xff]   ;;  %v3545_v40 = vadd.f32 %v9184_v15, %v3502_v50  ;;  %v8529_v50 = vld [vmem:[#allocation9 + $0x10c] ss:$16 sps:$4 sm:$0xff]  }
 0x2aa   :  { %5952 = vmatprep.subr.bf16.mxu0 %v8412_v34  ;;  %5994 = vmatpush1.bf16.msra.mxu1 %v8476_v37  ;;  %v3498_v34 = vadd.f32 %v9175_v32, %v9161_v35  ;;  %v3712_v37 = vsub.s32 6, %v9070_v31  ;;  %v8440_v39 = vld [vmem:[#allocation9 + $0x720] ss:$16 sps:$4 sm:$0xff]   ;;  %v8448_v35 = vld [vmem:[#allocation9 + $0xec] ss:$16 sps:$4 sm:$0xff]  }
 0x2ab   :  { %5976 = vmatprep.mubr.bf16.mxu0 %v9187_v43  ;;  %5995 = vmatprep.subr.bf16.mxu1 %v8484_v41  ;;  %v8445_v41 = vld [vmem:[#allocation9 + $0x704] ss:$16 sps:$4 sm:$0xff]   ;;  %v8548_v32 = vld [vmem:[#allocation9 + $0x900] ss:$16 sps:$4 sm:$0xff]  }
 0x2ac   :  { %v3541_v42 = vadd.f32 %v9178_v60, %v3498_v34  ;;  %v8449_v60 = vld [vmem:[#allocation9 + $0xc8] ss:$16 sps:$4 sm:$0xff]   ;;  %v8535_v34 = vld [vmem:[#allocation9 + $0x4ec] ss:$16 sps:$4 sm:$0xff]  }
 0x2ad   :  { %5953 = vmatpush1.bf16.msra.mxu0 %v8410_v44  ;;  %v8542_v44 = vld [vmem:[#allocation9 + $0x920] ss:$16 sps:$4 sm:$0xff]  }
 0x2ae   :  { %5954 = vmatprep.subr.bf16.mxu0 %v8415_v38  ;;  %5996 = vmatpush1.bf16.msra.mxu1 %v8482_v25  ;;  %v8779_v38 = vld [vmem:[#allocation8] sm:$0xff] }
 0x2af   :  { %5997 = vmatprep.subr.bf16.mxu1 %v8490_v26  ;;  %v3713_v25 = vrot.slane %v8779_v38, %v3712_v37  ;;  %v8443_v26 = vld [vmem:[#allocation9 + $0x700] ss:$16 sps:$4 sm:$0xff]   ;;  %v8533_v37 = vld [vmem:[#allocation9 + $0x4e8] ss:$16 sps:$4 sm:$0xff]  }
 0x2b1   :  { %5955 = vmatpush1.bf16.msra.mxu0 %v8413_v46  ;;  %v3752_v46 = vadd.f32 %v3713_v25, %v3545_v40  ;;  %v3742_v15 = vadd.f32 %v3713_v25, %v3541_v42  ;;  %v8547_v25 = vld [vmem:[#allocation9 + $0x4ac] ss:$16 sps:$4 sm:$0xff]  }
 0x2b2   :  { %5956 = vmatprep.subr.bf16.mxu0 %v8418_v49  ;;  %5998 = vmatpush1.bf16.msra.mxu1 %v8488_v22  ;;  %v8556_v49 = vld [vmem:[#allocation9 + $0x2ec] ss:$16 sps:$4 sm:$0xff]   ;;  %v8446_v22 = vld [vmem:[#allocation9 + $0xe8] ss:$16 sps:$4 sm:$0xff]  }
 0x2b3   :  { %5999 = vmatprep.subr.bf16.mxu1 %v8496_v51  ;;  %v9197_v51 = vpack.c.bf16 %v3752_v46, %v3742_v15 }
 0x2b5   :  { %5957 = vmatpush1.bf16.msra.mxu0 %v8416_v52  ;;  %v8451_v52 = vld [vmem:[#allocation9 + $0xcc] ss:$16 sps:$4 sm:$0xff]  }
 0x2b6   :  { %5958 = vmatprep.subr.bf16.mxu0 %v8421_v54  ;;  %6000 = vmatpush1.bf16.msra.mxu1 %v8494_v61  ;;  %v8454_v54 = vld [vmem:[#allocation9 + $0xac] ss:$16 sps:$4 sm:$0xff]   ;;  %v8452_v61 = vld [vmem:[#allocation9 + $0xa8] ss:$16 sps:$4 sm:$0xff]  }
 0x2b7   :  { %6001 = vmatprep.subr.bf16.mxu1 %v8502_v3  ;;  %v8457_v3 = vld [vmem:[#allocation9 + $0x8c] ss:$16 sps:$4 sm:$0xff]  }
 0x2b9   :  { %5959 = vmatpush1.bf16.msra.mxu0 %v8419_v56  ;;  %v8455_v56 = vld [vmem:[#allocation9 + $0x88] ss:$16 sps:$4 sm:$0xff]  }
 0x2ba   :  { %5960 = vmatprep.subr.bf16.mxu0 %v8424_v57  ;;  %6002 = vmatpush1.bf16.msra.mxu1 %v8500_v4  ;;  %v8463_v57 = vld [vmem:[#allocation9 + $0x6c] ss:$16 sps:$4 sm:$0xff]   ;;  %v8461_v4 = vld [vmem:[#allocation9 + $0x68] ss:$16 sps:$4 sm:$0xff]  }
 0x2bb   :  { %6003 = vmatprep.subr.bf16.mxu1 %v8508_v58  ;;  %v8469_v58 = vld [vmem:[#allocation9 + $0x4c] ss:$16 sps:$4 sm:$0xff]  }
 0x2bd   :  { %5961 = vmatpush2.bf16.msra.mxu0 %v8422_v59  ;;  %v8467_v59 = vld [vmem:[#allocation9 + $0x48] ss:$16 sps:$4 sm:$0xff]  }
 0x2be   :  { %5962 = vmatprep.subr.bf16.mxu0 %v8427_v63  ;;  %6004 = vmatpush2.bf16.msra.mxu1 %v8506_v27  ;;  %v8475_v63 = vld [vmem:[#allocation9 + $0x2c] ss:$16 sps:$4 sm:$0xff]  }
 0x2bf   :  { %6005 = vmatprep.subr.bf16.mxu1 %v8514_v28  ;;  %v8481_v27 = vld [vmem:[#allocation9 + $0xc] ss:$16 sps:$4 sm:$0xff]   ;;  %v8479_v28 = vld [vmem:[#allocation9 + $0x8] ss:$16 sps:$4 sm:$0xff]  }
 0x2c1   :  { %5963 = vmatpush2.bf16.msra.mxu0 %v8425_v47  ;;  %v8487_v47 = vld [vmem:[#allocation9 + $0x1ec] ss:$16 sps:$4 sm:$0xff]  }
 0x2c2   :  { %5964 = vmatprep.subr.bf16.mxu0 %v8430_v7  ;;  %6006 = vmatpush2.bf16.msra.mxu1 %v8512_v62  ;;  %v8485_v7 = vld [vmem:[#allocation9 + $0x1e8] ss:$16 sps:$4 sm:$0xff]   ;;  %v8493_v62 = vld [vmem:[#allocation9 + $0x1cc] ss:$16 sps:$4 sm:$0xff]  }
 0x2c3   :  { %6007 = vmatprep.subr.bf16.mxu1 %v8520_v0  ;;  %v8491_v0 = vld [vmem:[#allocation9 + $0x1c8] ss:$16 sps:$4 sm:$0xff]  }
 0x2c5   :  { %5965 = vmatpush2.bf16.msra.mxu0 %v8428_v1  ;;  %v8499_v1 = vld [vmem:[#allocation9 + $0x1ac] ss:$16 sps:$4 sm:$0xff]  }
 0x2c6   :  { %5966 = vmatprep.subr.bf16.mxu0 %v8433_v2  ;;  %6008 = vmatpush2.bf16.msra.mxu1 %v8518_v8  ;;  %v8497_v2 = vld [vmem:[#allocation9 + $0x1a8] ss:$16 sps:$4 sm:$0xff]   ;;  %v8505_v8 = vld [vmem:[#allocation9 + $0x18c] ss:$16 sps:$4 sm:$0xff]  }
 0x2c7   :  { %6009 = vmatprep.subr.bf16.mxu1 %v8526_v9  ;;  %v8503_v9 = vld [vmem:[#allocation9 + $0x188] ss:$16 sps:$4 sm:$0xff]  }
 0x2c9   :  { %5967 = vmatpush2.bf16.msra.mxu0 %v8431_v11  ;;  %v8511_v11 = vld [vmem:[#allocation9 + $0x16c] ss:$16 sps:$4 sm:$0xff]  }
 0x2ca   :  { %5968 = vmatprep.subr.bf16.mxu0 %v8436_v12  ;;  %6010 = vmatpush2.bf16.msra.mxu1 %v8524_v16  ;;  %v8509_v12 = vld [vmem:[#allocation9 + $0x168] ss:$16 sps:$4 sm:$0xff]   ;;  %v8517_v16 = vld [vmem:[#allocation9 + $0x14c] ss:$16 sps:$4 sm:$0xff]  }
 0x2cb   :  { %6011 = vmatprep.subr.bf16.mxu1 %v8532_v17  ;;  %v8515_v17 = vld [vmem:[#allocation9 + $0x148] ss:$16 sps:$4 sm:$0xff]  }
 0x2cd   :  { %5969 = vmatpush2.bf16.msra.mxu0 %v8434_v18 }
 0x2ce   :  { %5970 = vmatprep.subr.bf16.mxu0 %v8439_v19  ;;  %6012 = vmatpush2.bf16.msra.mxu1 %v8530_v20  ;;  %v8523_v19 = vld [vmem:[#allocation9 + $0x12c] ss:$16 sps:$4 sm:$0xff]   ;;  %v8521_v20 = vld [vmem:[#allocation9 + $0x128] ss:$16 sps:$4 sm:$0xff]  }
 0x2cf   :  { %6013 = vmatprep.subr.bf16.mxu1 %v8538_v5 }
 0x2d1   :  { %5971 = vmatpush2.bf16.msra.mxu0 %v8437_v24 }
 0x2d2   :  { %5972 = vmatprep.subr.bf16.mxu0 %v8442_v29  ;;  %6014 = vmatpush2.bf16.msra.mxu1 %v8536_v33  ;;  %v8527_v29 = vld [vmem:[#allocation9 + $0x108] ss:$16 sps:$4 sm:$0xff]  }
 0x2d3   :  { %6015 = vmatprep.subr.bf16.mxu1 %v8544_v36 }
 0x2d5   :  { %5973 = vmatpush2.bf16.msra.mxu0 %v8440_v39 }
 0x2d6   :  { %5974 = vmatprep.subr.bf16.mxu0 %v8445_v41  ;;  %6016 = vmatpush2.bf16.msra.mxu1 %v8542_v44  ;;  %v8541_v41 = vld [vmem:[#allocation9 + $0x4cc] ss:$16 sps:$4 sm:$0xff]  }
 0x2d7   :  { %6017 = vmatprep.subr.bf16.mxu1 %v8550_v53  ;;  %v8539_v53 = vld [vmem:[#allocation9 + $0x4c8] ss:$16 sps:$4 sm:$0xff]  }
 0x2d9   :  { %5975 = vmatpush2.bf16.msra.mxu0 %v8443_v26 }
 0x2da   :  { %6030 = vmatprep.subr.bf16.mxu0 %v8448_v35  ;;  %6018 = vmatpush2.bf16.msra.mxu1 %v8548_v32  ;;  %v3683_v35 = vld [vmem:[#allocation8 + $0x8] sm:$0x3] }
 0x2db   :  { %6073 = vmatprep.subr.bf16.mxu1 %v8556_v49 }
 0x2dc   :  { %5977 = vmatmul.mubr.bf16.vlgmr.msra.gmra.mxu0 %v9197_v51  ;;  %v3583_v18 = vpop.f32.mrf.mxu0 }
 0x2dd   :  { %6031 = vmatpush1.bf16.msra.mxu0 %v8446_v22  ;;  %6062 = vmatprep.mubr.bf16.mxu0 %v9129_v48  ;;  %v8473_v48 = vld [vmem:[#allocation9 + $0x28] ss:$16 sps:$4 sm:$0xff]   ;;  %v3626_v5 = vpop.f32.mrf.mxu1 }
 0x2de   :  { %6032 = vmatprep.subr.bf16.mxu0 %v8451_v52  ;;  %v3585_v24 = vpop.f32.mrf.mxu0  ;;  %v3627_v32 = vadd.f32 %v3626_v5, %v3583_v18  ;;  %v3725_v52 = vrot.slane %v3683_v35, %v9118_v10  ;;  %v8572_v18 = vld [vmem:[#allocation9 + $0x288] ss:$16 sps:$4 sm:$0xff]  }
 0x2df   :  { %v3628_v33 = vpop.f32.mrf.mxu1  ;;  %v8578_v5 = vld [vmem:[#allocation9 + $0x268] ss:$16 sps:$4 sm:$0xff]  }
 0x2e0   :  { %v3587_v36 = vpop.f32.mrf.mxu0  ;;  %v3629_v26 = vadd.f32 %v3628_v33, %v3585_v24  ;;  %v8586_v24 = vld [vmem:[#allocation9 + $0x24c] ss:$16 sps:$4 sm:$0xff]   ;;  %v8584_v33 = vld [vmem:[#allocation9 + $0x248] ss:$16 sps:$4 sm:$0xff]  }
 0x2e1   :  { %6033 = vmatpush1.bf16.msra.mxu0 %v8449_v60  ;;  %v3630_v39 = vpop.f32.mrf.mxu1 }
 0x2e2   :  { %6034 = vmatprep.subr.bf16.mxu0 %v8454_v54  ;;  %v3589_v40 = vpop.f32.mrf.mxu0  ;;  %v3631_v46 = vadd.f32 %v3630_v39, %v3587_v36  ;;  %v8592_v36 = vld [vmem:[#allocation9 + $0x22c] ss:$16 sps:$4 sm:$0xff]   ;;  %v8590_v39 = vld [vmem:[#allocation9 + $0x228] ss:$16 sps:$4 sm:$0xff]  }
 0x2e3   :  { %v3632_v42 = vpop.f32.mrf.mxu1 }
 0x2e4   :  { %v3633_v15 = vadd.f32 %v3632_v42, %v3589_v40  ;;  %v8598_v40 = vld [vmem:[#allocation9 + $0x20c] ss:$16 sps:$4 sm:$0xff]  }
 0x2e5   :  { %6035 = vmatpush1.bf16.msra.mxu0 %v8452_v61  ;;  %v8604_v42 = vld [vmem:[#allocation9 + $0x3ec] ss:$16 sps:$4 sm:$0xff]  }
 0x2e6   :  { %6036 = vmatprep.subr.bf16.mxu0 %v8457_v3  ;;  %v8553_v3 = vld [vmem:[#allocation9 + $0x48c] ss:$16 sps:$4 sm:$0xff]  }
 0x2e9   :  { %6037 = vmatpush1.bf16.msra.mxu0 %v8455_v56 }
 0x2ea   :  { %6038 = vmatprep.subr.bf16.mxu0 %v8463_v57 }
 0x2ed   :  { %6039 = vmatpush1.bf16.msra.mxu0 %v8461_v4 }
 0x2ee   :  { %6040 = vmatprep.subr.bf16.mxu0 %v8469_v58 }
 0x2f1   :  { %6041 = vmatpush1.bf16.msra.mxu0 %v8467_v59  ;;  %v8551_v59 = vld [vmem:[#allocation9 + $0x488] ss:$16 sps:$4 sm:$0xff]  }
 0x2f2   :  { %6042 = vmatprep.subr.bf16.mxu0 %v8475_v63 }
 0x2f5   :  { %6043 = vmatpush1.bf16.msra.mxu0 %v8473_v48  ;;  %v8559_v48 = vld [vmem:[#allocation9 + $0x46c] ss:$16 sps:$4 sm:$0xff]  }
 0x2f6   :  { %6044 = vmatprep.subr.bf16.mxu0 %v8481_v27 }
 0x2f9   :  { %6045 = vmatpush1.bf16.msra.mxu0 %v8479_v28  ;;  %v8554_v28 = vld [vmem:[#allocation9 + $0x2e8] ss:$16 sps:$4 sm:$0xff]  }
 0x2fa   :  { %6046 = vmatprep.subr.bf16.mxu0 %v8487_v47 }
 0x2fd   :  { %6047 = vmatpush2.bf16.msra.mxu0 %v8485_v7  ;;  %v8562_v7 = vld [vmem:[#allocation9 + $0x2cc] ss:$16 sps:$4 sm:$0xff]  }
 0x2fe   :  { %6048 = vmatprep.subr.bf16.mxu0 %v8493_v62  ;;  %v8557_v62 = vld [vmem:[#allocation9 + $0x468] ss:$16 sps:$4 sm:$0xff]  }
 0x301   :  { %6049 = vmatpush2.bf16.msra.mxu0 %v8491_v0  ;;  %v8565_v0 = vld [vmem:[#allocation9 + $0x44c] ss:$16 sps:$4 sm:$0xff]  }
 0x302   :  { %6050 = vmatprep.subr.bf16.mxu0 %v8499_v1  ;;  %v8560_v1 = vld [vmem:[#allocation9 + $0x2c8] ss:$16 sps:$4 sm:$0xff]  }
 0x305   :  { %6051 = vmatpush2.bf16.msra.mxu0 %v8497_v2  ;;  %v8568_v2 = vld [vmem:[#allocation9 + $0x2ac] ss:$16 sps:$4 sm:$0xff]  }
 0x306   :  { %6052 = vmatprep.subr.bf16.mxu0 %v8505_v8  ;;  %v8563_v8 = vld [vmem:[#allocation9 + $0x448] ss:$16 sps:$4 sm:$0xff]  }
 0x309   :  { %6053 = vmatpush2.bf16.msra.mxu0 %v8503_v9  ;;  %v8571_v9 = vld [vmem:[#allocation9 + $0x42c] ss:$16 sps:$4 sm:$0xff]  }
 0x30a   :  { %6054 = vmatprep.subr.bf16.mxu0 %v8511_v11  ;;  %v8566_v11 = vld [vmem:[#allocation9 + $0x2a8] ss:$16 sps:$4 sm:$0xff]  }
 0x30d   :  { %6055 = vmatpush2.bf16.msra.mxu0 %v8509_v12  ;;  %v8574_v12 = vld [vmem:[#allocation9 + $0x28c] ss:$16 sps:$4 sm:$0xff]  }
 0x30e   :  { %6056 = vmatprep.subr.bf16.mxu0 %v8517_v16  ;;  %v8569_v16 = vld [vmem:[#allocation9 + $0x428] ss:$16 sps:$4 sm:$0xff]  }
 0x311   :  { %6057 = vmatpush2.bf16.msra.mxu0 %v8515_v17  ;;  %v8577_v17 = vld [vmem:[#allocation9 + $0x40c] ss:$16 sps:$4 sm:$0xff]  }
 0x312   :  { %6058 = vmatprep.subr.bf16.mxu0 %v8523_v19  ;;  %v8580_v19 = vld [vmem:[#allocation9 + $0x26c] ss:$16 sps:$4 sm:$0xff]  }
 0x315   :  { %6059 = vmatpush2.bf16.msra.mxu0 %v8521_v20  ;;  %v8583_v20 = vld [vmem:[#allocation9 + $0x5ec] ss:$16 sps:$4 sm:$0xff]  }
 0x316   :  { %6060 = vmatprep.subr.bf16.mxu0 %v8529_v50  ;;  %v8581_v50 = vld [vmem:[#allocation9 + $0x5e8] ss:$16 sps:$4 sm:$0xff]  }
 0x319   :  { %6061 = vmatpush2.bf16.msra.mxu0 %v8527_v29  ;;  %v8589_v29 = vld [vmem:[#allocation9 + $0x5cc] ss:$16 sps:$4 sm:$0xff]  }
 0x31a   :  { %6116 = vmatprep.subr.bf16.mxu0 %v8535_v34  ;;  %v8587_v34 = vld [vmem:[#allocation9 + $0x5c8] ss:$16 sps:$4 sm:$0xff]  }
 0x31c   :  { %v3669_v44 = vpop.f32.mrf.mxu0  ;;  %6063 = vmatmul.mubr.bf16.vlgmr.msra.gmra.mxu0 %v9091_v55  ;;  %v8545_v55 = vld [vmem:[#allocation9 + $0x4a8] ss:$16 sps:$4 sm:$0xff]  }
 0x31d   :  { %6117 = vmatpush1.bf16.msra.mxu0 %v8533_v37  ;;  %6148 = vmatprep.mubr.bf16.mxu0 %v9158_v45  ;;  %v3670_v54 = vadd.f32 %v3669_v44, %v3627_v32  ;;  %v3721_v45 = vrot.slane %v3683_v35, %v9077_v21  ;;  %v8595_v37 = vld [vmem:[#allocation9 + $0x5ac] ss:$16 sps:$4 sm:$0xff]   ;;  %v8605_v35 = vld [vmem:[#allocation9 + $0x568] ss:$16 sps:$4 sm:$0xff]  }
 0x31e   :  { %v3671_v38 = vpop.f32.mrf.mxu0  ;;  %6118 = vmatprep.subr.bf16.mxu0 %v8541_v41  ;;  %v8593_v41 = vld [vmem:[#allocation9 + $0x5a8] ss:$16 sps:$4 sm:$0xff]   ;;  %v8601_v44 = vld [vmem:[#allocation9 + $0x58c] ss:$16 sps:$4 sm:$0xff]  }
 0x31f   :  { %v3672_v22 = vadd.f32 %v3671_v38, %v3629_v26  ;;  %v3744_v63 = vadd.f32 %v3721_v45, %v3670_v54  ;;  %v8599_v38 = vld [vmem:[#allocation9 + $0x588] ss:$16 sps:$4 sm:$0xff]   ;;  %v8613_v32 = vld [vmem:[#allocation9 + $0x54c] ss:$16 sps:$4 sm:$0xff]  }
 0x320   :  { %v3673_v49 = vpop.f32.mrf.mxu0  ;;  %v8602_v26 = vld [vmem:[#allocation9 + $0x3e8] ss:$16 sps:$4 sm:$0xff]  }
 0x321   :  { %v3674_v60 = vadd.f32 %v3673_v49, %v3631_v46  ;;  %6119 = vmatpush1.bf16.msra.mxu0 %v8539_v53  ;;  %v3745_v4 = vadd.f32 %v3725_v52, %v3672_v22  ;;  %v8596_v53 = vld [vmem:[#allocation9 + $0x208] ss:$16 sps:$4 sm:$0xff]   ;;  %v8610_v46 = vld [vmem:[#allocation9 + $0x3cc] ss:$16 sps:$4 sm:$0xff]  }
 0x322   :  { %v3675_v61 = vpop.f32.mrf.mxu0  ;;  %6120 = vmatprep.subr.bf16.mxu0 %v8547_v25  ;;  %v8607_v25 = vld [vmem:[#allocation9 + $0x56c] ss:$16 sps:$4 sm:$0xff]   ;;  %v8608_v49 = vld [vmem:[#allocation9 + $0x3c8] ss:$16 sps:$4 sm:$0xff]  }
 0x323   :  { %v3676_v56 = vadd.f32 %v3675_v61, %v3633_v15  ;;  %v3754_v57 = vadd.f32 %v3721_v45, %v3674_v60  ;;  %v8616_v15 = vld [vmem:[#allocation9 + $0x3ac] ss:$16 sps:$4 sm:$0xff]   ;;  %v8611_v22 = vld [vmem:[#allocation9 + $0x548] ss:$16 sps:$4 sm:$0xff]  }
 0x324   :  { %v8614_v60 = vld [vmem:[#allocation9 + $0x3a8] ss:$16 sps:$4 sm:$0xff]   ;;  %v8625_v45 = vld [vmem:[#allocation9 + $0x50c] ss:$16 sps:$4 sm:$0xff]  }
 0x325   :  { %v3755_v58 = vadd.f32 %v3725_v52, %v3676_v56  ;;  %6121 = vmatpush1.bf16.msra.mxu0 %v8545_v55  ;;  %v9207_v47 = vpack.c.bf16 %v3754_v57, %v3744_v63  ;;  %v8619_v52 = vld [vmem:[#allocation9 + $0x52c] ss:$16 sps:$4 sm:$0xff]   ;;  %v8617_v54 = vld [vmem:[#allocation9 + $0x528] ss:$16 sps:$4 sm:$0xff]  }
 0x326   :  { %6122 = vmatprep.subr.bf16.mxu0 %v8553_v3  ;;  %v8622_v55 = vld [vmem:[#allocation9 + $0x38c] ss:$16 sps:$4 sm:$0xff]   ;;  %v8620_v61 = vld [vmem:[#allocation9 + $0x388] ss:$16 sps:$4 sm:$0xff]  }
 0x327   :  { %v9205_v27 = vpack.c.bf16 %v3755_v58, %v3745_v4  ;;  %v8628_v3 = vld [vmem:[#allocation9 + $0x36c] ss:$16 sps:$4 sm:$0xff]   ;;  %v8623_v56 = vld [vmem:[#allocation9 + $0x508] ss:$16 sps:$4 sm:$0xff]  }
 0x328   :  { %v8631_v57 = vld [vmem:[#allocation9 + $0x8ec] ss:$16 sps:$4 sm:$0xff]   ;;  %v8626_v4 = vld [vmem:[#allocation9 + $0x368] ss:$16 sps:$4 sm:$0xff]  }
 0x329   :  { %6019 = vmatprep.mubr.bf16.mxu1 %v9205_v27  ;;  %6123 = vmatpush1.bf16.msra.mxu0 %v8551_v59  ;;  %v8634_v58 = vld [vmem:[#allocation9 + $0x34c] ss:$16 sps:$4 sm:$0xff]   ;;  %v8629_v59 = vld [vmem:[#allocation9 + $0x8e8] ss:$16 sps:$4 sm:$0xff]  }
 0x32a   :  { %6020 = vmatmul.mubr.bf16.vlgmr.msra.gmra.mxu1 %v9207_v47  ;;  %6124 = vmatprep.subr.bf16.mxu0 %v8559_v48  ;;  %v8637_v63 = vld [vmem:[#allocation9 + $0x8cc] ss:$16 sps:$4 sm:$0xff]   ;;  %v8632_v48 = vld [vmem:[#allocation9 + $0x348] ss:$16 sps:$4 sm:$0xff]  }
 0x32b   :  { %6074 = vmatpush1.bf16.msra.mxu1 %v8554_v28  ;;  %6105 = vmatprep.mubr.bf16.mxu1 %v9148_v13  ;;  %v8575_v13 = vld [vmem:[#allocation9 + $0x408] ss:$16 sps:$4 sm:$0xff]   ;;  %v8640_v28 = vld [vmem:[#allocation9 + $0x32c] ss:$16 sps:$4 sm:$0xff]  }
 0x32c   :  { %6075 = vmatprep.subr.bf16.mxu1 %v8562_v7  ;;  %v8635_v7 = vld [vmem:[#allocation9 + $0x8c8] ss:$16 sps:$4 sm:$0xff]  }
 0x32d   :  { %6125 = vmatpush1.bf16.msra.mxu0 %v8557_v62  ;;  %v8643_v62 = vld [vmem:[#allocation9 + $0x8ac] ss:$16 sps:$4 sm:$0xff]  }
 0x32e   :  { %6126 = vmatprep.subr.bf16.mxu0 %v8565_v0  ;;  %v8638_v0 = vld [vmem:[#allocation9 + $0x328] ss:$16 sps:$4 sm:$0xff]  }
 0x32f   :  { %6076 = vmatpush1.bf16.msra.mxu1 %v8560_v1  ;;  %v8646_v1 = vld [vmem:[#allocation9 + $0x30c] ss:$16 sps:$4 sm:$0xff]  }
 0x330   :  { %6077 = vmatprep.subr.bf16.mxu1 %v8568_v2  ;;  %v8641_v2 = vld [vmem:[#allocation9 + $0x8a8] ss:$16 sps:$4 sm:$0xff]  }
 0x331   :  { %6127 = vmatpush1.bf16.msra.mxu0 %v8563_v8  ;;  %v8649_v8 = vld [vmem:[#allocation9 + $0x88c] ss:$16 sps:$4 sm:$0xff]  }
 0x332   :  { %6128 = vmatprep.subr.bf16.mxu0 %v8571_v9  ;;  %v8644_v9 = vld [vmem:[#allocation9 + $0x308] ss:$16 sps:$4 sm:$0xff]  }
 0x333   :  { %6078 = vmatpush1.bf16.msra.mxu1 %v8566_v11  ;;  %v8647_v11 = vld [vmem:[#allocation9 + $0x888] ss:$16 sps:$4 sm:$0xff]  }
 0x334   :  { %6079 = vmatprep.subr.bf16.mxu1 %v8574_v12  ;;  %v8655_v12 = vld [vmem:[#allocation9 + $0x86c] ss:$16 sps:$4 sm:$0xff]  }
 0x335   :  { %6129 = vmatpush1.bf16.msra.mxu0 %v8569_v16  ;;  %v8658_v16 = vld [vmem:[#allocation9 + $0x6cc] ss:$16 sps:$4 sm:$0xff]  }
 0x336   :  { %6130 = vmatprep.subr.bf16.mxu0 %v8577_v17  ;;  %v8653_v17 = vld [vmem:[#allocation9 + $0x868] ss:$16 sps:$4 sm:$0xff]  }
 0x337   :  { %6080 = vmatpush1.bf16.msra.mxu1 %v8572_v18  ;;  %v8661_v18 = vld [vmem:[#allocation9 + $0x84c] ss:$16 sps:$4 sm:$0xff]  }
 0x338   :  { %6081 = vmatprep.subr.bf16.mxu1 %v8580_v19  ;;  %v8656_v19 = vld [vmem:[#allocation9 + $0x6c8] ss:$16 sps:$4 sm:$0xff]  }
 0x339   :  { %6131 = vmatpush1.bf16.msra.mxu0 %v8575_v13  ;;  %v8664_v13 = vld [vmem:[#allocation9 + $0x6ac] ss:$16 sps:$4 sm:$0xff]  }
 0x33a   :  { %6132 = vmatprep.subr.bf16.mxu0 %v8583_v20  ;;  %v8659_v20 = vld [vmem:[#allocation9 + $0x848] ss:$16 sps:$4 sm:$0xff]  }
 0x33b   :  { %6082 = vmatpush1.bf16.msra.mxu1 %v8578_v5  ;;  %v8667_v5 = vld [vmem:[#allocation9 + $0x82c] ss:$16 sps:$4 sm:$0xff]  }
 0x33c   :  { %6083 = vmatprep.subr.bf16.mxu1 %v8586_v24  ;;  %v8662_v24 = vld [vmem:[#allocation9 + $0x6a8] ss:$16 sps:$4 sm:$0xff]  }
 0x33d   :  { %6133 = vmatpush2.bf16.msra.mxu0 %v8581_v50  ;;  %v8670_v50 = vld [vmem:[#allocation9 + $0x68c] ss:$16 sps:$4 sm:$0xff]  }
 0x33e   :  { %6134 = vmatprep.subr.bf16.mxu0 %v8589_v29  ;;  %v8665_v29 = vld [vmem:[#allocation9 + $0x828] ss:$16 sps:$4 sm:$0xff]  }
 0x33f   :  { %6084 = vmatpush1.bf16.msra.mxu1 %v8584_v33  ;;  %v8668_v33 = vld [vmem:[#allocation9 + $0x688] ss:$16 sps:$4 sm:$0xff]  }
 0x340   :  { %6085 = vmatprep.subr.bf16.mxu1 %v8592_v36  ;;  %v8676_v36 = vld [vmem:[#allocation9 + $0x66c] ss:$16 sps:$4 sm:$0xff]  }
 0x341   :  { %6135 = vmatpush2.bf16.msra.mxu0 %v8587_v34  ;;  %v8679_v34 = vld [vmem:[#allocation9 + $0x9ec] ss:$16 sps:$4 sm:$0xff]  }
 0x342   :  { %6136 = vmatprep.subr.bf16.mxu0 %v8595_v37  ;;  %v8674_v37 = vld [vmem:[#allocation9 + $0x668] ss:$16 sps:$4 sm:$0xff]  }
 0x343   :  { %6086 = vmatpush1.bf16.msra.mxu1 %v8590_v39  ;;  %v8682_v39 = vld [vmem:[#allocation9 + $0x64c] ss:$16 sps:$4 sm:$0xff]  }
 0x344   :  { %6087 = vmatprep.subr.bf16.mxu1 %v8598_v40  ;;  %v8677_v40 = vld [vmem:[#allocation9 + $0x9e8] ss:$16 sps:$4 sm:$0xff]  }
 0x345   :  { %6137 = vmatpush2.bf16.msra.mxu0 %v8593_v41  ;;  %v8685_v41 = vld [vmem:[#allocation9 + $0x9cc] ss:$16 sps:$4 sm:$0xff]  }
 0x346   :  { %6138 = vmatprep.subr.bf16.mxu0 %v8601_v44  ;;  %v8680_v44 = vld [vmem:[#allocation9 + $0x648] ss:$16 sps:$4 sm:$0xff]  }
 0x347   :  { %6088 = vmatpush1.bf16.msra.mxu1 %v8596_v53  ;;  %v8688_v53 = vld [vmem:[#allocation9 + $0x62c] ss:$16 sps:$4 sm:$0xff]  }
 0x348   :  { %6089 = vmatprep.subr.bf16.mxu1 %v8604_v42  ;;  %v8683_v42 = vld [vmem:[#allocation9 + $0x9c8] ss:$16 sps:$4 sm:$0xff]  }
 0x349   :  { %6139 = vmatpush2.bf16.msra.mxu0 %v8599_v38  ;;  %v8691_v38 = vld [vmem:[#allocation9 + $0x9ac] ss:$16 sps:$4 sm:$0xff]  }
 0x34a   :  { %6140 = vmatprep.subr.bf16.mxu0 %v8607_v25  ;;  %v8686_v25 = vld [vmem:[#allocation9 + $0x628] ss:$16 sps:$4 sm:$0xff]  }
 0x34b   :  { %6090 = vmatpush2.bf16.msra.mxu1 %v8602_v26  ;;  %v8694_v26 = vld [vmem:[#allocation9 + $0x60c] ss:$16 sps:$4 sm:$0xff]  }
 0x34c   :  { %6091 = vmatprep.subr.bf16.mxu1 %v8610_v46  ;;  %v8689_v46 = vld [vmem:[#allocation9 + $0x9a8] ss:$16 sps:$4 sm:$0xff]  }
 0x34d   :  { %6141 = vmatpush2.bf16.msra.mxu0 %v8605_v35  ;;  %v8697_v35 = vld [vmem:[#allocation9 + $0x98c] ss:$16 sps:$4 sm:$0xff]  }
 0x34e   :  { %6142 = vmatprep.subr.bf16.mxu0 %v8613_v32  ;;  %v8692_v32 = vld [vmem:[#allocation9 + $0x608] ss:$16 sps:$4 sm:$0xff]  }
 0x34f   :  { %6092 = vmatpush2.bf16.msra.mxu1 %v8608_v49  ;;  %v8700_v49 = vld [vmem:[#allocation9 + $0x7ec] ss:$16 sps:$4 sm:$0xff]  }
 0x350   :  { %6093 = vmatprep.subr.bf16.mxu1 %v8616_v15  ;;  %v8695_v15 = vld [vmem:[#allocation9 + $0x988] ss:$16 sps:$4 sm:$0xff]  }
 0x351   :  { %6143 = vmatpush2.bf16.msra.mxu0 %v8611_v22  ;;  %v8703_v22 = vld [vmem:[#allocation9 + $0x96c] ss:$16 sps:$4 sm:$0xff]  }
 0x352   :  { %6144 = vmatprep.subr.bf16.mxu0 %v8619_v52  ;;  %v8698_v52 = vld [vmem:[#allocation9 + $0x7e8] ss:$16 sps:$4 sm:$0xff]  }
 0x353   :  { %6094 = vmatpush2.bf16.msra.mxu1 %v8614_v60  ;;  %v8706_v60 = vld [vmem:[#allocation9 + $0x7cc] ss:$16 sps:$4 sm:$0xff]  }
 0x354   :  { %6095 = vmatprep.subr.bf16.mxu1 %v8622_v55  ;;  %v8701_v55 = vld [vmem:[#allocation9 + $0x968] ss:$16 sps:$4 sm:$0xff]  }
 0x355   :  { %6145 = vmatpush2.bf16.msra.mxu0 %v8617_v54  ;;  %v8709_v54 = vld [vmem:[#allocation9 + $0x94c] ss:$16 sps:$4 sm:$0xff]  }
 0x356   :  { %6146 = vmatprep.subr.bf16.mxu0 %v8625_v45  ;;  %v8704_v45 = vld [vmem:[#allocation9 + $0x7c8] ss:$16 sps:$4 sm:$0xff]  }
 0x357   :  { %6096 = vmatpush2.bf16.msra.mxu1 %v8620_v61  ;;  %v8712_v61 = vld [vmem:[#allocation9 + $0x7ac] ss:$16 sps:$4 sm:$0xff]  }
 0x358   :  { %6097 = vmatprep.subr.bf16.mxu1 %v8628_v3  ;;  %v8707_v3 = vld [vmem:[#allocation9 + $0x948] ss:$16 sps:$4 sm:$0xff]  }
 0x359   :  { %6147 = vmatpush2.bf16.msra.mxu0 %v8623_v56  ;;  %v8715_v56 = vld [vmem:[#allocation9 + $0x92c] ss:$16 sps:$4 sm:$0xff]  }
 0x35a   :  { %6202 = vmatprep.subr.bf16.mxu0 %v8631_v57  ;;  %v8710_v57 = vld [vmem:[#allocation9 + $0x7a8] ss:$16 sps:$4 sm:$0xff]  }
 0x35b   :  { %6098 = vmatpush2.bf16.msra.mxu1 %v8626_v4  ;;  %v8718_v4 = vld [vmem:[#allocation9 + $0x78c] ss:$16 sps:$4 sm:$0xff]  }
 0x35c   :  { %6149 = vmatmul.mubr.bf16.vlgmr.msra.gmra.mxu0 %v9173_v14  ;;  %6099 = vmatprep.subr.bf16.mxu1 %v8634_v58  ;;  %v8652_v14 = vld [vmem:[#allocation9 + $0x6ec] ss:$16 sps:$4 sm:$0xff]   ;;  %v8713_v58 = vld [vmem:[#allocation9 + $0x928] ss:$16 sps:$4 sm:$0xff]  }
 0x35d   :  { %6203 = vmatpush1.bf16.msra.mxu0 %v8629_v59  ;;  %6234 = vmatprep.mubr.bf16.mxu0 %v9205_v27  ;;  %v8650_v27 = vld [vmem:[#allocation9 + $0x6e8] ss:$16 sps:$4 sm:$0xff]   ;;  %v8721_v59 = vld [vmem:[#allocation9 + $0x90c] ss:$16 sps:$4 sm:$0xff]  }
 0x35e   :  { %6204 = vmatprep.subr.bf16.mxu0 %v8637_v63  ;;  %v8716_v63 = vld [vmem:[#allocation9 + $0x788] ss:$16 sps:$4 sm:$0xff]  }
 0x35f   :  { %6100 = vmatpush2.bf16.msra.mxu1 %v8632_v48  ;;  %v8724_v48 = vld [vmem:[#allocation9 + $0x76c] ss:$16 sps:$4 sm:$0xff]  }
 0x360   :  { %6101 = vmatprep.subr.bf16.mxu1 %v8640_v28  ;;  %v8719_v28 = vld [vmem:[#allocation9 + $0x908] ss:$16 sps:$4 sm:$0xff]  }
 0x361   :  { %6205 = vmatpush1.bf16.msra.mxu0 %v8635_v7  ;;  %v8722_v7 = vld [vmem:[#allocation9 + $0x768] ss:$16 sps:$4 sm:$0xff]  }
 0x362   :  { %6206 = vmatprep.subr.bf16.mxu0 %v8643_v62  ;;  %v8727_v62 = vld [vmem:[#allocation9 + $0x74c] ss:$16 sps:$4 sm:$0xff]  }
 0x363   :  { %6102 = vmatpush2.bf16.msra.mxu1 %v8638_v0  ;;  %v8725_v0 = vld [vmem:[#allocation9 + $0x748] ss:$16 sps:$4 sm:$0xff]  }
 0x364   :  { %6103 = vmatprep.subr.bf16.mxu1 %v8646_v1  ;;  %v8730_v1 = vld [vmem:[#allocation9 + $0x72c] ss:$16 sps:$4 sm:$0xff]  }
 0x365   :  { %6207 = vmatpush1.bf16.msra.mxu0 %v8641_v2  ;;  %v8728_v2 = vld [vmem:[#allocation9 + $0x728] ss:$16 sps:$4 sm:$0xff]  }
 0x366   :  { %6208 = vmatprep.subr.bf16.mxu0 %v8649_v8  ;;  %v8733_v8 = vld [vmem:[#allocation9 + $0x70c] ss:$16 sps:$4 sm:$0xff]  }
 0x367   :  { %6104 = vmatpush2.bf16.msra.mxu1 %v8644_v9  ;;  %v8731_v9 = vld [vmem:[#allocation9 + $0x708] ss:$16 sps:$4 sm:$0xff]  }
 0x368   :  { %6159 = vmatprep.subr.bf16.mxu1 %v8652_v14  ;;  %v8734_v14 = vld [vmem:[#allocation12 + $0x78] sm:$0xff]  }
 0x369   :  { %6209 = vmatpush1.bf16.msra.mxu0 %v8647_v11  ;;  %v8735_v11 = vld [vmem:[#allocation12 + $0x38] sm:$0xff]  }
 0x36a   :  { %6106 = vmatmul.mubr.bf16.vlgmr.msra.gmra.mxu1 %v9113_v30  ;;  %6210 = vmatprep.subr.bf16.mxu0 %v8655_v12  ;;  %v8673_v30 = vld [vmem:[#allocation9 + $0x80c] ss:$16 sps:$4 sm:$0xff]   ;;  %v8736_v12 = vld [vmem:[#allocation12 + $0x70] sm:$0xff]  }
 0x36b   :  { %6160 = vmatpush1.bf16.msra.mxu1 %v8650_v27  ;;  %6191 = vmatprep.mubr.bf16.mxu1 %v9187_v43  ;;  %v8671_v43 = vld [vmem:[#allocation9 + $0x808] ss:$16 sps:$4 sm:$0xff]  }
 0x36c   :  { %6161 = vmatprep.subr.bf16.mxu1 %v8658_v16  ;;  %v8737_v27 = vld [vmem:[#allocation12 + $0x30] sm:$0xff]   ;;  %v8739_v16 = vld [vmem:[#allocation12 + $0x28] sm:$0xff]  }
 0x36d   :  { %6211 = vmatpush1.bf16.msra.mxu0 %v8653_v17  ;;  %v8740_v17 = vld [vmem:[#allocation12 + $0x60] sm:$0xff]  }
 0x36e   :  { %6212 = vmatprep.subr.bf16.mxu0 %v8661_v18  ;;  %v8741_v18 = vld [vmem:[#allocation12 + $0x20] sm:$0xff]  }
 0x36f   :  { %6162 = vmatpush1.bf16.msra.mxu1 %v8656_v19  ;;  %v8742_v19 = vld [vmem:[#allocation12 + $0x58] sm:$0xff]  }
 0x370   :  { %6163 = vmatprep.subr.bf16.mxu1 %v8664_v13  ;;  %v8743_v13 = vld [vmem:[#allocation12 + $0x18] sm:$0xff]  }
 0x371   :  { %6213 = vmatpush1.bf16.msra.mxu0 %v8659_v20  ;;  %v8744_v20 = vld [vmem:[#allocation12 + $0x50] sm:$0xff]  }
 0x372   :  { %6214 = vmatprep.subr.bf16.mxu0 %v8667_v5  ;;  %v8745_v5 = vld [vmem:[#allocation12 + $0x10] sm:$0xff]  }
 0x373   :  { %6164 = vmatpush1.bf16.msra.mxu1 %v8662_v24  ;;  %v8747_v24 = vld [vmem:[#allocation12 + $0x8] sm:$0xff]  }
 0x374   :  { %6165 = vmatprep.subr.bf16.mxu1 %v8670_v50  ;;  %v8748_v50 = vld [vmem:[#allocation12 + $0x40] sm:$0xff]  }
 0x375   :  { %6215 = vmatpush1.bf16.msra.mxu0 %v8665_v29  ;;  %v8749_v29 = vld [vmem:[#allocation12] sm:$0xff]  }
 0x376   :  { %6216 = vmatprep.subr.bf16.mxu0 %v8673_v30  ;;  %v8750_v30 = vld [vmem:[#allocation12 + $0xf8] sm:$0xff]  }
 0x377   :  { %6166 = vmatpush1.bf16.msra.mxu1 %v8668_v33  ;;  %v5849_v33 = vpop.f32.mrf.mxu1 }
 0x378   :  { %6167 = vmatprep.subr.bf16.mxu1 %v8676_v36 }
 0x379   :  { %6217 = vmatpush1.bf16.msra.mxu0 %v8671_v43  ;;  %v5851_v36 = vpop.f32.mrf.mxu1  ;;  %v5892_v43 = vpop.f32.mrf.mxu0 }
 0x37a   :  { %6218 = vmatprep.subr.bf16.mxu0 %v8679_v34 }
 0x37b   :  { %6168 = vmatpush1.bf16.msra.mxu1 %v8674_v37  ;;  %v5853_v34 = vpop.f32.mrf.mxu1  ;;  %v5894_v37 = vpop.f32.mrf.mxu0 }
 0x37c   :  { %6169 = vmatprep.subr.bf16.mxu1 %v8682_v39 }
 0x37d   :  { %6219 = vmatpush2.bf16.msra.mxu0 %v8677_v40  ;;  %v5855_v39 = vpop.f32.mrf.mxu1  ;;  %v5896_v40 = vpop.f32.mrf.mxu0 }
 0x37e   :  { %6220 = vmatprep.subr.bf16.mxu0 %v8685_v41 }
 0x37f   :  { %6170 = vmatpush1.bf16.msra.mxu1 %v8680_v44  ;;  %v5935_v41 = vpop.f32.mrf.mxu1  ;;  %v5898_v44 = vpop.f32.mrf.mxu0 }
 0x380   :  { %6171 = vmatprep.subr.bf16.mxu1 %v8688_v53  ;;  %v9218_v53 = vld [vmem:[#allocation11] sm:$0xf] }
 0x381   :  { %6221 = vmatpush2.bf16.msra.mxu0 %v8683_v42  ;;  %v5937_v42 = vpop.f32.mrf.mxu1 }
 0x382   :  { %6222 = vmatprep.subr.bf16.mxu0 %v8691_v38 }
 0x383   :  { %6172 = vmatpush1.bf16.msra.mxu1 %v8686_v25  ;;  %v4202_v25 = vrot.slane %v9218_v53, %v9118_v10 }
 0x384   :  { %6173 = vmatprep.subr.bf16.mxu1 %v8694_v26  ;;  %v4198_v26 = vrot.slane %v9218_v53, %v9077_v21 }
 0x385   :  { %6223 = vmatpush2.bf16.msra.mxu0 %v8689_v46  ;;  %v5939_v46 = vpop.f32.mrf.mxu1 }
 0x386   :  { %6224 = vmatprep.subr.bf16.mxu0 %v8697_v35 }
 0x387   :  { %6174 = vmatpush1.bf16.msra.mxu1 %v8692_v32  ;;  %v5852_v32 = vadd.f32 %v5851_v36, %v4202_v25  ;;  %v8764_v36 = vld [vmem:[#allocation12 + $0xc0] sm:$0xff]  }
 0x388   :  { %6175 = vmatprep.subr.bf16.mxu1 %v8700_v49  ;;  %v5854_v49 = vadd.f32 %v5853_v34, %v4198_v26 }
 0x389   :  { %6225 = vmatpush2.bf16.msra.mxu0 %v8695_v15  ;;  %v5850_v15 = vadd.f32 %v5849_v33, %v4198_v26  ;;  %v8763_v33 = vld [vmem:[#allocation12 + $0x88] sm:$0xff]   ;;  %v4210_v26 = vrot.slane %v9218_v53, %v3700_v23 }
 0x38a   :  { %6226 = vmatprep.subr.bf16.mxu0 %v8703_v22  ;;  %v5856_v22 = vadd.f32 %v5855_v39, %v4202_v25 }
 0x38b   :  { %6176 = vmatpush2.bf16.msra.mxu1 %v8698_v52  ;;  %v5895_v52 = vadd.f32 %v5894_v37, %v5852_v32 }
 0x38c   :  { %6177 = vmatprep.subr.bf16.mxu1 %v8706_v60  ;;  %v5897_v60 = vadd.f32 %v5896_v40, %v5854_v49 }
 0x38d   :  { %6227 = vmatpush2.bf16.msra.mxu0 %v8701_v55  ;;  %v5893_v55 = vadd.f32 %v5892_v43, %v5850_v15  ;;  %v8765_v43 = vld [vmem:[#allocation12 + $0x80] sm:$0xff]  }
 0x38e   :  { %6228 = vmatprep.subr.bf16.mxu0 %v8709_v54  ;;  %v5941_v54 = vpop.f32.mrf.mxu1 }
 0x38f   :  { %6178 = vmatpush2.bf16.msra.mxu1 %v8704_v45 }
 0x390   :  { %6179 = vmatprep.subr.bf16.mxu1 %v8712_v61  ;;  %v5899_v61 = vadd.f32 %v5898_v44, %v5856_v22 }
 0x391   :  { %6229 = vmatpush2.bf16.msra.mxu0 %v8707_v3 }
 0x392   :  { %6230 = vmatprep.subr.bf16.mxu0 %v8715_v56  ;;  %v5938_v56 = vadd.f32 %v5937_v42, %v5895_v52 }
 0x393   :  { %6180 = vmatpush2.bf16.msra.mxu1 %v8710_v57  ;;  %v5940_v57 = vadd.f32 %v5939_v46, %v5897_v60  ;;  %v4206_v46 = vrot.slane %v9218_v53, %v3696_v6 }
 0x394   :  { %6181 = vmatprep.subr.bf16.mxu1 %v8718_v4  ;;  %v5936_v4 = vadd.f32 %v5935_v41, %v5893_v55 }
 0x395   :  { %6231 = vmatpush2.bf16.msra.mxu0 %v8713_v58 }
 0x396   :  { %6232 = vmatprep.subr.bf16.mxu0 %v8721_v59  ;;  %v5942_v59 = vadd.f32 %v5941_v54, %v5899_v61 }
 0x397   :  { %6182 = vmatpush2.bf16.msra.mxu1 %v8716_v63 }
 0x398   :  { %6183 = vmatprep.subr.bf16.mxu1 %v8724_v48 }
 0x399   :  { %6233 = vmatpush2.bf16.msra.mxu0 %v8719_v28 }
 0x39b   :  { %6184 = vmatpush2.bf16.msra.mxu1 %v8722_v7 }
 0x39c   :  { %6235 = vmatmul.mubr.bf16.vlgmr.msra.gmra.mxu0 %v9207_v47  ;;  %6185 = vmatprep.subr.bf16.mxu1 %v8727_v62  ;;  %v8738_v47 = vld [vmem:[#allocation12 + $0x68] sm:$0xff]   ;;  %v5978_v38 = vpop.f32.mrf.mxu0 }
 0x39d   :  { %v5979_v48 = vadd.f32 %v5978_v38, %v5936_v4 }
 0x39e   :  { %v5980_v35 = vpop.f32.mrf.mxu0 }
 0x39f   :  { %6186 = vmatpush2.bf16.msra.mxu1 %v8725_v0  ;;  %v5981_v21 = vadd.f32 %v5980_v35, %v5938_v56 }
 0x3a0   :  { %6187 = vmatprep.subr.bf16.mxu1 %v8730_v1  ;;  %v5982_v45 = vpop.f32.mrf.mxu0 }
 0x3a1   :  { %v5983_v63 = vadd.f32 %v5982_v45, %v5940_v57 }
 0x3a2   :  { %v5984_v10 = vpop.f32.mrf.mxu0 }
 0x3a3   :  { %6188 = vmatpush2.bf16.msra.mxu1 %v8728_v2  ;;  %v5985_v7 = vadd.f32 %v5984_v10, %v5942_v59 }
 0x3a4   :  { %6189 = vmatprep.subr.bf16.mxu1 %v8733_v8 }
 0x3a7   :  { %6190 = vmatpush2.bf16.msra.mxu1 %v8731_v9 }
 0x3a8   :  { %7463 = vmatprep.subr.bf16.mxu1 %v8734_v14 }
 0x3aa   :  { %6192 = vmatmul.mubr.bf16.vlgmr.msra.gmra.mxu1 %v9197_v51  ;;  %v8746_v51 = vld [vmem:[#allocation12 + $0x48] sm:$0xff]  }
 0x3ab   :  { %7464 = vmatpush3.bf16.msra.mxu1 %v8735_v11 }
 0x3ac   :  { %7465 = vmatprep.subr.bf16.mxu1 %v8736_v12 }
 0x3af   :  { %7466 = vmatpush3.bf16.msra.mxu1 %v8737_v27 }
 0x3b0   :  { %7467 = vmatprep.subr.bf16.mxu1 %v8738_v47  ;;  %v8751_v47 = vld [vmem:[#allocation12 + $0xb8] sm:$0xff]  }
 0x3b3   :  { %7468 = vmatpush3.bf16.msra.mxu1 %v8739_v16 }
 0x3b4   :  { %7469 = vmatprep.subr.bf16.mxu1 %v8740_v17  ;;  %v8752_v17 = vld [vmem:[#allocation12 + $0xf0] sm:$0xff]  }
 0x3b7   :  { %7470 = vmatpush3.bf16.msra.mxu1 %v8741_v18  ;;  %v8753_v18 = vld [vmem:[#allocation12 + $0xb0] sm:$0xff]  }
 0x3b8   :  { %7471 = vmatprep.subr.bf16.mxu1 %v8742_v19  ;;  %v8754_v19 = vld [vmem:[#allocation12 + $0xe8] sm:$0xff]  }
 0x3bb   :  { %7472 = vmatpush3.bf16.msra.mxu1 %v8743_v13  ;;  %v8755_v13 = vld [vmem:[#allocation12 + $0xa8] sm:$0xff]  }
 0x3bc   :  { %7473 = vmatprep.subr.bf16.mxu1 %v8744_v20  ;;  %v8756_v20 = vld [vmem:[#allocation12 + $0xe0] sm:$0xff]  }
 0x3bf   :  { %7474 = vmatpush3.bf16.msra.mxu1 %v8745_v5  ;;  %v8757_v5 = vld [vmem:[#allocation12 + $0xa0] sm:$0xff]  }
 0x3c0   :  { %7475 = vmatprep.subr.bf16.mxu1 %v8746_v51  ;;  %v8758_v51 = vld [vmem:[#allocation12 + $0xd8] sm:$0xff]  }
 0x3c3   :  { %7476 = vmatpush3.bf16.msra.mxu1 %v8747_v24  ;;  %v8759_v24 = vld [vmem:[#allocation12 + $0x98] sm:$0xff]  }
 0x3c4   :  { %7477 = vmatprep.subr.bf16.mxu1 %v8748_v50  ;;  %v8760_v50 = vld [vmem:[#allocation12 + $0xd0] sm:$0xff]  }
 0x3c7   :  { %7478 = vmatpush3.bf16.msra.mxu1 %v8749_v29  ;;  %v8761_v29 = vld [vmem:[#allocation12 + $0x90] sm:$0xff]  }
 0x3c8   :  { %7485 = vmatprep.subr.bf16.mxu1 %v8750_v30  ;;  %v8762_v30 = vld [vmem:[#allocation12 + $0xc8] sm:$0xff]  }
 0x3dc   :  { %v6064_v34 = vpop.f32.mrf.mxu0 }
 0x3dd   :  { %v6065_v15 = vadd.f32 %v6064_v34, %v4206_v46 }
 0x3de   :  { %v6066_v37 = vpop.f32.mrf.mxu0 }
 0x3df   :  { %v6067_v49 = vadd.f32 %v6066_v37, %v4210_v26 }
 0x3e0   :  { %v6068_v39 = vpop.f32.mrf.mxu0 }
 0x3e1   :  { %v6069_v52 = vadd.f32 %v6068_v39, %v4206_v46 }
 0x3e2   :  { %v6070_v40 = vpop.f32.mrf.mxu0 }
 0x3e3   :  { %v6071_v45 = vadd.f32 %v6070_v40, %v4210_v26 }
 0x3ea   :  { %v6021_v3 = vpop.f32.mrf.mxu1 }
 0x3eb   :  { %v6022_v1 = vadd.f32 %v6021_v3, %v5979_v48 }
 0x3ec   :  { %v6023_v58 = vpop.f32.mrf.mxu1 }
 0x3ed   :  { %v6024_v62 = vadd.f32 %v6023_v58, %v5981_v21  ;;  %v6245_v12 = vmax.f32 %v6022_v1, 0.0 }
 0x3ee   :  { %v6025_v28 = vpop.f32.mrf.mxu1 }
 0x3ef   :  { %v6026_v0 = vadd.f32 %v6025_v28, %v5983_v63  ;;  %v6246_v14 = vmax.f32 %v6024_v62, 0.0 }
 0x3f0   :  { %v6027_v2 = vpop.f32.mrf.mxu1 }
 0x3f1   :  { %v6028_v8 = vadd.f32 %v6027_v2, %v5985_v7  ;;  %v6249_v9 = vmax.f32 %v6026_v0, 0.0 }
 0x3f3   :  { %v6250_v11 = vmax.f32 %v6028_v8, 0.0  ;;  %v6253_v16 = vpack.c.bf16 %v6249_v9, %v6245_v12 }
 0x3f5   :  { %v6254_v27 = vpack.c.bf16 %v6250_v11, %v6246_v14 }
 0x3f7   :  { %6552 = vmatprep.mubr.bf16.mxu1 %v6254_v27 }
 0x3f8   :  { %6553 = vmatmul.mubr.bf16.vlgmr.msra.gmra.mxu1 %v6253_v16 }
 0x3f9   :  { %7486 = vmatpush3.bf16.msra.mxu1 %v8751_v47 }
 0x3fa   :  { %7487 = vmatprep.subr.bf16.mxu1 %v8752_v17 }
 0x3fd   :  { %7488 = vmatpush3.bf16.msra.mxu1 %v8753_v18 }
 0x3fe   :  { %7489 = vmatprep.subr.bf16.mxu1 %v8754_v19 }
 0x401   :  { %7490 = vmatpush3.bf16.msra.mxu1 %v8755_v13  ;;  %v7430_v13 = vld [vmem:[#allocation14] ss:$0 sm:$0xff] }
 0x402   :  { %7491 = vmatprep.subr.bf16.mxu1 %v8756_v20 }
 0x405   :  { %7492 = vmatpush3.bf16.msra.mxu1 %v8757_v5 }
 0x406   :  { %7493 = vmatprep.subr.bf16.mxu1 %v8758_v51 }
 0x409   :  { %7494 = vmatpush3.bf16.msra.mxu1 %v8759_v24 }
 0x40a   :  { %7495 = vmatprep.subr.bf16.mxu1 %v8760_v50 }
 0x40d   :  { %7496 = vmatpush3.bf16.msra.mxu1 %v8761_v29 }
 0x40e   :  { %7497 = vmatprep.subr.bf16.mxu1 %v8762_v30 }
 0x411   :  { %7498 = vmatpush3.bf16.msra.mxu1 %v8763_v33 }
 0x412   :  { %7499 = vmatprep.subr.bf16.mxu1 %v8764_v36 }
 0x415   :  { %7500 = vmatpush3.bf16.msra.mxu1 %v8765_v43 }
 0x41c   :  { %v6150_v41 = vpop.f32.mrf.mxu0 }
 0x41e   :  { %v6152_v44 = vpop.f32.mrf.mxu0 }
 0x420   :  { %v6154_v38 = vpop.f32.mrf.mxu0 }
 0x422   :  { %v6156_v35 = vpop.f32.mrf.mxu0 }
 0x42a   :  { %v6107_v42 = vpop.f32.mrf.mxu1 }
 0x42b   :  { %v6108_v55 = vadd.f32 %v6107_v42, %v6065_v15 }
 0x42c   :  { %v6109_v25 = vpop.f32.mrf.mxu1 }
 0x42d   :  { %v6110_v60 = vadd.f32 %v6109_v25, %v6067_v49  ;;  %v6151_v23 = vadd.f32 %v6150_v41, %v6108_v55 }
 0x42e   :  { %v6111_v32 = vpop.f32.mrf.mxu1 }
 0x42f   :  { %v6112_v61 = vadd.f32 %v6111_v32, %v6069_v52  ;;  %v6153_v4 = vadd.f32 %v6152_v44, %v6110_v60 }
 0x430   :  { %v6113_v54 = vpop.f32.mrf.mxu1 }
 0x431   :  { %v6114_v57 = vadd.f32 %v6113_v54, %v6071_v45  ;;  %v6155_v58 = vadd.f32 %v6154_v38, %v6112_v61 }
 0x433   :  { %v6157_v63 = vadd.f32 %v6156_v35, %v6114_v57 }
 0x45c   :  { %v6236_v22 = vpop.f32.mrf.mxu0 }
 0x45e   :  { %v6238_v3 = vpop.f32.mrf.mxu0 }
 0x460   :  { %v6240_v6 = vpop.f32.mrf.mxu0 }
 0x462   :  { %v6242_v0 = vpop.f32.mrf.mxu0 }
 0x46a   :  { %v6193_v56 = vpop.f32.mrf.mxu1 }
 0x46b   :  { %v6194_v53 = vadd.f32 %v6193_v56, %v6151_v23 }
 0x46c   :  { %v6195_v10 = vpop.f32.mrf.mxu1 }
 0x46d   :  { %v6196_v31 = vadd.f32 %v6195_v10, %v6153_v4  ;;  %v6237_v1 = vadd.f32 %v6236_v22, %v6194_v53 }
 0x46e   :  { %v6197_v59 = vpop.f32.mrf.mxu1 }
 0x46f   :  { %v6198_v21 = vadd.f32 %v6197_v59, %v6155_v58  ;;  %v6239_v28 = vadd.f32 %v6238_v3, %v6196_v31  ;;  %v6247_v11 = vmax.f32 %v6237_v1, 0.0 }
 0x470   :  { %v6199_v48 = vpop.f32.mrf.mxu1 }
 0x471   :  { %v6241_v7 = vadd.f32 %v6240_v6, %v6198_v21  ;;  %v6200_v62 = vadd.f32 %v6199_v48, %v6157_v63  ;;  %v6248_v9 = vmax.f32 %v6239_v28, 0.0 }
 0x473   :  { %v6243_v2 = vadd.f32 %v6242_v0, %v6200_v62  ;;  %v6251_v8 = vmax.f32 %v6241_v7, 0.0 }
 0x475   :  { %v6252_v14 = vmax.f32 %v6243_v2, 0.0  ;;  %v6255_v27 = vpack.c.bf16 %v6251_v8, %v6247_v11 }
 0x477   :  { %v6256_v12 = vpack.c.bf16 %v6252_v14, %v6248_v9 }
 0x479   :  { %6593 = vmatprep.mubr.bf16.mxu1 %v6256_v12 }
 0x47a   :  { %6594 = vmatmul.mubr.bf16.vlgmr.msra.gmra.mxu1 %v6255_v27 }
 0x4b8   :  { %v7479_v47 = vpop.f32.mrf.mxu1 }
 0x4ba   :  { %v7480_v16 = vpop.f32.mrf.mxu1 }
 0x4bb   :  { %v7481_v19 = vadd.f32 %v7480_v16, %v7479_v47 }
 0x4bc   :  { %v7482_v17 = vpop.f32.mrf.mxu1 }
 0x4bd   :  { %v6555_v51 = vadd.f32 %v7481_v19, %v7430_v13 }
 0x4be   :  { %v7483_v18 = vpop.f32.mrf.mxu1 }
 0x4bf   :  { %v7484_v24 = vadd.f32 %v7483_v18, %v7482_v17 }
 0x4c1   :  { %v6558_v36 = vadd.f32 %v7484_v24, %v7430_v13 }
 0x53a   :  { %v7501_v20 = vpop.f32.mrf.mxu1 }
 0x53c   :  { %v7502_v5 = vpop.f32.mrf.mxu1 }
 0x53d   :  { %v7503_v50 = vadd.f32 %v7502_v5, %v7501_v20 }
 0x53e   :  { %v7504_v29 = vpop.f32.mrf.mxu1 }
 0x53f   :  { %v6596_v30 = vadd.f32 %v7503_v50, %v6555_v51 }
 0x540   :  { %v7505_v33 = vpop.f32.mrf.mxu1 }
 0x541   :  { %6602 = vst [vmem:[#allocation15] sm:$0xff] %v6596_v30  ;;  %v7506_v43 = vadd.f32 %v7505_v33, %v7504_v29 }
 0x543   :  { %v6599_v34 = vadd.f32 %v7506_v43, %v6558_v36 }
 0x545   :  { %6603 = vst [vmem:[#allocation15 + $0x8] sm:$0xff] %v6599_v34 }
 0x546   :  { %8931 = shalt.err (!%p8928_p11)
}
 0x547   :  { %s8966_s17 = smov 128   ;;  %s8967_s18 = smov 8  }
 0x548   :  { %6615 = dma.vmem_to_hbm [thread:$0]  %s6610_s6, 256, %s9240_s7, [#allocation5], %s8966_s17, %s8966_s17, %s8967_s18  }
 0x549   :  { %8948 = dma.done.wait [#allocation5], 256  }
 0x54a   :  { %8949 = vsyncadd [#allocation5], 4294967040 }
 0x54b   :  { %6619 = vsyncpa [#allocation4], 1 }
 0x54c   :  { %6620 = vsyncpa [#allocation7], 1 }
 0x54d   :  { %6621 = vsyncpa [#allocation10], 1 }
 0x54e   :  { %6622 = vsyncpa [#allocation13], 1 }
 0x54f   :  { %6623 = vsyncpa [#allocation5], 1 }

</bundles_post_ra>
